<compile_context>
chip_gen: v6e
topology: v6e:2x2x1
jax: 0.10.0
libtpu: 0.0.40
codegen_flags: <defaults>
</compile_context>

<pallas_src>
import functools

import jax
import jax.numpy as jnp
from jax.experimental import pallas as pl
from jax.experimental.pallas import tpu as pltpu


def _conv3d_kernel(x_ref, w_ref, b_ref, o_ref, *, K, Do, stride):
    """One batch-block of the conv.

    x_ref : (NB, Dp, HWCp)   bf16  padded input, (Hp, Wp, Cin) fused into the lane dim
    w_ref : (K, HWCp, WoC)   bf16  banded weight, one kd tap per leading slice
    b_ref : (1, WoC)         f32   bias tiled over (Ho, Wo)
    o_ref : (NB*Do, WoC)     f32   lane-dense output block
    """
    NB = x_ref.shape[0]
    HWCp = x_ref.shape[2]
    WoC = o_ref.shape[1]
    M = NB * Do

    # f32 accumulator lives in vregs; seeded with the bias so the epilogue add is free.
    acc = jnp.broadcast_to(b_ref[...], (M, WoC)).astype(jnp.float32)

    # K matmuls (one per kd tap); the whole (kh, kw, Cin) band is contracted at once.
    for kd in range(K):
        if stride == 1:
            lhs = x_ref[:, pl.ds(kd, Do), :]
        else:
            # TODO(synk): verify Mosaic lowers this strided sublane slice efficiently
            # for stride > 1 (the demo / module default path uses stride == 1).
            lhs = x_ref[:, pl.ds(kd, Do, stride), :]
        acc = acc + jnp.dot(
            lhs.reshape(M, HWCp),          # merges leading dims only
            w_ref[kd],
            preferred_element_type=jnp.float32,
        )

    o_ref[...] = acc.astype(o_ref.dtype)


def _pick_block_n(N, Do, max_nb=8):
    """Batch rows per grid step.

    Prefer >= 2 grid steps (v7x megacore split + DMA/compute pipelining) while keeping
    the matmul M dim (nb * Do) sublane-aligned.  Falls back to one full-size block when
    no divisor works (block == full array dims, so the (8,128) rule does not apply).
    """
    target = min(max_nb, max(1, N // 2))
    for nb in range(target, 0, -1):
        if N % nb == 0 and (nb * Do) % 8 == 0:
            return nb
    return N


@functools.partial(jax.jit, static_argnames=("stride", "padding"))
def post_vq_conv_forward(x, w, b, *, stride=1, padding=0):
    """post_vq_conv forward: Conv3d(ch_in, ch_out, k_size, stride, padding) + bias.

    x: (N, Cin, D, H, W)   w: (Cout, Cin, K, K, K)   b: (Cout,)
    returns (N, Cout, Do, Ho, Wo), matching PyTorch nn.Conv3d semantics.
    """
    N, Cin, D, H, W = x.shape
    Cout, Cin_w, K, K2, K3 = w.shape
    assert (Cin_w, K2, K3) == (Cin, K, K)
    p, s = padding, stride
    Do = (D + 2 * p - K) // s + 1
    Ho = (H + 2 * p - K) // s + 1
    Wo = (W + 2 * p - K) // s + 1
    Dp, Hp, Wp = D + 2 * p, H + 2 * p, W + 2 * p

    HWC = Hp * Wp * Cin
    HWCp = ((HWC + 127) // 128) * 128           # lane-pad the fused contraction dim
    WoC = Ho * Wo * Cout

    # ---- glue (one HBM pass): channels-last, spatial pad, fuse+pad lanes, bf16 ----
    x_cl = jnp.transpose(x, (0, 2, 3, 4, 1))                        # (N, D, H, W, Cin)
    xp = jnp.pad(x_cl, ((0, 0), (p, p), (p, p), (p, p), (0, 0)))    # (N, Dp, Hp, Wp, Cin)
    xf = xp.reshape(N, Dp, HWC)
    xf = jnp.pad(xf, ((0, 0), (0, 0), (0, HWCp - HWC))).astype(jnp.bfloat16)

    # ---- banded weight: wb[kd, (hi,wi,ci), (ho,wo,co)] = w[co,ci,kd,hi-ho*s,wi-wo*s] ----
    wt = jnp.transpose(w, (2, 3, 4, 1, 0))            # (K, K, K, Cin, Cout) [kd,kh,kw,ci,co]
    hi = jnp.arange(Hp)
    ho = jnp.arange(Ho)
    wi = jnp.arange(Wp)
    wo = jnp.arange(Wo)
    kh_idx = hi[:, None] - ho[None, :] * s            # (Hp, Ho)
    kw_idx = wi[:, None] - wo[None, :] * s            # (Wp, Wo)
    kh_ok = (kh_idx >= 0) & (kh_idx < K)
    kw_ok = (kw_idx >= 0) & (kw_idx < K)
    kh_safe = jnp.clip(kh_idx, 0, K - 1)
    kw_safe = jnp.clip(kw_idx, 0, K - 1)
    band = wt[:, kh_safe[:, :, None, None], kw_safe[None, None, :, :], :, :]
    #      -> (K, Hp, Ho, Wp, Wo, Cin, Cout)
    valid = kh_ok[:, :, None, None] & kw_ok[None, None, :, :]       # (Hp, Ho, Wp, Wo)
    band = band * valid[None, :, :, :, :, None, None].astype(band.dtype)
    wb = jnp.transpose(band, (0, 1, 3, 5, 2, 4, 6)).reshape(K, HWC, WoC)
    wb = jnp.pad(wb, ((0, 0), (0, HWCp - HWC), (0, 0))).astype(jnp.bfloat16)

    # Bias tiled over (Ho, Wo) to match the fused output lane layout; f32 (accumulator seed).
    b_f = jnp.tile(b.astype(jnp.float32), Ho * Wo).reshape(1, WoC)

    # ---- pallas call: grid over batch blocks (>= 2 steps whenever the batch allows) ----
    block_n = _pick_block_n(N, Do)
    grid = (N // block_n,)
    M_blk = block_n * Do

    out2d = pl.pallas_call(
        functools.partial(_conv3d_kernel, K=K, Do=Do, stride=s),
        out_shape=jax.ShapeDtypeStruct((N * Do, WoC), x.dtype),
        grid_spec=pltpu.PrefetchScalarGridSpec(
            num_scalar_prefetch=0,
            grid=grid,
            in_specs=[
                pl.BlockSpec((block_n, Dp, HWCp), lambda n: (n, 0, 0)),
                # invariant operands (constant index_map); ~3 MB bf16 weight even
                # double-buffered is far under scoped VMEM on every generation.
                pl.BlockSpec((K, HWCp, WoC), lambda n: (0, 0, 0)),
                pl.BlockSpec((1, WoC), lambda n: (0, 0)),
            ],
            out_specs=pl.BlockSpec((M_blk, WoC), lambda n: (n, 0)),
        ),
        compiler_params=pltpu.CompilerParams(dimension_semantics=("parallel",)),
    )(xf, wb, b_f)

    # ---- back to PyTorch NCDHW (one HBM pass) ----
    out = out2d.reshape(N, Do, Ho, Wo, Cout)
    return jnp.transpose(out, (0, 4, 1, 2, 3))


if __name__ == "__main__":
    # Module config: post_vq_conv(ch_in=4, ch_out=16, k_size=3, stride=1, p=1)
    # (p=1 -> Ho*Wo*Cout = 1024 lane-dense output; Hp*Wp*Cin = 400 padded to 512 lanes;
    #  N=8 -> block_n=4 -> grid=(2,) so the parallel axis can use both v7x TensorCores.)
    N, Cin, Cout, K, S, P = 8, 4, 16, 3, 1, 1
    D = H = W = 8

    key = jax.random.PRNGKey(0)
    kx, kw_, kb = jax.random.split(key, 3)
    x = jax.random.normal(kx, (N, Cin, D, H, W), jnp.float32)
    w = jax.random.normal(kw_, (Cout, Cin, K, K, K), jnp.float32) * 0.1
    b = jax.random.normal(kb, (Cout,), jnp.float32) * 0.1

    out = post_vq_conv_forward(x, w, b, stride=S, padding=P)
    out = jax.block_until_ready(out)

    # Reference uses the same bf16 input/weight quantization the kernel feeds the MXU
    # (accumulation is f32 in both), so the numerical check stays tight.
    xq = x.astype(jnp.bfloat16).astype(jnp.float32)
    wq = w.astype(jnp.bfloat16).astype(jnp.float32)
    ref = jax.lax.conv_general_dilated(
        xq, wq, window_strides=(S, S, S), padding=[(P, P)] * 3,
        dimension_numbers=("NCDHW", "OIDHW", "NCDHW"),
        precision=jax.lax.Precision.HIGHEST) + b.reshape(1, Cout, 1, 1, 1)

    assert out.shape == ref.shape, (out.shape, ref.shape)
    err = float(jnp.max(jnp.abs(out - ref)))
    assert jnp.allclose(out, ref, atol=1e-2, rtol=1e-2), err

    print("KERNEL_OK")
</pallas_src>

<mosaic_0001>
module attributes {stable_mosaic.version = 11 : i64} {
  func.func @_conv3d_kernel(%arg0: i32, %arg1: memref<4x10x512xbf16, #tpu.memory_space<vmem>>, %arg2: memref<3x512x1024xbf16, #tpu.memory_space<vmem>>, %arg3: memref<1x1024xf32, #tpu.memory_space<vmem>>, %arg4: memref<32x1024xf32, #tpu.memory_space<vmem>>) attributes {dimension_semantics = [#tpu.dimension_semantics<parallel>], iteration_bounds = array<i64: 2>, scalar_prefetch = 0 : i64, scratch_operands = 0 : i64, tpu.core_type = #tpu.core_type<tc>, window_params = [{transform_indices = @transform_0, window_bounds = array<i64: 4, 10, 512>}, {pipeline_mode = #tpu.pipeline_mode<synchronous>, transform_indices = @transform_1, window_bounds = array<i64: 3, 512, 1024>}, {pipeline_mode = #tpu.pipeline_mode<synchronous>, transform_indices = @transform_2, window_bounds = array<i64: 1, 1024>}, {transform_indices = @transform_3, window_bounds = array<i64: 32, 1024>}]} {
    %c0 = arith.constant 0 : index
    %c0_0 = arith.constant 0 : index
    %0 = vector.load %arg3[%c0, %c0_0] : memref<1x1024xf32, #tpu.memory_space<vmem>>, vector<1x1024xf32>
    %1 = vector.shape_cast %0 : vector<1x1024xf32> to vector<1x1024xf32>
    %2 = vector.broadcast %1 : vector<1x1024xf32> to vector<32x1024xf32>
    %c0_1 = arith.constant 0 : index
    %c0_2 = arith.constant 0 : index
    %c0_3 = arith.constant 0 : index
    %3 = vector.load %arg1[%c0_1, %c0_2, %c0_3] : memref<4x10x512xbf16, #tpu.memory_space<vmem>>, vector<4x8x512xbf16>
    %4 = vector.shape_cast %3 : vector<4x8x512xbf16> to vector<32x512xbf16>
    %c0_4 = arith.constant 0 : index
    %c0_5 = arith.constant 0 : index
    %c0_6 = arith.constant 0 : index
    %5 = vector.load %arg2[%c0_4, %c0_5, %c0_6] : memref<3x512x1024xbf16, #tpu.memory_space<vmem>>, vector<1x512x1024xbf16>
    %6 = vector.shape_cast %5 : vector<1x512x1024xbf16> to vector<512x1024xbf16>
    %cst = arith.constant dense<0.000000e+00> : vector<32x1024xf32>
    %7 = tpu.matmul %4, %6, %cst {dimension_numbers = #tpu.dot_dimension_numbers<[1], [0], [0], [1], [0, 0, 1, 1], [], []>} : vector<32x512xbf16>, vector<512x1024xbf16>, vector<32x1024xf32> -> vector<32x1024xf32>
    %8 = arith.addf %2, %7 : vector<32x1024xf32>
    %c0_7 = arith.constant 0 : index
    %c1 = arith.constant 1 : index
    %c0_8 = arith.constant 0 : index
    %9 = vector.load %arg1[%c0_7, %c1, %c0_8] : memref<4x10x512xbf16, #tpu.memory_space<vmem>>, vector<4x8x512xbf16>
    %10 = vector.shape_cast %9 : vector<4x8x512xbf16> to vector<32x512xbf16>
    %c1_9 = arith.constant 1 : index
    %c0_10 = arith.constant 0 : index
    %c0_11 = arith.constant 0 : index
    %11 = vector.load %arg2[%c1_9, %c0_10, %c0_11] : memref<3x512x1024xbf16, #tpu.memory_space<vmem>>, vector<1x512x1024xbf16>
    %12 = vector.shape_cast %11 : vector<1x512x1024xbf16> to vector<512x1024xbf16>
    %cst_12 = arith.constant dense<0.000000e+00> : vector<32x1024xf32>
    %13 = tpu.matmul %10, %12, %cst_12 {dimension_numbers = #tpu.dot_dimension_numbers<[1], [0], [0], [1], [0, 0, 1, 1], [], []>} : vector<32x512xbf16>, vector<512x1024xbf16>, vector<32x1024xf32> -> vector<32x1024xf32>
    %14 = arith.addf %8, %13 : vector<32x1024xf32>
    %c0_13 = arith.constant 0 : index
    %c2 = arith.constant 2 : index
    %c0_14 = arith.constant 0 : index
    %15 = vector.load %arg1[%c0_13, %c2, %c0_14] : memref<4x10x512xbf16, #tpu.memory_space<vmem>>, vector<4x8x512xbf16>
    %16 = vector.shape_cast %15 : vector<4x8x512xbf16> to vector<32x512xbf16>
    %c2_15 = arith.constant 2 : index
    %c0_16 = arith.constant 0 : index
    %c0_17 = arith.constant 0 : index
    %17 = vector.load %arg2[%c2_15, %c0_16, %c0_17] : memref<3x512x1024xbf16, #tpu.memory_space<vmem>>, vector<1x512x1024xbf16>
    %18 = vector.shape_cast %17 : vector<1x512x1024xbf16> to vector<512x1024xbf16>
    %cst_18 = arith.constant dense<0.000000e+00> : vector<32x1024xf32>
    %19 = tpu.matmul %16, %18, %cst_18 {dimension_numbers = #tpu.dot_dimension_numbers<[1], [0], [0], [1], [0, 0, 1, 1], [], []>} : vector<32x512xbf16>, vector<512x1024xbf16>, vector<32x1024xf32> -> vector<32x1024xf32>
    %20 = arith.addf %14, %19 : vector<32x1024xf32>
    %c0_19 = arith.constant 0 : index
    %c0_20 = arith.constant 0 : index
    %21 = vector.load %arg4[%c0_19, %c0_20] : memref<32x1024xf32, #tpu.memory_space<vmem>>, vector<32x1024xf32>
    tpu.vector_store %arg4[%c0_19, %c0_20], %20 {strides = array<i32>} : memref<32x1024xf32, #tpu.memory_space<vmem>>, vector<32x1024xf32>,
    return
  }
  func.func @transform_0(%arg0: i32) -> (i32, i32, i32) {
    %c0_i32 = arith.constant 0 : i32
    %c0_i32_0 = arith.constant 0 : i32
    %c0_i32_1 = arith.constant 0 : i32
    return %arg0, %c0_i32, %c0_i32_0 : i32, i32, i32
  }
  func.func @transform_1(%arg0: i32) -> (i32, i32, i32) {
    %c0_i32 = arith.constant 0 : i32
    %c0_i32_0 = arith.constant 0 : i32
    %c0_i32_1 = arith.constant 0 : i32
    %c0_i32_2 = arith.constant 0 : i32
    return %c0_i32, %c0_i32_0, %c0_i32_1 : i32, i32, i32
  }
  func.func @transform_2(%arg0: i32) -> (i32, i32) {
    %c0_i32 = arith.constant 0 : i32
    %c0_i32_0 = arith.constant 0 : i32
    %c0_i32_1 = arith.constant 0 : i32
    return %c0_i32, %c0_i32_0 : i32, i32
  }
  func.func @transform_3(%arg0: i32) -> (i32, i32) {
    %c0_i32 = arith.constant 0 : i32
    %c0_i32_0 = arith.constant 0 : i32
    return %arg0, %c0_i32 : i32, i32
  }
}

</mosaic_0001>

<bundles_post_ra>
// kernel: tile.8
= control target key start
LH: loop header
LB: loop body
LE: loop exit
PB: predicated region body
PF: predicated region fallthrough
CT: control target
= control target key end

     0   :  { %s64_s0 = inlined_call_operand.vmem [shape: f32[16], index: 0, kind: input, shape index: {}]   ;;  %s65_s1 = inlined_call_operand.vmem [shape: f32[64,16], index: 1, kind: output, shape index: {}]  }
   0x1   :  { %v4_v0 = vld [vmem:[%s64_s0] ss:$0 sm:$0xff] }
   0x2   :  { %5 = vst [vmem:[%s65_s1] sm:$0xff] %v4_v0  ;;  %20 = vst [vmem:[%s65_s1 + $0x8] sm:$0xff] %v4_v0 }
   0x3   :  { %21 = vst [vmem:[%s65_s1 + $0x10] sm:$0xff] %v4_v0  ;;  %22 = vst [vmem:[%s65_s1 + $0x18] sm:$0xff] %v4_v0 }
   0x4   :  { %23 = vst [vmem:[%s65_s1 + $0x20] sm:$0xff] %v4_v0  ;;  %24 = vst [vmem:[%s65_s1 + $0x28] sm:$0xff] %v4_v0 }
   0x5   :  { %25 = vst [vmem:[%s65_s1 + $0x30] sm:$0xff] %v4_v0  ;;  %26 = vst [vmem:[%s65_s1 + $0x38] sm:$0xff] %v4_v0 }

// kernel: tile.9
= control target key start
LH: loop header
LB: loop body
LE: loop exit
PB: predicated region body
PF: predicated region fallthrough
CT: control target
= control target key end

     0   :  { %vm4_vm0 = vcmask 1047556   ;;  %s176_s16 = smov 112   ;;  %s177_s19 = smov 80   ;;  %vm6_vm1 = vcmask 130048   ;;  %vm17_vm2 = vcmask 1048448   ;;  %vm28_vm3 = vcmask 917248   ;;  %s273_s0 = inlined_call_operand.vmem [shape: f32[64,16], index: 0, kind: input, shape index: {}]   ;;  %s274_s1 = inlined_call_operand.vmem [shape: f32[1,1024], index: 1, kind: output, shape index: {}]  }
   0x1   :  { %v148_v0 = vld [vmem:[%s273_s0 + $0x7] ss:$8 sm:$0xf]   ;;  %v152_v2 = vld [vmem:[%s273_s0 + $0x5] ss:$8 sm:$0xf]  }
   0x2   :  { %v149_v1 = vld [vmem:[%s273_s0 + $0x7] ss:$8 sm:$0xf0]   ;;  %v153_v4 = vld [vmem:[%s273_s0 + $0x5] ss:$8 sm:$0xf0]  }
   0x3   :  { %v14_v3 = vsel %vm4_vm0, %v149_v1, %v148_v0  ;;  %v150_v5 = vld [vmem:[%s273_s0 + $0x6] ss:$8 sm:$0xf]   ;;  %v36_v6 = vsel %vm4_vm0, %v153_v4, %v152_v2  ;;  %v154_v9 = vld [vmem:[%s273_s0 + $0x4] ss:$8 sm:$0xf]  }
   0x4   :  { %15 = vrot.lane.b32.xlu0 %v14_v3, %s176_s16  ;;  %v151_v7 = vld [vmem:[%s273_s0 + $0x6] ss:$8 sm:$0xf0]   ;;  %37 = vrot.lane.b32.xlu1 %v36_v6, %s177_s19  ;;  %v155_v10 = vld [vmem:[%s273_s0 + $0x4] ss:$8 sm:$0xf0]  }
   0x5   :  { %v25_v8 = vsel %vm4_vm0, %v151_v7, %v150_v5  ;;  %v47_v11 = vsel %vm4_vm0, %v155_v10, %v154_v9  ;;  %v156_v12 = vld [vmem:[%s273_s0 + $0x3] ss:$8 sm:$0xf]   ;;  %v158_v14 = vld [vmem:[%s273_s0 + $0x2] ss:$8 sm:$0xf]  }
   0x6   :  { %v157_v13 = vld [vmem:[%s273_s0 + $0x3] ss:$8 sm:$0xf0]   ;;  %s178_s30 = smov 96   ;;  %s179_s4 = smov 64   ;;  %vm39_vm4 = vcmask 786048  }
   0x7   :  { %v159_v15 = vld [vmem:[%s273_s0 + $0x2] ss:$8 sm:$0xf0]   ;;  %v58_v16 = vsel %vm4_vm0, %v157_v13, %v156_v12  ;;  %v160_v17 = vld [vmem:[%s273_s0 + $0x1] ss:$8 sm:$0xf]  }
   0x8   :  { %26 = vrot.lane.b32.xlu0 %v25_v8, %s178_s30  ;;  %48 = vrot.lane.b32.xlu1 %v47_v11, %s179_s4  ;;  %v161_v18 = vld [vmem:[%s273_s0 + $0x1] ss:$8 sm:$0xf0]   ;;  %v69_v19 = vsel %vm4_vm0, %v159_v15, %v158_v14  ;;  %v2_v20 = vld [vmem:[%s273_s0] ss:$8 sm:$0xf]  }
   0x9   :  { %v3_v21 = vld [vmem:[%s273_s0] ss:$8 sm:$0xf0]   ;;  %s180_s0 = smov 48   ;;  %s181_s13 = smov 32   ;;  %v80_v23 = vsel %vm4_vm0, %v161_v18, %v160_v17  ;;  %vm50_vm5 = vcmask 654848  }
   0xa   :  { %v5_v22 = vsel %vm4_vm0, %v3_v21, %v2_v20  ;;  %s182_s14 = smov 16   ;;  %vm61_vm6 = vcmask 523648   ;;  %vm72_vm7 = vcmask 392448   ;;  %vm83_vm8 = vcmask 261248  }
   0xb   :  { %7 = vst.msk [vmem:[#allocation0] ss:$8 sm:$0xf] %vm6_vm1, %v5_v22   ;;  %8 = vst.msk [vmem:[#allocation0] ss:$8 sm:$0xf0] %vm6_vm1, %v5_v22  }
   0xc   :  { %59 = vrot.lane.b32.xlu0 %v58_v16, %s180_s0  ;;  %70 = vrot.lane.b32.xlu1 %v69_v19, %s181_s13 }
  0x10   :  { %81 = vrot.lane.b32.xlu0 %v80_v23, %s182_s14 }
  0x76   :  { %v16_v24 = vpop.permute.xlu0 %15   ;;  %v38_v25 = vpop.permute.xlu1 %37  }
  0x77   :  { %18 = vst.msk [vmem:[#allocation0] ss:$8 sm:$0xf] %vm17_vm2, %v16_v24   ;;  %19 = vst.msk [vmem:[#allocation0] ss:$8 sm:$0xf0] %vm17_vm2, %v16_v24  }
  0x7a   :  { %v27_v26 = vpop.permute.xlu0 %26   ;;  %v49_v27 = vpop.permute.xlu1 %48  }
  0x7b   :  { %29 = vst.msk [vmem:[#allocation0] ss:$8 sm:$0xf] %vm28_vm3, %v27_v26   ;;  %30 = vst.msk [vmem:[#allocation0] ss:$8 sm:$0xf0] %vm28_vm3, %v27_v26  }
  0x7c   :  { %40 = vst.msk [vmem:[#allocation0] ss:$8 sm:$0xf] %vm39_vm4, %v38_v25   ;;  %41 = vst.msk [vmem:[#allocation0] ss:$8 sm:$0xf0] %vm39_vm4, %v38_v25  }
  0x7d   :  { %51 = vst.msk [vmem:[#allocation0] ss:$8 sm:$0xf] %vm50_vm5, %v49_v27   ;;  %52 = vst.msk [vmem:[#allocation0] ss:$8 sm:$0xf0] %vm50_vm5, %v49_v27  }
  0x7e   :  { %v60_v28 = vpop.permute.xlu0 %59   ;;  %v71_v29 = vpop.permute.xlu1 %70  }
  0x7f   :  { %62 = vst.msk [vmem:[#allocation0] ss:$8 sm:$0xf] %vm61_vm6, %v60_v28   ;;  %63 = vst.msk [vmem:[#allocation0] ss:$8 sm:$0xf0] %vm61_vm6, %v60_v28  }
  0x80   :  { %73 = vst.msk [vmem:[#allocation0] ss:$8 sm:$0xf] %vm72_vm7, %v71_v29   ;;  %74 = vst.msk [vmem:[#allocation0] ss:$8 sm:$0xf0] %vm72_vm7, %v71_v29  }
  0x82   :  { %v82_v30 = vpop.permute.xlu0 %81  }
  0x83   :  { %84 = vst.msk [vmem:[#allocation0] ss:$8 sm:$0xf] %vm83_vm8, %v82_v30   ;;  %85 = vst.msk [vmem:[#allocation0] ss:$8 sm:$0xf0] %vm83_vm8, %v82_v30  }
  0x8a   :  { %v90_v31 = vld [vmem:[#allocation0] sm:$0x1]  ;;  %v95_v32 = vld [vmem:[#allocation0 + $0x8] sm:$0x1]  ;;  %v101_v33 = vld [vmem:[#allocation0 + $0x10] sm:$0x1] }
  0x8b   :  { %93 = vst [vmem:[%s274_s1] sm:$0x1] %v90_v31  ;;  %162 = vst [vmem:[%s274_s1 + $0x1] sm:$0x1] %v95_v32  ;;  %v108_v34 = vld [vmem:[#allocation0 + $0x18] sm:$0x1] }
  0x8c   :  { %163 = vst [vmem:[%s274_s1 + $0x2] sm:$0x1] %v101_v33  ;;  %v115_v35 = vld [vmem:[#allocation0 + $0x20] sm:$0x1]  ;;  %v122_v36 = vld [vmem:[#allocation0 + $0x28] sm:$0x1] }
  0x8d   :  { %164 = vst [vmem:[%s274_s1 + $0x3] sm:$0x1] %v108_v34  ;;  %165 = vst [vmem:[%s274_s1 + $0x4] sm:$0x1] %v115_v35  ;;  %v129_v37 = vld [vmem:[#allocation0 + $0x30] sm:$0x1] }
  0x8e   :  { %166 = vst [vmem:[%s274_s1 + $0x5] sm:$0x1] %v122_v36  ;;  %v136_v38 = vld [vmem:[#allocation0 + $0x38] sm:$0x1]  ;;  %167 = vst [vmem:[%s274_s1 + $0x6] sm:$0x1] %v129_v37 }
  0x8f   :  { %168 = vst [vmem:[%s274_s1 + $0x7] sm:$0x1] %v136_v38 }

// kernel: post_vq_conv_forward.1
= control target key start
LH: loop header
LB: loop body
LE: loop exit
PB: predicated region body
PF: predicated region fallthrough
CT: control target
= control target key end

     0   :  { %s7963_s12 = smov 0   ;;  %s10888_s0 = inlined_call_operand.vmem [shape: bf16[8,10,512], index: 0, kind: input, shape index: {}]   ;;  %s10889_s1 = inlined_call_operand.vmem [shape: bf16[3,512,1024], index: 1, kind: input, shape index: {}]   ;;  %s10890_s2 = inlined_call_operand.vmem [shape: f32[1,1024], index: 2, kind: input, shape index: {}]   ;;  %s10891_s3 = inlined_call_operand.vmem [shape: f32[64,1024], index: 3, kind: output, shape index: {}]  }
   0x1 LB: > { %s6591_s13 = sadd.s32 4294967295, %s7941_s12   ;;  %p6595_p0 = scmp.ge.s32.totalorder %s7941_s12, 1  ;;  %s7941_s12 = sphi %s7963_s12, %s13_s12  }
   0x2   : > { %p139_p1 = scmp.lt.s32.totalorder %s7941_s12, 3 }
   0x4   : > { %p140_p2 = pnand %p6595_p0, %p139_p1 }
   0x6   : > { %143 = sbr.rel (%p140_p2) target bundleno = 999 (0x3e7), region = 32 }
   0xb   : > { %v285_v0 = vld [vmem:[%s10889_s1 + $0x1c0] sm:$0xff]  ;;  %s6596_s11 = sshll.u32 %s6591_s13, 2  ;;  %vm2277_vm0 = vsmask.f32 3328  ;;  %vm2278_vm1 = vsmask.f32 7440 }
   0xc   : > { %v289_v1 = vld [vmem:[%s10889_s1 + $0x1e0] sm:$0xff]  ;;  %p166_p3 = scmp.lt.s32.totalorder %s6596_s11, 7  ;;  %vm8868_vm2 = vmor %vm2277_vm0, %vm2278_vm1  ;;  %vm4441_vm3 = vcmask 1042432   ;;  %vm4442_vm4 = vcmask 1046532  }
   0xd   : > { %v413_v2 = vld [vmem:[%s10889_s1 + $0x5c0] sm:$0xff]  ;;  %v6667_v3 = vcombine.high %v285_v0, %v289_v1  ;;  %v6666_v5 = vcombine.low %v285_v0, %v289_v1  ;;  %vm9801_vm5 = vmor %vm4441_vm3, %vm4442_vm4 }
   0xe   : > { %v417_v4 = vld [vmem:[%s10889_s1 + $0x5e0] sm:$0xff]  ;;  %s10941_s11 = smov (!%p166_p3, %s6596_s11), 7 }
   0xf   : > { %v277_v6 = vld [vmem:[%s10889_s1 + $0x180] sm:$0xff]  ;;  %v6795_v8 = vcombine.high %v413_v2, %v417_v4  ;;  %v6794_v9 = vcombine.low %v413_v2, %v417_v4  ;;  %1805 = vmatprep.subr.bf16.mxu0 %v6667_v3  ;;  %s7916_s10 = sshll.u32 %s10941_s11, 5  ;;  %s7917_s28 = sshll.u32 %s10941_s11, 6 }
  0x10   : > { %v281_v7 = vld [vmem:[%s10889_s1 + $0x1a0] sm:$0xff]  ;;  %1806 = vmatpush1.bf16.msra.mxu0 %v6666_v5  ;;  %s8055_s20 = scalar_lea.vmem %s10888_s0, %s7916_s10  ;;  %s10810_s30 = scalar_lea.vmem %s10891_s3, %s7917_s28 }
  0x11   : > { %v6659_v10 = vcombine.high %v277_v6, %v281_v7  ;;  %v405_v11 = vld [vmem:[%s10889_s1 + $0x580] sm:$0xff]  ;;  %1858 = vmatprep.subr.bf16.mxu1 %v6795_v8  ;;  %v6658_v18 = vcombine.low %v277_v6, %v281_v7  ;;  %v8080_v59 = vld [vmem:[%s8055_s20 + $0x8] sm:$0xff] }
  0x12   : > { %v409_v12 = vld [vmem:[%s10889_s1 + $0x5a0] sm:$0xff]  ;;  %1859 = vmatpush1.bf16.msra.mxu1 %v6794_v9  ;;  %v8083_v60 = vld [vmem:[%s8055_s20 + $0x28] sm:$0xff] }
  0x13   : > { %v269_v13 = vld [vmem:[%s10889_s1 + $0x140] sm:$0xff]  ;;  %v6787_v14 = vcombine.high %v405_v11, %v409_v12  ;;  %1807 = vmatprep.subr.bf16.mxu0 %v6659_v10  ;;  %v6786_v19 = vcombine.low %v405_v11, %v409_v12  ;;  %v8093_v63 = vcombine.high %v8080_v59, %v8083_v60 }
  0x14   : > { %v273_v15 = vld [vmem:[%s10889_s1 + $0x160] sm:$0xff]  ;;  %1808 = vmatpush1.bf16.msra.mxu0 %v6658_v18 }
  0x15   : > { %v397_v16 = vld [vmem:[%s10889_s1 + $0x540] sm:$0xff]  ;;  %v6651_v20 = vcombine.high %v269_v13, %v273_v15  ;;  %1860 = vmatprep.subr.bf16.mxu1 %v6787_v14  ;;  %v6650_v26 = vcombine.low %v269_v13, %v273_v15  ;;  %1890 = vmatprep.mubr.bf16.mxu1 %v8093_v63 }
  0x16   : > { %v401_v17 = vld [vmem:[%s10889_s1 + $0x560] sm:$0xff]  ;;  %1861 = vmatpush1.bf16.msra.mxu1 %v6786_v19 }
  0x17   : > { %v6779_v21 = vcombine.high %v397_v16, %v401_v17  ;;  %v261_v22 = vld [vmem:[%s10889_s1 + $0x100] sm:$0xff]  ;;  %1809 = vmatprep.subr.bf16.mxu0 %v6651_v20  ;;  %v6778_v27 = vcombine.low %v397_v16, %v401_v17 }
  0x18   : > { %v265_v23 = vld [vmem:[%s10889_s1 + $0x120] sm:$0xff]  ;;  %1810 = vmatpush1.bf16.msra.mxu0 %v6650_v26 }
  0x19   : > { %v389_v24 = vld [vmem:[%s10889_s1 + $0x500] sm:$0xff]  ;;  %v6643_v28 = vcombine.high %v261_v22, %v265_v23  ;;  %1862 = vmatprep.subr.bf16.mxu1 %v6779_v21  ;;  %v6642_v34 = vcombine.low %v261_v22, %v265_v23 }
  0x1a   : > { %v393_v25 = vld [vmem:[%s10889_s1 + $0x520] sm:$0xff]  ;;  %1863 = vmatpush1.bf16.msra.mxu1 %v6778_v27 }
  0x1b   : > { %v6771_v29 = vcombine.high %v389_v24, %v393_v25  ;;  %v253_v30 = vld [vmem:[%s10889_s1 + $0xc0] sm:$0xff]  ;;  %1811 = vmatprep.subr.bf16.mxu0 %v6643_v28  ;;  %v6770_v35 = vcombine.low %v389_v24, %v393_v25 }
  0x1c   : > { %v257_v31 = vld [vmem:[%s10889_s1 + $0xe0] sm:$0xff]  ;;  %1812 = vmatpush1.bf16.msra.mxu0 %v6642_v34 }
  0x1d   : > { %v381_v32 = vld [vmem:[%s10889_s1 + $0x4c0] sm:$0xff]  ;;  %v6635_v36 = vcombine.high %v253_v30, %v257_v31  ;;  %1864 = vmatprep.subr.bf16.mxu1 %v6771_v29  ;;  %v6634_v42 = vcombine.low %v253_v30, %v257_v31 }
  0x1e   : > { %v385_v33 = vld [vmem:[%s10889_s1 + $0x4e0] sm:$0xff]  ;;  %1865 = vmatpush1.bf16.msra.mxu1 %v6770_v35 }
  0x1f   : > { %v6763_v37 = vcombine.high %v381_v32, %v385_v33  ;;  %v245_v38 = vld [vmem:[%s10889_s1 + $0x80] sm:$0xff]  ;;  %1813 = vmatprep.subr.bf16.mxu0 %v6635_v36  ;;  %v6762_v43 = vcombine.low %v381_v32, %v385_v33 }
  0x20   : > { %v249_v39 = vld [vmem:[%s10889_s1 + $0xa0] sm:$0xff]  ;;  %1814 = vmatpush1.bf16.msra.mxu0 %v6634_v42 }
  0x21   : > { %v373_v40 = vld [vmem:[%s10889_s1 + $0x480] sm:$0xff]  ;;  %v6627_v44 = vcombine.high %v245_v38, %v249_v39  ;;  %1866 = vmatprep.subr.bf16.mxu1 %v6763_v37  ;;  %v6626_v50 = vcombine.low %v245_v38, %v249_v39 }
  0x22   : > { %v377_v41 = vld [vmem:[%s10889_s1 + $0x4a0] sm:$0xff]  ;;  %1867 = vmatpush1.bf16.msra.mxu1 %v6762_v43 }
  0x23   : > { %v6755_v45 = vcombine.high %v373_v40, %v377_v41  ;;  %v237_v46 = vld [vmem:[%s10889_s1 + $0x40] sm:$0xff]  ;;  %1815 = vmatprep.subr.bf16.mxu0 %v6627_v44  ;;  %v6754_v51 = vcombine.low %v373_v40, %v377_v41 }
  0x24   : > { %v241_v47 = vld [vmem:[%s10889_s1 + $0x60] sm:$0xff]  ;;  %1816 = vmatpush1.bf16.msra.mxu0 %v6626_v50 }
  0x25   : > { %v365_v48 = vld [vmem:[%s10889_s1 + $0x440] sm:$0xff]  ;;  %v6619_v52 = vcombine.high %v237_v46, %v241_v47  ;;  %1868 = vmatprep.subr.bf16.mxu1 %v6755_v45  ;;  %v6618_v0 = vcombine.low %v237_v46, %v241_v47 }
  0x26   : > { %v369_v49 = vld [vmem:[%s10889_s1 + $0x460] sm:$0xff]  ;;  %1869 = vmatpush1.bf16.msra.mxu1 %v6754_v51 }
  0x27   : > { %v229_v53 = vld [vmem:[%s10889_s1] sm:$0xff]  ;;  %v6747_v56 = vcombine.high %v365_v48, %v369_v49  ;;  %1817 = vmatprep.subr.bf16.mxu0 %v6619_v52  ;;  %v6746_v1 = vcombine.low %v365_v48, %v369_v49 }
  0x28   : > { %v8067_v54 = vld [vmem:[%s8055_s20] sm:$0xff]  ;;  %1818 = vmatpush1.bf16.msra.mxu0 %v6618_v0 }
  0x29   : > { %v8070_v55 = vld [vmem:[%s8055_s20 + $0x20] sm:$0xff]  ;;  %1870 = vmatprep.subr.bf16.mxu1 %v6747_v56 }
  0x2a   : > { %v233_v57 = vld [vmem:[%s10889_s1 + $0x20] sm:$0xff]  ;;  %v8077_v58 = vcombine.high %v8067_v54, %v8070_v55  ;;  %1871 = vmatpush1.bf16.msra.mxu1 %v6746_v1 }
  0x2b   : > { %v357_v61 = vld [vmem:[%s10889_s1 + $0x400] sm:$0xff]  ;;  %v6611_v2 = vcombine.high %v229_v53, %v233_v57  ;;  %v6610_v8 = vcombine.low %v229_v53, %v233_v57 }
  0x2c   : > { %v361_v62 = vld [vmem:[%s10889_s1 + $0x420] sm:$0xff]  ;;  %1837 = vmatprep.mubr.bf16.mxu0 %v8077_v58 }
  0x2d   : > { %v6739_v3 = vcombine.high %v357_v61, %v361_v62  ;;  %v349_v4 = vld [vmem:[%s10889_s1 + $0x3c0] sm:$0xff]  ;;  %1819 = vmatprep.subr.bf16.mxu0 %v6611_v2  ;;  %v6738_v9 = vcombine.low %v357_v61, %v361_v62 }
  0x2e   : > { %v353_v5 = vld [vmem:[%s10889_s1 + $0x3e0] sm:$0xff]  ;;  %1820 = vmatpush1.bf16.msra.mxu0 %v6610_v8 }
  0x2f   : > { %v477_v6 = vld [vmem:[%s10889_s1 + $0x7c0] sm:$0xff]  ;;  %v6731_v10 = vcombine.high %v349_v4, %v353_v5  ;;  %1872 = vmatprep.subr.bf16.mxu1 %v6739_v3  ;;  %v6730_v16 = vcombine.low %v349_v4, %v353_v5 }
  0x30   : > { %v481_v7 = vld [vmem:[%s10889_s1 + $0x7e0] sm:$0xff]  ;;  %1873 = vmatpush1.bf16.msra.mxu1 %v6738_v9 }
  0x31   : > { %v6859_v11 = vcombine.high %v477_v6, %v481_v7  ;;  %v341_v12 = vld [vmem:[%s10889_s1 + $0x380] sm:$0xff]  ;;  %1821 = vmatprep.subr.bf16.mxu0 %v6731_v10  ;;  %v6858_v17 = vcombine.low %v477_v6, %v481_v7  ;;  %v286_v10 = vld [vmem:[%s10889_s1 + $0x1c8] sm:$0xff] }
  0x32   : > { %v345_v13 = vld [vmem:[%s10889_s1 + $0x3a0] sm:$0xff]  ;;  %1822 = vmatpush2.bf16.msra.mxu0 %v6730_v16 }
  0x33   : > { %v469_v14 = vld [vmem:[%s10889_s1 + $0x780] sm:$0xff]  ;;  %v6723_v18 = vcombine.high %v341_v12, %v345_v13  ;;  %1874 = vmatprep.subr.bf16.mxu1 %v6859_v11  ;;  %v6722_v24 = vcombine.low %v341_v12, %v345_v13  ;;  %v290_v11 = vld [vmem:[%s10889_s1 + $0x1e8] sm:$0xff] }
  0x34   : > { %v473_v15 = vld [vmem:[%s10889_s1 + $0x7a0] sm:$0xff]  ;;  %1875 = vmatpush2.bf16.msra.mxu1 %v6858_v17  ;;  %v414_v12 = vld [vmem:[%s10889_s1 + $0x5c8] sm:$0xff]  ;;  %v6669_v16 = vcombine.high %v286_v10, %v290_v11 }
  0x35   : > { %v6851_v19 = vcombine.high %v469_v14, %v473_v15  ;;  %v333_v20 = vld [vmem:[%s10889_s1 + $0x340] sm:$0xff]  ;;  %1823 = vmatprep.subr.bf16.mxu0 %v6723_v18  ;;  %v6850_v25 = vcombine.low %v469_v14, %v473_v15  ;;  %v418_v13 = vld [vmem:[%s10889_s1 + $0x5e8] sm:$0xff] }
  0x36   : > { %v337_v21 = vld [vmem:[%s10889_s1 + $0x360] sm:$0xff]  ;;  %1824 = vmatpush2.bf16.msra.mxu0 %v6722_v24  ;;  %v6797_v17 = vcombine.high %v414_v12, %v418_v13  ;;  %v278_v18 = vld [vmem:[%s10889_s1 + $0x188] sm:$0xff] }
  0x37   : > { %v461_v22 = vld [vmem:[%s10889_s1 + $0x740] sm:$0xff]  ;;  %v6715_v26 = vcombine.high %v333_v20, %v337_v21  ;;  %1876 = vmatprep.subr.bf16.mxu1 %v6851_v19  ;;  %v6714_v32 = vcombine.low %v333_v20, %v337_v21  ;;  %v282_v19 = vld [vmem:[%s10889_s1 + $0x1a8] sm:$0xff]  ;;  %v8216_v21 = vcombine.low %v8067_v54, %v8070_v55 }
  0x38   : > { %v465_v23 = vld [vmem:[%s10889_s1 + $0x760] sm:$0xff]  ;;  %1877 = vmatpush2.bf16.msra.mxu1 %v6850_v25  ;;  %v406_v20 = vld [vmem:[%s10889_s1 + $0x588] sm:$0xff]  ;;  %v8225_v25 = vcombine.low %v8080_v59, %v8083_v60 }
  0x39   : > { %v6843_v27 = vcombine.high %v461_v22, %v465_v23  ;;  %v325_v28 = vld [vmem:[%s10889_s1 + $0x300] sm:$0xff]  ;;  %1825 = vmatprep.subr.bf16.mxu0 %v6715_v26  ;;  %v6842_v33 = vcombine.low %v461_v22, %v465_v23  ;;  %v410_v22 = vld [vmem:[%s10889_s1 + $0x5a8] sm:$0xff]  ;;  %v6668_v26 = vcombine.low %v286_v10, %v290_v11 }
  0x3a   : > { %v329_v29 = vld [vmem:[%s10889_s1 + $0x320] sm:$0xff]  ;;  %1826 = vmatpush2.bf16.msra.mxu0 %v6714_v32  ;;  %v6789_v54 = vcombine.high %v406_v20, %v410_v22  ;;  %v270_v55 = vld [vmem:[%s10889_s1 + $0x148] sm:$0xff] }
  0x3b   : > { %v453_v30 = vld [vmem:[%s10889_s1 + $0x700] sm:$0xff]  ;;  %v6707_v34 = vcombine.high %v325_v28, %v329_v29  ;;  %1878 = vmatprep.subr.bf16.mxu1 %v6843_v27  ;;  %v6706_v40 = vcombine.low %v325_v28, %v329_v29  ;;  %v226_v27 = vld [vmem:[%s8055_s20 + $0x48] sm:$0xff]  ;;  %v6796_v29 = vcombine.low %v414_v12, %v418_v13 }
  0x3c   : > { %v457_v31 = vld [vmem:[%s10889_s1 + $0x720] sm:$0xff]  ;;  %1879 = vmatpush2.bf16.msra.mxu1 %v6842_v33  ;;  %v228_v28 = vld [vmem:[%s8055_s20 + $0x68] sm:$0xff] }
  0x3d   : > { %v6835_v35 = vcombine.high %v453_v30, %v457_v31  ;;  %v317_v36 = vld [vmem:[%s10889_s1 + $0x2c0] sm:$0xff]  ;;  %1827 = vmatprep.subr.bf16.mxu0 %v6707_v34  ;;  %v6834_v41 = vcombine.low %v453_v30, %v457_v31  ;;  %v6661_v30 = vcombine.high %v278_v18, %v282_v19  ;;  %v274_v31 = vld [vmem:[%s10889_s1 + $0x168] sm:$0xff]  ;;  %v8244_v33 = vcombine.high %v226_v27, %v228_v28 }
  0x3e   : > { %v321_v37 = vld [vmem:[%s10889_s1 + $0x2e0] sm:$0xff]  ;;  %1828 = vmatpush2.bf16.msra.mxu0 %v6706_v40  ;;  %v398_v59 = vld [vmem:[%s10889_s1 + $0x548] sm:$0xff]  ;;  %v6660_v34 = vcombine.low %v278_v18, %v282_v19 }
  0x3f   : > { %v445_v38 = vld [vmem:[%s10889_s1 + $0x6c0] sm:$0xff]  ;;  %v6699_v42 = vcombine.high %v317_v36, %v321_v37  ;;  %1880 = vmatprep.subr.bf16.mxu1 %v6835_v35  ;;  %v6698_v48 = vcombine.low %v317_v36, %v321_v37  ;;  %v402_v60 = vld [vmem:[%s10889_s1 + $0x568] sm:$0xff]  ;;  %v6788_v35 = vcombine.low %v406_v20, %v410_v22  ;;  %v6653_v36 = vcombine.high %v270_v55, %v274_v31 }
  0x40   : > { %v449_v39 = vld [vmem:[%s10889_s1 + $0x6e0] sm:$0xff]  ;;  %1881 = vmatpush2.bf16.msra.mxu1 %v6834_v41  ;;  %v6781_v37 = vcombine.high %v398_v59, %v402_v60  ;;  %v390_v40 = vld [vmem:[%s10889_s1 + $0x508] sm:$0xff] }
  0x41   : > { %v6827_v43 = vcombine.high %v445_v38, %v449_v39  ;;  %v309_v44 = vld [vmem:[%s10889_s1 + $0x280] sm:$0xff]  ;;  %1829 = vmatprep.subr.bf16.mxu0 %v6699_v42  ;;  %v6826_v49 = vcombine.low %v445_v38, %v449_v39  ;;  %v262_v38 = vld [vmem:[%s10889_s1 + $0x108] sm:$0xff] }
  0x42   : > { %v313_v45 = vld [vmem:[%s10889_s1 + $0x2a0] sm:$0xff]  ;;  %1830 = vmatpush2.bf16.msra.mxu0 %v6698_v48  ;;  %v266_v39 = vld [vmem:[%s10889_s1 + $0x128] sm:$0xff] }
  0x43   : > { %v437_v46 = vld [vmem:[%s10889_s1 + $0x680] sm:$0xff]  ;;  %v6691_v50 = vcombine.high %v309_v44, %v313_v45  ;;  %1882 = vmatprep.subr.bf16.mxu1 %v6827_v43  ;;  %v6690_v61 = vcombine.low %v309_v44, %v313_v45  ;;  %v394_v41 = vld [vmem:[%s10889_s1 + $0x528] sm:$0xff]  ;;  %v6652_v43 = vcombine.low %v270_v55, %v274_v31  ;;  %v8263_v44 = vcombine.low %v226_v27, %v228_v28 }
  0x44   : > { %v441_v47 = vld [vmem:[%s10889_s1 + $0x6a0] sm:$0xff]  ;;  %1883 = vmatpush2.bf16.msra.mxu1 %v6826_v49  ;;  %v6780_v45 = vcombine.low %v398_v59, %v402_v60  ;;  %v254_v48 = vld [vmem:[%s10889_s1 + $0xc8] sm:$0xff] }
  0x45   : > { %v6819_v51 = vcombine.high %v437_v46, %v441_v47  ;;  %v301_v52 = vld [vmem:[%s10889_s1 + $0x240] sm:$0xff]  ;;  %1831 = vmatprep.subr.bf16.mxu0 %v6691_v50  ;;  %v6818_v62 = vcombine.low %v437_v46, %v441_v47  ;;  %v6645_v46 = vcombine.high %v262_v38, %v266_v39  ;;  %v6773_v47 = vcombine.high %v390_v40, %v394_v41  ;;  %v258_v49 = vld [vmem:[%s10889_s1 + $0xe8] sm:$0xff] }
  0x46   : > { %v305_v53 = vld [vmem:[%s10889_s1 + $0x260] sm:$0xff]  ;;  %1832 = vmatpush2.bf16.msra.mxu0 %v6690_v61  ;;  %v382_v50 = vld [vmem:[%s10889_s1 + $0x4c8] sm:$0xff] }
  0x47   : > { %v429_v56 = vld [vmem:[%s10889_s1 + $0x640] sm:$0xff]  ;;  %v6683_v0 = vcombine.high %v301_v52, %v305_v53  ;;  %1884 = vmatprep.subr.bf16.mxu1 %v6819_v51  ;;  %v6682_v6 = vcombine.low %v301_v52, %v305_v53  ;;  %v386_v51 = vld [vmem:[%s10889_s1 + $0x4e8] sm:$0xff]  ;;  %v6644_v52 = vcombine.low %v262_v38, %v266_v39  ;;  %v6772_v53 = vcombine.low %v390_v40, %v394_v41 }
  0x48   : > { %v433_v57 = vld [vmem:[%s10889_s1 + $0x660] sm:$0xff]  ;;  %1885 = vmatpush2.bf16.msra.mxu1 %v6818_v62  ;;  %v246_v61 = vld [vmem:[%s10889_s1 + $0x88] sm:$0xff] }
  0x49   : > { %v6811_v1 = vcombine.high %v429_v56, %v433_v57  ;;  %v293_v2 = vld [vmem:[%s10889_s1 + $0x200] sm:$0xff]  ;;  %1833 = vmatprep.subr.bf16.mxu0 %v6683_v0  ;;  %v6810_v7 = vcombine.low %v429_v56, %v433_v57  ;;  %v6637_v56 = vcombine.high %v254_v48, %v258_v49  ;;  %v6765_v57 = vcombine.high %v382_v50, %v386_v51  ;;  %v250_v62 = vld [vmem:[%s10889_s1 + $0xa8] sm:$0xff] }
  0x4a   : > { %v297_v3 = vld [vmem:[%s10889_s1 + $0x220] sm:$0xff]  ;;  %1834 = vmatpush2.bf16.msra.mxu0 %v6682_v6  ;;  %v374_v0 = vld [vmem:[%s10889_s1 + $0x488] sm:$0xff]  ;;  %v6628_v10 = vcombine.low %v246_v61, %v250_v62 }
  0x4b   : > { %v421_v4 = vld [vmem:[%s10889_s1 + $0x600] sm:$0xff]  ;;  %v6675_v8 = vcombine.high %v293_v2, %v297_v3  ;;  %1886 = vmatprep.subr.bf16.mxu1 %v6811_v1  ;;  %v6674_v14 = vcombine.low %v293_v2, %v297_v3  ;;  %v378_v1 = vld [vmem:[%s10889_s1 + $0x4a8] sm:$0xff]  ;;  %v6636_v2 = vcombine.low %v254_v48, %v258_v49  ;;  %v6764_v3 = vcombine.low %v382_v50, %v386_v51 }
  0x4c   : > { %v425_v5 = vld [vmem:[%s10889_s1 + $0x620] sm:$0xff]  ;;  %1887 = vmatpush2.bf16.msra.mxu1 %v6810_v7  ;;  %v238_v6 = vld [vmem:[%s10889_s1 + $0x48] sm:$0xff]  ;;  %v6756_v11 = vcombine.low %v374_v0, %v378_v1 }
  0x4d   : > { %v6803_v9 = vcombine.high %v421_v4, %v425_v5  ;;  %1835 = vmatprep.subr.bf16.mxu0 %v6675_v8  ;;  %v6802_v15 = vcombine.low %v421_v4, %v425_v5  ;;  %v225_v23 = vld [vmem:[%s8055_s20 + $0x40] sm:$0xff]  ;;  %v6629_v4 = vcombine.high %v246_v61, %v250_v62  ;;  %v6757_v5 = vcombine.high %v374_v0, %v378_v1  ;;  %v242_v7 = vld [vmem:[%s10889_s1 + $0x68] sm:$0xff] }
  0x4e   : > { %v227_v24 = vld [vmem:[%s8055_s20 + $0x60] sm:$0xff]  ;;  %1836 = vmatpush2.bf16.msra.mxu0 %v6674_v14  ;;  %v366_v8 = vld [vmem:[%s10889_s1 + $0x448] sm:$0xff]  ;;  %v6621_v12 = vcombine.high %v238_v6, %v242_v7  ;;  %v6620_v18 = vcombine.low %v238_v6, %v242_v7 }
  0x4f   : > { %1888 = vmatprep.subr.bf16.mxu1 %v6803_v9  ;;  %1911 = vmatprep.subr.bf16.mxu0 %v6669_v16  ;;  %v8235_v32 = vcombine.high %v225_v23, %v227_v24  ;;  %v8261_v42 = vcombine.low %v225_v23, %v227_v24  ;;  %v370_v9 = vld [vmem:[%s10889_s1 + $0x468] sm:$0xff] }
  0x50   : > { %1889 = vmatpush2.bf16.msra.mxu1 %v6802_v15  ;;  %v6749_v13 = vcombine.high %v366_v8, %v370_v9  ;;  %v230_v14 = vld [vmem:[%s10889_s1 + $0x8] sm:$0xff]  ;;  %v6748_v19 = vcombine.low %v366_v8, %v370_v9 }
  0x51   : > { %1964 = vmatprep.subr.bf16.mxu1 %v6797_v17  ;;  %1838 = vmatmul.mubr.bf16.vlgmr.msra.gmra.mxu0 %v8216_v21  ;;  %v234_v15 = vld [vmem:[%s10889_s1 + $0x28] sm:$0xff] }
  0x52   : > { %1912 = vmatpush1.bf16.msra.mxu0 %v6668_v26  ;;  %1847 = vmatprep.mubr.bf16.mxu0 %v8235_v32  ;;  %v358_v16 = vld [vmem:[%s10889_s1 + $0x408] sm:$0xff]  ;;  %v6613_v20 = vcombine.high %v230_v14, %v234_v15  ;;  %v6612_v28 = vcombine.low %v230_v14, %v234_v15 }
  0x53   : > { %1891 = vmatmul.mubr.bf16.vlgmr.msra.gmra.mxu1 %v8225_v25  ;;  %1913 = vmatprep.subr.bf16.mxu0 %v6661_v30  ;;  %v362_v17 = vld [vmem:[%s10889_s1 + $0x428] sm:$0xff] }
  0x54   : > { %1965 = vmatpush1.bf16.msra.mxu1 %v6796_v29  ;;  %1900 = vmatprep.mubr.bf16.mxu1 %v8244_v33  ;;  %v6741_v22 = vcombine.high %v358_v16, %v362_v17  ;;  %v350_v23 = vld [vmem:[%s10889_s1 + $0x3c8] sm:$0xff]  ;;  %v6740_v29 = vcombine.low %v358_v16, %v362_v17 }
  0x55   : > { %1966 = vmatprep.subr.bf16.mxu1 %v6789_v54  ;;  %v354_v24 = vld [vmem:[%s10889_s1 + $0x3e8] sm:$0xff] }
  0x56   : > { %1914 = vmatpush1.bf16.msra.mxu0 %v6660_v34  ;;  %v478_v26 = vld [vmem:[%s10889_s1 + $0x7c8] sm:$0xff]  ;;  %v6733_v30 = vcombine.high %v350_v23, %v354_v24  ;;  %v6732_v34 = vcombine.low %v350_v23, %v354_v24 }
  0x57   : > { %1915 = vmatprep.subr.bf16.mxu0 %v6653_v36  ;;  %v482_v27 = vld [vmem:[%s10889_s1 + $0x7e8] sm:$0xff] }
  0x58   : > { %1967 = vmatpush1.bf16.msra.mxu1 %v6788_v35  ;;  %v6861_v54 = vcombine.high %v478_v26, %v482_v27  ;;  %v342_v55 = vld [vmem:[%s10889_s1 + $0x388] sm:$0xff]  ;;  %v6860_v35 = vcombine.low %v478_v26, %v482_v27 }
  0x59   : > { %1968 = vmatprep.subr.bf16.mxu1 %v6781_v37  ;;  %1848 = vmatmul.mubr.bf16.gmra.mxu0 %v8261_v42  ;;  %v346_v31 = vld [vmem:[%s10889_s1 + $0x3a8] sm:$0xff] }
  0x5a   : > { %1916 = vmatpush1.bf16.msra.mxu0 %v6652_v43  ;;  %1943 = vmatprep.mubr.bf16.mxu0 %v8077_v58  ;;  %v470_v59 = vld [vmem:[%s10889_s1 + $0x788] sm:$0xff]  ;;  %v6725_v36 = vcombine.high %v342_v55, %v346_v31  ;;  %v6724_v43 = vcombine.low %v342_v55, %v346_v31  ;;  %v287_v55 = vld [vmem:[%s10889_s1 + $0x1d0] sm:$0xff] }
  0x5b   : > { %1901 = vmatmul.mubr.bf16.gmra.mxu1 %v8263_v44  ;;  %1917 = vmatprep.subr.bf16.mxu0 %v6645_v46  ;;  %v474_v60 = vld [vmem:[%s10889_s1 + $0x7a8] sm:$0xff]  ;;  %v291_v31 = vld [vmem:[%s10889_s1 + $0x1f0] sm:$0xff] }
  0x5c   : > { %1969 = vmatpush1.bf16.msra.mxu1 %v6780_v45  ;;  %1996 = vmatprep.mubr.bf16.mxu1 %v8093_v63  ;;  %v6853_v37 = vcombine.high %v470_v59, %v474_v60  ;;  %v334_v38 = vld [vmem:[%s10889_s1 + $0x348] sm:$0xff]  ;;  %v6852_v45 = vcombine.low %v470_v59, %v474_v60  ;;  %v415_v59 = vld [vmem:[%s10889_s1 + $0x5d0] sm:$0xff] }
  0x5d   : > { %1970 = vmatprep.subr.bf16.mxu1 %v6773_v47  ;;  %v338_v39 = vld [vmem:[%s10889_s1 + $0x368] sm:$0xff]  ;;  %v419_v60 = vld [vmem:[%s10889_s1 + $0x5f0] sm:$0xff] }
  0x5e   : > { %1918 = vmatpush1.bf16.msra.mxu0 %v6644_v52  ;;  %v462_v40 = vld [vmem:[%s10889_s1 + $0x748] sm:$0xff]  ;;  %v6717_v46 = vcombine.high %v334_v38, %v338_v39  ;;  %v6716_v52 = vcombine.low %v334_v38, %v338_v39  ;;  %v279_v38 = vld [vmem:[%s10889_s1 + $0x190] sm:$0xff] }
  0x5f   : > { %1919 = vmatprep.subr.bf16.mxu0 %v6637_v56  ;;  %v466_v41 = vld [vmem:[%s10889_s1 + $0x768] sm:$0xff]  ;;  %v283_v39 = vld [vmem:[%s10889_s1 + $0x1b0] sm:$0xff] }
  0x60   : > { %1971 = vmatpush1.bf16.msra.mxu1 %v6772_v53  ;;  %v6845_v47 = vcombine.high %v462_v40, %v466_v41  ;;  %v326_v48 = vld [vmem:[%s10889_s1 + $0x308] sm:$0xff]  ;;  %v6844_v53 = vcombine.low %v462_v40, %v466_v41  ;;  %v407_v40 = vld [vmem:[%s10889_s1 + $0x590] sm:$0xff] }
  0x61   : > { %1972 = vmatprep.subr.bf16.mxu1 %v6765_v57  ;;  %v330_v49 = vld [vmem:[%s10889_s1 + $0x328] sm:$0xff]  ;;  %v411_v41 = vld [vmem:[%s10889_s1 + $0x5b0] sm:$0xff] }
  0x62   : > { %1920 = vmatpush1.bf16.msra.mxu0 %v6636_v2  ;;  %v454_v50 = vld [vmem:[%s10889_s1 + $0x708] sm:$0xff]  ;;  %v6709_v56 = vcombine.high %v326_v48, %v330_v49  ;;  %v6708_v2 = vcombine.low %v326_v48, %v330_v49  ;;  %v271_v48 = vld [vmem:[%s10889_s1 + $0x150] sm:$0xff] }
  0x63   : > { %1921 = vmatprep.subr.bf16.mxu0 %v6629_v4  ;;  %v458_v51 = vld [vmem:[%s10889_s1 + $0x728] sm:$0xff]  ;;  %v275_v49 = vld [vmem:[%s10889_s1 + $0x170] sm:$0xff] }
  0x64   : > { %1973 = vmatpush1.bf16.msra.mxu1 %v6764_v3  ;;  %v6837_v57 = vcombine.high %v454_v50, %v458_v51  ;;  %v318_v61 = vld [vmem:[%s10889_s1 + $0x2c8] sm:$0xff]  ;;  %v6836_v3 = vcombine.low %v454_v50, %v458_v51  ;;  %v399_v50 = vld [vmem:[%s10889_s1 + $0x550] sm:$0xff] }
  0x65   : > { %1974 = vmatprep.subr.bf16.mxu1 %v6757_v5  ;;  %v322_v62 = vld [vmem:[%s10889_s1 + $0x2e8] sm:$0xff]  ;;  %v403_v51 = vld [vmem:[%s10889_s1 + $0x570] sm:$0xff] }
  0x66   : > { %1922 = vmatpush1.bf16.msra.mxu0 %v6628_v10  ;;  %v446_v0 = vld [vmem:[%s10889_s1 + $0x6c8] sm:$0xff]  ;;  %v6701_v4 = vcombine.high %v318_v61, %v322_v62  ;;  %v6700_v10 = vcombine.low %v318_v61, %v322_v62  ;;  %v263_v61 = vld [vmem:[%s10889_s1 + $0x110] sm:$0xff] }
  0x67   : > { %1923 = vmatprep.subr.bf16.mxu0 %v6621_v12  ;;  %v450_v1 = vld [vmem:[%s10889_s1 + $0x6e8] sm:$0xff]  ;;  %v267_v62 = vld [vmem:[%s10889_s1 + $0x130] sm:$0xff] }
  0x68   : > { %1975 = vmatpush1.bf16.msra.mxu1 %v6756_v11  ;;  %v6829_v5 = vcombine.high %v446_v0, %v450_v1  ;;  %v310_v6 = vld [vmem:[%s10889_s1 + $0x288] sm:$0xff]  ;;  %v6828_v11 = vcombine.low %v446_v0, %v450_v1  ;;  %v391_v0 = vld [vmem:[%s10889_s1 + $0x510] sm:$0xff] }
  0x69   : > { %1976 = vmatprep.subr.bf16.mxu1 %v6749_v13  ;;  %v314_v7 = vld [vmem:[%s10889_s1 + $0x2a8] sm:$0xff]  ;;  %v395_v1 = vld [vmem:[%s10889_s1 + $0x530] sm:$0xff] }
  0x6a   : > { %1924 = vmatpush1.bf16.msra.mxu0 %v6620_v18  ;;  %v438_v8 = vld [vmem:[%s10889_s1 + $0x688] sm:$0xff]  ;;  %v6693_v12 = vcombine.high %v310_v6, %v314_v7  ;;  %v6692_v18 = vcombine.low %v310_v6, %v314_v7  ;;  %v255_v6 = vld [vmem:[%s10889_s1 + $0xd0] sm:$0xff] }
  0x6b   : > { %1925 = vmatprep.subr.bf16.mxu0 %v6613_v20  ;;  %v442_v9 = vld [vmem:[%s10889_s1 + $0x6a8] sm:$0xff]  ;;  %v259_v7 = vld [vmem:[%s10889_s1 + $0xf0] sm:$0xff] }
  0x6c   : > { %1977 = vmatpush1.bf16.msra.mxu1 %v6748_v19  ;;  %v6821_v13 = vcombine.high %v438_v8, %v442_v9  ;;  %v302_v14 = vld [vmem:[%s10889_s1 + $0x248] sm:$0xff]  ;;  %v6820_v19 = vcombine.low %v438_v8, %v442_v9  ;;  %v383_v8 = vld [vmem:[%s10889_s1 + $0x4d0] sm:$0xff] }
  0x6d   : > { %1978 = vmatprep.subr.bf16.mxu1 %v6741_v22  ;;  %v306_v15 = vld [vmem:[%s10889_s1 + $0x268] sm:$0xff]  ;;  %v387_v9 = vld [vmem:[%s10889_s1 + $0x4f0] sm:$0xff] }
  0x6e   : > { %1926 = vmatpush1.bf16.msra.mxu0 %v6612_v28  ;;  %v430_v16 = vld [vmem:[%s10889_s1 + $0x648] sm:$0xff]  ;;  %v6685_v20 = vcombine.high %v302_v14, %v306_v15  ;;  %v6684_v28 = vcombine.low %v302_v14, %v306_v15  ;;  %v247_v14 = vld [vmem:[%s10889_s1 + $0x90] sm:$0xff] }
  0x6f   : > { %1927 = vmatprep.subr.bf16.mxu0 %v6733_v30  ;;  %v434_v17 = vld [vmem:[%s10889_s1 + $0x668] sm:$0xff]  ;;  %v251_v15 = vld [vmem:[%s10889_s1 + $0xb0] sm:$0xff] }
  0x70   : > { %1979 = vmatpush1.bf16.msra.mxu1 %v6740_v29  ;;  %v6813_v22 = vcombine.high %v430_v16, %v434_v17  ;;  %v294_v23 = vld [vmem:[%s10889_s1 + $0x208] sm:$0xff]  ;;  %v6812_v29 = vcombine.low %v430_v16, %v434_v17  ;;  %v375_v16 = vld [vmem:[%s10889_s1 + $0x490] sm:$0xff] }
  0x71   : > { %1980 = vmatprep.subr.bf16.mxu1 %v6861_v54  ;;  %v298_v24 = vld [vmem:[%s10889_s1 + $0x228] sm:$0xff]  ;;  %v379_v17 = vld [vmem:[%s10889_s1 + $0x4b0] sm:$0xff] }
  0x72   : > { %1928 = vmatpush2.bf16.msra.mxu0 %v6732_v34  ;;  %v422_v26 = vld [vmem:[%s10889_s1 + $0x608] sm:$0xff]  ;;  %v6677_v30 = vcombine.high %v294_v23, %v298_v24  ;;  %v6676_v34 = vcombine.low %v294_v23, %v298_v24  ;;  %v239_v23 = vld [vmem:[%s10889_s1 + $0x50] sm:$0xff] }
  0x73   : > { %1929 = vmatprep.subr.bf16.mxu0 %v6725_v36  ;;  %v426_v27 = vld [vmem:[%s10889_s1 + $0x628] sm:$0xff]  ;;  %v6671_v36 = vcombine.high %v287_v55, %v291_v31  ;;  %v243_v24 = vld [vmem:[%s10889_s1 + $0x70] sm:$0xff] }
  0x74   : > { %1981 = vmatpush2.bf16.msra.mxu1 %v6860_v35  ;;  %v6805_v54 = vcombine.high %v422_v26, %v426_v27  ;;  %v6804_v35 = vcombine.low %v422_v26, %v426_v27  ;;  %v367_v26 = vld [vmem:[%s10889_s1 + $0x450] sm:$0xff] }
  0x75   : > { %1982 = vmatprep.subr.bf16.mxu1 %v6853_v37  ;;  %v6799_v37 = vcombine.high %v415_v59, %v419_v60  ;;  %v371_v27 = vld [vmem:[%s10889_s1 + $0x470] sm:$0xff] }
  0x76   : > { %1930 = vmatpush2.bf16.msra.mxu0 %v6724_v43  ;;  %v6670_v43 = vcombine.low %v287_v55, %v291_v31  ;;  %v231_v55 = vld [vmem:[%s10889_s1 + $0x10] sm:$0xff] }
  0x77   : > { %1931 = vmatprep.subr.bf16.mxu0 %v6717_v46  ;;  %v6663_v46 = vcombine.high %v279_v38, %v283_v39  ;;  %v235_v31 = vld [vmem:[%s10889_s1 + $0x30] sm:$0xff] }
  0x78   : > { %1983 = vmatpush2.bf16.msra.mxu1 %v6852_v45  ;;  %v6798_v45 = vcombine.low %v415_v59, %v419_v60  ;;  %v359_v59 = vld [vmem:[%s10889_s1 + $0x410] sm:$0xff] }
  0x79   : > { %1984 = vmatprep.subr.bf16.mxu1 %v6845_v47  ;;  %v6791_v47 = vcombine.high %v407_v40, %v411_v41  ;;  %v363_v60 = vld [vmem:[%s10889_s1 + $0x430] sm:$0xff] }
  0x7a   : > { %1932 = vmatpush2.bf16.msra.mxu0 %v6716_v52  ;;  %v6662_v52 = vcombine.low %v279_v38, %v283_v39  ;;  %v351_v38 = vld [vmem:[%s10889_s1 + $0x3d0] sm:$0xff] }
  0x7b   : > { %1933 = vmatprep.subr.bf16.mxu0 %v6709_v56  ;;  %v6655_v56 = vcombine.high %v271_v48, %v275_v49  ;;  %v355_v39 = vld [vmem:[%s10889_s1 + $0x3f0] sm:$0xff] }
  0x7c   : > { %1985 = vmatpush2.bf16.msra.mxu1 %v6844_v53  ;;  %v6790_v53 = vcombine.low %v407_v40, %v411_v41  ;;  %v479_v40 = vld [vmem:[%s10889_s1 + $0x7d0] sm:$0xff] }
  0x7d   : > { %1986 = vmatprep.subr.bf16.mxu1 %v6837_v57  ;;  %v6783_v57 = vcombine.high %v399_v50, %v403_v51  ;;  %v483_v41 = vld [vmem:[%s10889_s1 + $0x7f0] sm:$0xff] }
  0x7e   : > { %1934 = vmatpush2.bf16.msra.mxu0 %v6708_v2  ;;  %v6654_v2 = vcombine.low %v271_v48, %v275_v49  ;;  %v343_v48 = vld [vmem:[%s10889_s1 + $0x390] sm:$0xff] }
  0x7f   : > { %1935 = vmatprep.subr.bf16.mxu0 %v6701_v4  ;;  %v6647_v4 = vcombine.high %v263_v61, %v267_v62  ;;  %v347_v49 = vld [vmem:[%s10889_s1 + $0x3b0] sm:$0xff] }
  0x80   : > { %1987 = vmatpush2.bf16.msra.mxu1 %v6836_v3  ;;  %v6782_v3 = vcombine.low %v399_v50, %v403_v51  ;;  %v471_v50 = vld [vmem:[%s10889_s1 + $0x790] sm:$0xff] }
  0x81   : > { %1988 = vmatprep.subr.bf16.mxu1 %v6829_v5  ;;  %v6775_v5 = vcombine.high %v391_v0, %v395_v1  ;;  %v475_v51 = vld [vmem:[%s10889_s1 + $0x7b0] sm:$0xff] }
  0x82   : > { %1936 = vmatpush2.bf16.msra.mxu0 %v6700_v10  ;;  %v6646_v10 = vcombine.low %v263_v61, %v267_v62  ;;  %v335_v61 = vld [vmem:[%s10889_s1 + $0x350] sm:$0xff] }
  0x83   : > { %1937 = vmatprep.subr.bf16.mxu0 %v6693_v12  ;;  %v6639_v12 = vcombine.high %v255_v6, %v259_v7  ;;  %v339_v62 = vld [vmem:[%s10889_s1 + $0x370] sm:$0xff] }
  0x84   : > { %1989 = vmatpush2.bf16.msra.mxu1 %v6828_v11  ;;  %v6774_v11 = vcombine.low %v391_v0, %v395_v1  ;;  %v463_v0 = vld [vmem:[%s10889_s1 + $0x750] sm:$0xff] }
  0x85   : > { %1990 = vmatprep.subr.bf16.mxu1 %v6821_v13  ;;  %v6767_v13 = vcombine.high %v383_v8, %v387_v9  ;;  %v467_v1 = vld [vmem:[%s10889_s1 + $0x770] sm:$0xff] }
  0x86   : > { %1938 = vmatpush2.bf16.msra.mxu0 %v6692_v18  ;;  %v6638_v18 = vcombine.low %v255_v6, %v259_v7  ;;  %v327_v6 = vld [vmem:[%s10889_s1 + $0x310] sm:$0xff] }
  0x87   : > { %1939 = vmatprep.subr.bf16.mxu0 %v6685_v20  ;;  %v6631_v20 = vcombine.high %v247_v14, %v251_v15  ;;  %v331_v7 = vld [vmem:[%s10889_s1 + $0x330] sm:$0xff] }
  0x88   : > { %1991 = vmatpush2.bf16.msra.mxu1 %v6820_v19  ;;  %v6766_v19 = vcombine.low %v383_v8, %v387_v9  ;;  %v455_v8 = vld [vmem:[%s10889_s1 + $0x710] sm:$0xff] }
  0x89   : > { %1992 = vmatprep.subr.bf16.mxu1 %v6813_v22  ;;  %v6759_v22 = vcombine.high %v375_v16, %v379_v17  ;;  %v459_v9 = vld [vmem:[%s10889_s1 + $0x730] sm:$0xff] }
  0x8a   : > { %1940 = vmatpush2.bf16.msra.mxu0 %v6684_v28  ;;  %v6630_v28 = vcombine.low %v247_v14, %v251_v15  ;;  %v319_v14 = vld [vmem:[%s10889_s1 + $0x2d0] sm:$0xff] }
  0x8b   : > { %1941 = vmatprep.subr.bf16.mxu0 %v6677_v30  ;;  %v6623_v30 = vcombine.high %v239_v23, %v243_v24  ;;  %v323_v15 = vld [vmem:[%s10889_s1 + $0x2f0] sm:$0xff] }
  0x8c   : > { %1993 = vmatpush2.bf16.msra.mxu1 %v6812_v29  ;;  %v6758_v29 = vcombine.low %v375_v16, %v379_v17  ;;  %v447_v16 = vld [vmem:[%s10889_s1 + $0x6d0] sm:$0xff] }
  0x8d   : > { %1994 = vmatprep.subr.bf16.mxu1 %v6805_v54  ;;  %v6751_v54 = vcombine.high %v367_v26, %v371_v27  ;;  %v451_v17 = vld [vmem:[%s10889_s1 + $0x6f0] sm:$0xff] }
  0x8e   : > { %1942 = vmatpush2.bf16.msra.mxu0 %v6676_v34  ;;  %v6622_v34 = vcombine.low %v239_v23, %v243_v24  ;;  %v311_v23 = vld [vmem:[%s10889_s1 + $0x290] sm:$0xff] }
  0x8f   : > { %2017 = vmatprep.subr.bf16.mxu0 %v6671_v36  ;;  %v6615_v36 = vcombine.high %v231_v55, %v235_v31  ;;  %v315_v24 = vld [vmem:[%s10889_s1 + $0x2b0] sm:$0xff] }
  0x90   : > { %1995 = vmatpush2.bf16.msra.mxu1 %v6804_v35  ;;  %v6750_v35 = vcombine.low %v367_v26, %v371_v27  ;;  %v439_v26 = vld [vmem:[%s10889_s1 + $0x690] sm:$0xff] }
  0x91   : > { %2070 = vmatprep.subr.bf16.mxu1 %v6799_v37  ;;  %1944 = vmatmul.mubr.bf16.vlgmr.msra.gmra.mxu0 %v8216_v21  ;;  %v6743_v37 = vcombine.high %v359_v59, %v363_v60  ;;  %v443_v27 = vld [vmem:[%s10889_s1 + $0x6b0] sm:$0xff] }
  0x92   : > { %2018 = vmatpush1.bf16.msra.mxu0 %v6670_v43  ;;  %1953 = vmatprep.mubr.bf16.mxu0 %v8235_v32  ;;  %v6614_v43 = vcombine.low %v231_v55, %v235_v31  ;;  %v303_v55 = vld [vmem:[%s10889_s1 + $0x250] sm:$0xff] }
  0x93   : > { %1997 = vmatmul.mubr.bf16.vlgmr.msra.gmra.mxu1 %v8225_v25  ;;  %2019 = vmatprep.subr.bf16.mxu0 %v6663_v46  ;;  %v6735_v46 = vcombine.high %v351_v38, %v355_v39  ;;  %v307_v31 = vld [vmem:[%s10889_s1 + $0x270] sm:$0xff] }
  0x94   : > { %2071 = vmatpush1.bf16.msra.mxu1 %v6798_v45  ;;  %2006 = vmatprep.mubr.bf16.mxu1 %v8244_v33  ;;  %v6742_v45 = vcombine.low %v359_v59, %v363_v60  ;;  %v431_v59 = vld [vmem:[%s10889_s1 + $0x650] sm:$0xff] }
  0x95   : > { %2072 = vmatprep.subr.bf16.mxu1 %v6791_v47  ;;  %v6863_v47 = vcombine.high %v479_v40, %v483_v41  ;;  %v435_v60 = vld [vmem:[%s10889_s1 + $0x670] sm:$0xff] }
  0x96   : > { %2020 = vmatpush1.bf16.msra.mxu0 %v6662_v52  ;;  %v6734_v52 = vcombine.low %v351_v38, %v355_v39  ;;  %v295_v38 = vld [vmem:[%s10889_s1 + $0x210] sm:$0xff] }
  0x97   : > { %2021 = vmatprep.subr.bf16.mxu0 %v6655_v56  ;;  %v6727_v56 = vcombine.high %v343_v48, %v347_v49  ;;  %v299_v39 = vld [vmem:[%s10889_s1 + $0x230] sm:$0xff] }
  0x98   : > { %2073 = vmatpush1.bf16.msra.mxu1 %v6790_v53  ;;  %v6862_v53 = vcombine.low %v479_v40, %v483_v41  ;;  %v423_v40 = vld [vmem:[%s10889_s1 + $0x610] sm:$0xff] }
  0x99   : > { %2074 = vmatprep.subr.bf16.mxu1 %v6783_v57  ;;  %1954 = vmatmul.mubr.bf16.gmra.mxu0 %v8261_v42  ;;  %v6855_v57 = vcombine.high %v471_v50, %v475_v51  ;;  %v427_v41 = vld [vmem:[%s10889_s1 + $0x630] sm:$0xff] }
  0x9a   : > { %2022 = vmatpush1.bf16.msra.mxu0 %v6654_v2  ;;  %2049 = vmatprep.mubr.bf16.mxu0 %v8077_v58  ;;  %v6726_v2 = vcombine.low %v343_v48, %v347_v49  ;;  %v288_v48 = vld [vmem:[%s10889_s1 + $0x1d8] sm:$0xff] }
  0x9b   : > { %2007 = vmatmul.mubr.bf16.gmra.mxu1 %v8263_v44  ;;  %2023 = vmatprep.subr.bf16.mxu0 %v6647_v4  ;;  %v6719_v4 = vcombine.high %v335_v61, %v339_v62  ;;  %v292_v49 = vld [vmem:[%s10889_s1 + $0x1f8] sm:$0xff] }
  0x9c   : > { %2075 = vmatpush1.bf16.msra.mxu1 %v6782_v3  ;;  %2102 = vmatprep.mubr.bf16.mxu1 %v8093_v63  ;;  %v6854_v3 = vcombine.low %v471_v50, %v475_v51  ;;  %v416_v50 = vld [vmem:[%s10889_s1 + $0x5d8] sm:$0xff] }
  0x9d   : > { %2076 = vmatprep.subr.bf16.mxu1 %v6775_v5  ;;  %v6847_v5 = vcombine.high %v463_v0, %v467_v1  ;;  %v420_v51 = vld [vmem:[%s10889_s1 + $0x5f8] sm:$0xff] }
  0x9e   : > { %2024 = vmatpush1.bf16.msra.mxu0 %v6646_v10  ;;  %v6718_v10 = vcombine.low %v335_v61, %v339_v62  ;;  %v280_v61 = vld [vmem:[%s10889_s1 + $0x198] sm:$0xff] }
  0x9f   : > { %2025 = vmatprep.subr.bf16.mxu0 %v6639_v12  ;;  %v6711_v12 = vcombine.high %v327_v6, %v331_v7  ;;  %v284_v62 = vld [vmem:[%s10889_s1 + $0x1b8] sm:$0xff] }
  0xa0   : > { %2077 = vmatpush1.bf16.msra.mxu1 %v6774_v11  ;;  %v6846_v11 = vcombine.low %v463_v0, %v467_v1  ;;  %v408_v0 = vld [vmem:[%s10889_s1 + $0x598] sm:$0xff] }
  0xa1   : > { %2078 = vmatprep.subr.bf16.mxu1 %v6767_v13  ;;  %v6839_v13 = vcombine.high %v455_v8, %v459_v9  ;;  %v412_v1 = vld [vmem:[%s10889_s1 + $0x5b8] sm:$0xff] }
  0xa2   : > { %2026 = vmatpush1.bf16.msra.mxu0 %v6638_v18  ;;  %v6710_v18 = vcombine.low %v327_v6, %v331_v7  ;;  %v272_v6 = vld [vmem:[%s10889_s1 + $0x158] sm:$0xff] }
  0xa3   : > { %2027 = vmatprep.subr.bf16.mxu0 %v6631_v20  ;;  %v6703_v20 = vcombine.high %v319_v14, %v323_v15  ;;  %v276_v7 = vld [vmem:[%s10889_s1 + $0x178] sm:$0xff] }
  0xa4   : > { %2079 = vmatpush1.bf16.msra.mxu1 %v6766_v19  ;;  %v6838_v19 = vcombine.low %v455_v8, %v459_v9  ;;  %v400_v8 = vld [vmem:[%s10889_s1 + $0x558] sm:$0xff] }
  0xa5   : > { %2080 = vmatprep.subr.bf16.mxu1 %v6759_v22  ;;  %v6831_v22 = vcombine.high %v447_v16, %v451_v17  ;;  %v404_v9 = vld [vmem:[%s10889_s1 + $0x578] sm:$0xff] }
  0xa6   : > { %2028 = vmatpush1.bf16.msra.mxu0 %v6630_v28  ;;  %v6702_v28 = vcombine.low %v319_v14, %v323_v15  ;;  %v264_v14 = vld [vmem:[%s10889_s1 + $0x118] sm:$0xff] }
  0xa7   : > { %2029 = vmatprep.subr.bf16.mxu0 %v6623_v30  ;;  %v6695_v30 = vcombine.high %v311_v23, %v315_v24  ;;  %v268_v15 = vld [vmem:[%s10889_s1 + $0x138] sm:$0xff] }
  0xa8   : > { %2081 = vmatpush1.bf16.msra.mxu1 %v6758_v29  ;;  %v6830_v29 = vcombine.low %v447_v16, %v451_v17  ;;  %v392_v16 = vld [vmem:[%s10889_s1 + $0x518] sm:$0xff] }
  0xa9   : > { %2082 = vmatprep.subr.bf16.mxu1 %v6751_v54  ;;  %v6823_v54 = vcombine.high %v439_v26, %v443_v27  ;;  %v396_v17 = vld [vmem:[%s10889_s1 + $0x538] sm:$0xff] }
  0xaa   : > { %2030 = vmatpush1.bf16.msra.mxu0 %v6622_v34  ;;  %v6694_v34 = vcombine.low %v311_v23, %v315_v24  ;;  %v256_v23 = vld [vmem:[%s10889_s1 + $0xd8] sm:$0xff] }
  0xab   : > { %2031 = vmatprep.subr.bf16.mxu0 %v6615_v36  ;;  %v6687_v36 = vcombine.high %v303_v55, %v307_v31  ;;  %v260_v24 = vld [vmem:[%s10889_s1 + $0xf8] sm:$0xff] }
  0xac   : > { %2083 = vmatpush1.bf16.msra.mxu1 %v6750_v35  ;;  %v6822_v35 = vcombine.low %v439_v26, %v443_v27  ;;  %v384_v26 = vld [vmem:[%s10889_s1 + $0x4d8] sm:$0xff] }
  0xad   : > { %2084 = vmatprep.subr.bf16.mxu1 %v6743_v37  ;;  %v6815_v37 = vcombine.high %v431_v59, %v435_v60  ;;  %v388_v27 = vld [vmem:[%s10889_s1 + $0x4f8] sm:$0xff] }
  0xae   : > { %2032 = vmatpush1.bf16.msra.mxu0 %v6614_v43  ;;  %v6686_v43 = vcombine.low %v303_v55, %v307_v31  ;;  %v248_v55 = vld [vmem:[%s10889_s1 + $0x98] sm:$0xff] }
  0xaf   : > { %2033 = vmatprep.subr.bf16.mxu0 %v6735_v46  ;;  %v6679_v46 = vcombine.high %v295_v38, %v299_v39  ;;  %v252_v31 = vld [vmem:[%s10889_s1 + $0xb8] sm:$0xff] }
  0xb0   : > { %2085 = vmatpush1.bf16.msra.mxu1 %v6742_v45  ;;  %v6814_v45 = vcombine.low %v431_v59, %v435_v60  ;;  %v376_v59 = vld [vmem:[%s10889_s1 + $0x498] sm:$0xff] }
  0xb1   : > { %2086 = vmatprep.subr.bf16.mxu1 %v6863_v47  ;;  %v6807_v47 = vcombine.high %v423_v40, %v427_v41  ;;  %v380_v60 = vld [vmem:[%s10889_s1 + $0x4b8] sm:$0xff] }
  0xb2   : > { %2034 = vmatpush2.bf16.msra.mxu0 %v6734_v52  ;;  %v6678_v52 = vcombine.low %v295_v38, %v299_v39  ;;  %v244_v38 = vld [vmem:[%s10889_s1 + $0x78] sm:$0xff] }
  0xb3   : > { %2035 = vmatprep.subr.bf16.mxu0 %v6727_v56  ;;  %v6673_v56 = vcombine.high %v288_v48, %v292_v49  ;;  %v372_v39 = vld [vmem:[%s10889_s1 + $0x478] sm:$0xff] }
  0xb4   : > { %2087 = vmatpush2.bf16.msra.mxu1 %v6862_v53  ;;  %v6806_v53 = vcombine.low %v423_v40, %v427_v41  ;;  %v6632_v40 = vcombine.low %v248_v55, %v252_v31  ;;  %v6760_v41 = vcombine.low %v376_v59, %v380_v60 }
  0xb5   : > { %2088 = vmatprep.subr.bf16.mxu1 %v6855_v57  ;;  %v6801_v57 = vcombine.high %v416_v50, %v420_v51 }
  0xb6   : > { %2036 = vmatpush2.bf16.msra.mxu0 %v6726_v2  ;;  %v6672_v2 = vcombine.low %v288_v48, %v292_v49  ;;  %v360_v48 = vld [vmem:[%s10889_s1 + $0x418] sm:$0xff] }
  0xb7   : > { %2037 = vmatprep.subr.bf16.mxu0 %v6719_v4  ;;  %v6665_v4 = vcombine.high %v280_v61, %v284_v62  ;;  %v364_v49 = vld [vmem:[%s10889_s1 + $0x438] sm:$0xff] }
  0xb8   : > { %2089 = vmatpush2.bf16.msra.mxu1 %v6854_v3  ;;  %v6800_v3 = vcombine.low %v416_v50, %v420_v51 }
  0xb9   : > { %2090 = vmatprep.subr.bf16.mxu1 %v6847_v5  ;;  %v6793_v5 = vcombine.high %v408_v0, %v412_v1 }
  0xba   : > { %2038 = vmatpush2.bf16.msra.mxu0 %v6718_v10  ;;  %v6664_v10 = vcombine.low %v280_v61, %v284_v62  ;;  %v480_v61 = vld [vmem:[%s10889_s1 + $0x7d8] sm:$0xff] }
  0xbb   : > { %2039 = vmatprep.subr.bf16.mxu0 %v6711_v12  ;;  %v6657_v12 = vcombine.high %v272_v6, %v276_v7  ;;  %v484_v62 = vld [vmem:[%s10889_s1 + $0x7f8] sm:$0xff] }
  0xbc   : > { %2091 = vmatpush2.bf16.msra.mxu1 %v6846_v11  ;;  %v6792_v11 = vcombine.low %v408_v0, %v412_v1  ;;  %v6744_v1 = vcombine.low %v360_v48, %v364_v49 }
  0xbd   : > { %2092 = vmatprep.subr.bf16.mxu1 %v6839_v13  ;;  %v6785_v13 = vcombine.high %v400_v8, %v404_v9 }
  0xbe   : > { %2040 = vmatpush2.bf16.msra.mxu0 %v6710_v18  ;;  %v6656_v18 = vcombine.low %v272_v6, %v276_v7  ;;  %v472_v6 = vld [vmem:[%s10889_s1 + $0x798] sm:$0xff] }
  0xbf   : > { %2041 = vmatprep.subr.bf16.mxu0 %v6703_v20  ;;  %v6649_v20 = vcombine.high %v264_v14, %v268_v15  ;;  %v476_v7 = vld [vmem:[%s10889_s1 + $0x7b8] sm:$0xff] }
  0xc0   : > { %2093 = vmatpush2.bf16.msra.mxu1 %v6838_v19  ;;  %v6784_v19 = vcombine.low %v400_v8, %v404_v9  ;;  %v6864_v9 = vcombine.low %v480_v61, %v484_v62 }
  0xc1   : > { %2094 = vmatprep.subr.bf16.mxu1 %v6831_v22  ;;  %v6777_v22 = vcombine.high %v392_v16, %v396_v17 }
  0xc2   : > { %2042 = vmatpush2.bf16.msra.mxu0 %v6702_v28  ;;  %v6648_v28 = vcombine.low %v264_v14, %v268_v15  ;;  %v464_v14 = vld [vmem:[%s10889_s1 + $0x758] sm:$0xff] }
  0xc3   : > { %2043 = vmatprep.subr.bf16.mxu0 %v6695_v30  ;;  %v6641_v30 = vcombine.high %v256_v23, %v260_v24  ;;  %v468_v15 = vld [vmem:[%s10889_s1 + $0x778] sm:$0xff] }
  0xc4   : > { %2095 = vmatpush2.bf16.msra.mxu1 %v6830_v29  ;;  %v6776_v29 = vcombine.low %v392_v16, %v396_v17  ;;  %v6856_v17 = vcombine.low %v472_v6, %v476_v7 }
  0xc5   : > { %2096 = vmatprep.subr.bf16.mxu1 %v6823_v54  ;;  %v6769_v54 = vcombine.high %v384_v26, %v388_v27 }
  0xc6   : > { %2044 = vmatpush2.bf16.msra.mxu0 %v6694_v34  ;;  %v6640_v34 = vcombine.low %v256_v23, %v260_v24  ;;  %v456_v23 = vld [vmem:[%s10889_s1 + $0x718] sm:$0xff] }
  0xc7   : > { %2045 = vmatprep.subr.bf16.mxu0 %v6687_v36  ;;  %v6633_v36 = vcombine.high %v248_v55, %v252_v31  ;;  %v460_v24 = vld [vmem:[%s10889_s1 + $0x738] sm:$0xff] }
  0xc8   : > { %2097 = vmatpush2.bf16.msra.mxu1 %v6822_v35  ;;  %v6768_v35 = vcombine.low %v384_v26, %v388_v27  ;;  %v6848_v27 = vcombine.low %v464_v14, %v468_v15  ;;  %v448_v55 = vld [vmem:[%s10889_s1 + $0x6d8] sm:$0xff] }
  0xc9   : > { %2098 = vmatprep.subr.bf16.mxu1 %v6815_v37  ;;  %v6761_v37 = vcombine.high %v376_v59, %v380_v60  ;;  %v452_v31 = vld [vmem:[%s10889_s1 + $0x6f8] sm:$0xff]  ;;  %v6840_v60 = vcombine.low %v456_v23, %v460_v24 }
  0xca   : > { %2046 = vmatpush2.bf16.msra.mxu0 %v6686_v43 }
  0xcb   : > { %2047 = vmatprep.subr.bf16.mxu0 %v6679_v46  ;;  %v232_v46 = vld [vmem:[%s10889_s1 + $0x18] sm:$0xff] }
  0xcc   : > { %2099 = vmatpush2.bf16.msra.mxu1 %v6814_v45 }
  0xcd   : > { %2100 = vmatprep.subr.bf16.mxu1 %v6807_v47  ;;  %v236_v47 = vld [vmem:[%s10889_s1 + $0x38] sm:$0xff] }
  0xce   : > { %2048 = vmatpush2.bf16.msra.mxu0 %v6678_v52  ;;  %v6617_v52 = vcombine.high %v232_v46, %v236_v47  ;;  %v6616_v0 = vcombine.low %v232_v46, %v236_v47  ;;  %v432_v46 = vld [vmem:[%s10889_s1 + $0x658] sm:$0xff] }
  0xcf   : > { %2123 = vmatprep.subr.bf16.mxu0 %v6673_v56  ;;  %v352_v56 = vld [vmem:[%s10889_s1 + $0x3d8] sm:$0xff] }
  0xd0   : > { %2101 = vmatpush2.bf16.msra.mxu1 %v6806_v53  ;;  %v6745_v53 = vcombine.high %v360_v48, %v364_v49  ;;  %v436_v47 = vld [vmem:[%s10889_s1 + $0x678] sm:$0xff]  ;;  %v2261_v49 = vld [vmem:[%s8055_s20] sm:$0xff] }
  0xd1   : > { %2176 = vmatprep.subr.bf16.mxu1 %v6801_v57  ;;  %2050 = vmatmul.mubr.bf16.vlgmr.msra.gmra.mxu0 %v8216_v21  ;;  %v356_v57 = vld [vmem:[%s10889_s1 + $0x3f8] sm:$0xff] }
  0xd2   : > { %2124 = vmatpush1.bf16.msra.mxu0 %v6672_v2  ;;  %2059 = vmatprep.mubr.bf16.mxu0 %v8235_v32  ;;  %v6737_v2 = vcombine.high %v352_v56, %v356_v57  ;;  %v6736_v8 = vcombine.low %v352_v56, %v356_v57  ;;  %v2266_v56 = vld [vmem:[%s8055_s20 + $0x28] sm:$0xff] }
  0xd3   : > { %2103 = vmatmul.mubr.bf16.vlgmr.msra.gmra.mxu1 %v8225_v25  ;;  %2125 = vmatprep.subr.bf16.mxu0 %v6665_v4  ;;  %v344_v4 = vld [vmem:[%s10889_s1 + $0x398] sm:$0xff] }
  0xd4   : > { %2177 = vmatpush1.bf16.msra.mxu1 %v6800_v3  ;;  %2112 = vmatprep.mubr.bf16.mxu1 %v8244_v33  ;;  %v6865_v3 = vcombine.high %v480_v61, %v484_v62  ;;  %v6817_v61 = vcombine.high %v432_v46, %v436_v47  ;;  %v296_v62 = vld [vmem:[%s10889_s1 + $0x218] sm:$0xff] }
  0xd5   : > { %2178 = vmatprep.subr.bf16.mxu1 %v6793_v5  ;;  %v348_v5 = vld [vmem:[%s10889_s1 + $0x3b8] sm:$0xff] }
  0xd6   : > { %2126 = vmatpush1.bf16.msra.mxu0 %v6664_v10  ;;  %v6729_v10 = vcombine.high %v344_v4, %v348_v5  ;;  %v6728_v16 = vcombine.low %v344_v4, %v348_v5  ;;  %v2284_v4 = vshll.u32 %v2261_v49, 16 }
  0xd7   : > { %2127 = vmatprep.subr.bf16.mxu0 %v6657_v12  ;;  %v336_v12 = vld [vmem:[%s10889_s1 + $0x358] sm:$0xff] }
  0xd8   : > { %2179 = vmatpush1.bf16.msra.mxu1 %v6792_v11  ;;  %v6857_v11 = vcombine.high %v472_v6, %v476_v7 }
  0xd9   : > { %2180 = vmatprep.subr.bf16.mxu1 %v6785_v13  ;;  %2060 = vmatmul.mubr.bf16.gmra.mxu0 %v8261_v42  ;;  %v340_v13 = vld [vmem:[%s10889_s1 + $0x378] sm:$0xff] }
  0xda   : > { %2128 = vmatpush1.bf16.msra.mxu0 %v6656_v18  ;;  %2155 = vmatprep.mubr.bf16.mxu0 %v8077_v58  ;;  %v240_v58 = vld [vmem:[%s10889_s1 + $0x58] sm:$0xff]  ;;  %v6721_v18 = vcombine.high %v336_v12, %v340_v13  ;;  %v6720_v26 = vcombine.low %v336_v12, %v340_v13  ;;  %v6922_v13 = vld [vmem:[%s10889_s1 + $0x9c0] sm:$0xff] }
  0xdb   : > { %2113 = vmatmul.mubr.bf16.gmra.mxu1 %v8263_v44  ;;  %2129 = vmatprep.subr.bf16.mxu0 %v6649_v20  ;;  %v6625_v43 = vcombine.high %v240_v58, %v244_v38  ;;  %v6624_v50 = vcombine.low %v240_v58, %v244_v38  ;;  %v328_v20 = vld [vmem:[%s10889_s1 + $0x318] sm:$0xff] }
  0xdc   : > { %2181 = vmatpush1.bf16.msra.mxu1 %v6784_v19  ;;  %2208 = vmatprep.mubr.bf16.mxu1 %v8093_v63  ;;  %v368_v63 = vld [vmem:[%s10889_s1 + $0x458] sm:$0xff]  ;;  %v6849_v19 = vcombine.high %v464_v14, %v468_v15 }
  0xdd   : > { %2182 = vmatprep.subr.bf16.mxu1 %v6777_v22  ;;  %v6753_v45 = vcombine.high %v368_v63, %v372_v39  ;;  %v6752_v51 = vcombine.low %v368_v63, %v372_v39  ;;  %v332_v22 = vld [vmem:[%s10889_s1 + $0x338] sm:$0xff]  ;;  %v6832_v39 = vcombine.low %v448_v55, %v452_v31 }
  0xde   : > { %2130 = vmatpush1.bf16.msra.mxu0 %v6648_v28  ;;  %v6713_v28 = vcombine.high %v328_v20, %v332_v22  ;;  %v6712_v59 = vcombine.low %v328_v20, %v332_v22  ;;  %v440_v58 = vld [vmem:[%s10889_s1 + $0x698] sm:$0xff]  ;;  %v2286_v22 = vrot.slane %v2284_v4, 5 }
  0xdf   : > { %2131 = vmatprep.subr.bf16.mxu0 %v6641_v30  ;;  %v320_v30 = vld [vmem:[%s10889_s1 + $0x2d8] sm:$0xff] }
  0xe0   : > { %2183 = vmatpush1.bf16.msra.mxu1 %v6776_v29  ;;  %v6841_v29 = vcombine.high %v456_v23, %v460_v24  ;;  %v444_v38 = vld [vmem:[%s10889_s1 + $0x6b8] sm:$0xff] }
  0xe1   : > { %2184 = vmatprep.subr.bf16.mxu1 %v6769_v54  ;;  %v324_v54 = vld [vmem:[%s10889_s1 + $0x2f8] sm:$0xff] }
  0xe2   : > { %2132 = vmatpush1.bf16.msra.mxu0 %v6640_v34  ;;  %v6705_v34 = vcombine.high %v320_v30, %v324_v54  ;;  %v6704_v63 = vcombine.low %v320_v30, %v324_v54 }
  0xe3   : > { %2133 = vmatprep.subr.bf16.mxu0 %v6633_v36  ;;  %v312_v36 = vld [vmem:[%s10889_s1 + $0x298] sm:$0xff] }
  0xe4   : > { %2185 = vmatpush1.bf16.msra.mxu1 %v6768_v35  ;;  %v6833_v35 = vcombine.high %v448_v55, %v452_v31  ;;  %v2264_v31 = vld [vmem:[%s8055_s20 + $0x18] sm:$0x11] }
  0xe5   : > { %2186 = vmatprep.subr.bf16.mxu1 %v6761_v37  ;;  %v316_v37 = vld [vmem:[%s10889_s1 + $0x2b8] sm:$0xff] }
  0xe6   : > { %2134 = vmatpush1.bf16.msra.mxu0 %v6632_v40  ;;  %v6697_v40 = vcombine.high %v312_v36, %v316_v37  ;;  %v6696_v48 = vcombine.low %v312_v36, %v316_v37  ;;  %v6918_v36 = vld [vmem:[%s10889_s1 + $0x9a0] sm:$0xff] }
  0xe7   : > { %2135 = vmatprep.subr.bf16.mxu0 %v6625_v43  ;;  %v304_v43 = vld [vmem:[%s10889_s1 + $0x258] sm:$0xff]  ;;  %v8845_v37 = vld [vmem:[%s10889_s1 + $0xd80] sm:$0xff] }
  0xe8   : > { %2187 = vmatpush1.bf16.msra.mxu1 %v6760_v41  ;;  %v6825_v41 = vcombine.high %v440_v58, %v444_v38 }
  0xe9   : > { %2188 = vmatprep.subr.bf16.mxu1 %v6753_v45  ;;  %v308_v45 = vld [vmem:[%s10889_s1 + $0x278] sm:$0xff] }
  0xea   : > { %2136 = vmatpush1.bf16.msra.mxu0 %v6624_v50  ;;  %v2265_v50 = vld [vmem:[%s8055_s20 + $0x20] sm:$0xff]  ;;  %v6688_v57 = vcombine.low %v304_v43, %v308_v45 }
  0xeb   : > { %2137 = vmatprep.subr.bf16.mxu0 %v6617_v52  ;;  %v6689_v52 = vcombine.high %v304_v43, %v308_v45  ;;  %v2309_v5 = vshrl.u32 %v2265_v50, 16  ;;  %v2312_v6 = vshll.u32 %v2265_v50, 16  ;;  %v2304_v43 = vshll.u32 %v2264_v31, 16 }
  0xec   : > { %2189 = vmatpush1.bf16.msra.mxu1 %v6752_v51  ;;  %v6824_v51 = vcombine.low %v440_v58, %v444_v38  ;;  %v7046_v58 = vld [vmem:[%s10889_s1 + $0xda0] sm:$0xff] }
  0xed   : > { %2190 = vmatprep.subr.bf16.mxu1 %v6745_v53  ;;  %v2262_v53 = vld [vmem:[%s8055_s20 + $0x8] sm:$0xff]  ;;  %v2311_v23 = vrot.slane %v2309_v5, 4  ;;  %v2314_v24 = vrot.slane %v2312_v6, 5  ;;  %v7307_v50 = vcombine.high %v8845_v37, %v7046_v58  ;;  %v2306_v4 = vrot.slane %v2304_v43, 5 }
  0xee   : > { %2138 = vmatpush1.bf16.msra.mxu0 %v6616_v0  ;;  %v300_v0 = vld [vmem:[%s10889_s1 + $0x238] sm:$0xff]  ;;  %v2295_v7 = vshrl.u32 %v2262_v53, 16 }
  0xef   : > { %2139 = vmatprep.subr.bf16.mxu0 %v6737_v2  ;;  %v428_v2 = vld [vmem:[%s10889_s1 + $0x638] sm:$0xff]  ;;  %v6681_v12 = vcombine.high %v296_v62, %v300_v0  ;;  %v6680_v14 = vcombine.low %v296_v62, %v300_v0 }
  0xf0   : > { %2191 = vmatpush1.bf16.msra.mxu1 %v6744_v1  ;;  %v424_v1 = vld [vmem:[%s10889_s1 + $0x618] sm:$0xff] }
  0xf1   : > { %2192 = vmatprep.subr.bf16.mxu1 %v6865_v3  ;;  %v2281_v3 = vshrl.u32 %v2261_v49, 16  ;;  %v6809_v15 = vcombine.high %v424_v1, %v428_v2  ;;  %v6808_v54 = vcombine.low %v424_v1, %v428_v2 }
  0xf2   : > { %2140 = vmatpush2.bf16.msra.mxu0 %v6736_v8  ;;  %v2298_v8 = vshll.u32 %v2262_v53, 16 }
  0xf3   : > { %2141 = vmatprep.subr.bf16.mxu0 %v6729_v10  ;;  %v2326_v10 = vshll.u32 %v2266_v56, 16  ;;  %v2283_v20 = vrot.slane %v2281_v3, 4 }
  0xf4   : > { %2193 = vmatpush2.bf16.msra.mxu1 %v6864_v9  ;;  %v2323_v9 = vshrl.u32 %v2266_v56, 16  ;;  %v7034_v56 = vld [vmem:[%s10889_s1 + $0xd40] sm:$0xff] }
  0xf5   : > { %2194 = vmatprep.subr.bf16.mxu1 %v6857_v11  ;;  %v6816_v11 = vcombine.low %v432_v46, %v436_v47  ;;  %v2328_v30 = vrot.slane %v2326_v10, 5  ;;  %v2287_v38 = vor.u32 %v2286_v22, %v2283_v20 }
  0xf6   : > { %2142 = vmatpush2.bf16.msra.mxu0 %v6728_v16  ;;  %v6926_v16 = vld [vmem:[%s10889_s1 + $0x9e0] sm:$0xff] }
  0xf7   : > { %2143 = vmatprep.subr.bf16.mxu0 %v6721_v18  ;;  %v7054_v18 = vld [vmem:[%s10889_s1 + $0xde0] sm:$0xff]  ;;  %v7187_v55 = vcombine.high %v6922_v13, %v6926_v16 }
  0xf8   : > { %2195 = vmatpush2.bf16.msra.mxu1 %v6856_v17  ;;  %v8826_v17 = vld [vmem:[%s10889_s1 + $0xdc0] sm:$0xff] }
  0xf9   : > { %2196 = vmatprep.subr.bf16.mxu1 %v6849_v19  ;;  %v2263_v19 = vld [vmem:[%s8055_s20 + $0x10] sm:$0x11]  ;;  %v7314_v47 = vcombine.low %v8826_v17, %v7054_v18 }
  0xfa   : > { %2144 = vmatpush2.bf16.msra.mxu0 %v6720_v26  ;;  %v2267_v26 = vld [vmem:[%s8055_s20 + $0x30] sm:$0x11] }
  0xfb   : > { %2145 = vmatprep.subr.bf16.mxu0 %v6713_v28  ;;  %v2300_v28 = vrot.slane %v2298_v8, 5 }
  0xfc   : > { %2197 = vmatpush2.bf16.msra.mxu1 %v6848_v27  ;;  %v2297_v27 = vrot.slane %v2295_v7, 4 }
  0xfd   : > { %2198 = vmatprep.subr.bf16.mxu1 %v6841_v29  ;;  %v2325_v29 = vrot.slane %v2323_v9, 4  ;;  %v7306_v9 = vcombine.low %v8845_v37, %v7046_v58 }
  0xfe   : > { %2146 = vmatpush2.bf16.msra.mxu0 %v6712_v59  ;;  %v2268_v59 = vld [vmem:[%s8055_s20 + $0x38] sm:$0x11] }
  0xff   : > { %2147 = vmatprep.subr.bf16.mxu0 %v6705_v34  ;;  %v7315_v34 = vcombine.high %v8826_v17, %v7054_v18  ;;  %v2329_v45 = vor.u32 %v2328_v30, %v2325_v29  ;;  %v2332_v46 = vshll.u32 %v2268_v59, 16  ;;  %v7030_v17 = vld [vmem:[%s10889_s1 + $0xd20] sm:$0xff] }
 0x100   : > { %2199 = vmatpush2.bf16.msra.mxu1 %v6840_v60  ;;  %v7186_v60 = vcombine.low %v6922_v13, %v6926_v16  ;;  %v6902_v13 = vld [vmem:[%s10889_s1 + $0x920] sm:$0xff] }
 0x101   : > { %2200 = vmatprep.subr.bf16.mxu1 %v6833_v35  ;;  %v6914_v35 = vld [vmem:[%s10889_s1 + $0x980] sm:$0xff]  ;;  %v2330_v5 = vrot.slane %v2329_v45, 4  ;;  %v2334_v6 = vrot.slane %v2332_v46, 5 }
 0x102   : > { %2148 = vmatpush2.bf16.msra.mxu0 %v6704_v63  ;;  %v2290_v63 = vshll.u32 %v2263_v19, 16  ;;  %v7178_v49 = vcombine.low %v6914_v35, %v6918_v36  ;;  %v7026_v16 = vld [vmem:[%s10889_s1 + $0xd00] sm:$0xff] }
 0x103   : > { %2149 = vmatprep.subr.bf16.mxu0 %v6697_v40  ;;  %v2318_v40 = vshll.u32 %v2267_v26, 16  ;;  %v7291_v29 = vcombine.high %v7026_v16, %v7030_v17  ;;  %v6890_v30 = vld [vmem:[%s10889_s1 + $0x8c0] sm:$0xff]  ;;  %v7290_v58 = vcombine.low %v7026_v16, %v7030_v17 }
 0x104   : > { %2201 = vmatpush2.bf16.msra.mxu1 %v6832_v39  ;;  %v2315_v39 = vor.u32 %v2314_v24, %v2311_v23  ;;  %v2292_v62 = vrot.slane %v2290_v63, 5  ;;  %v8905_v23 = vsel %vm8868_vm2, %v2330_v5, %v2334_v6  ;;  %v7018_v59 = vld [vmem:[%s10889_s1 + $0xcc0] sm:$0xff] }
 0x105   : > { %2202 = vmatprep.subr.bf16.mxu1 %v6825_v41  ;;  %v2301_v41 = vor.u32 %v2300_v28, %v2297_v27  ;;  %v2320_v1 = vrot.slane %v2318_v40, 5  ;;  %v7014_v45 = vld [vmem:[%s10889_s1 + $0xca0] sm:$0xff] }
 0x106   : > { %2150 = vmatpush2.bf16.msra.mxu0 %v6696_v48  ;;  %v7179_v48 = vcombine.high %v6914_v35, %v6918_v36  ;;  %v2316_v0 = vrot.slane %v2315_v39, 4  ;;  %v6986_v16 = vld [vmem:[%s10889_s1 + $0xbc0] sm:$0xff] }
 0x107   : > { %2151 = vmatprep.subr.bf16.mxu0 %v6689_v52  ;;  %v6910_v52 = vld [vmem:[%s10889_s1 + $0x960] sm:$0xff]  ;;  %v2302_v3 = vrot.slane %v2301_v41, 4 }
 0x108   : > { %2203 = vmatpush2.bf16.msra.mxu1 %v6824_v51  ;;  %v6906_v51 = vld [vmem:[%s10889_s1 + $0x940] sm:$0xff] }
 0x109   : > { %2204 = vmatprep.subr.bf16.mxu1 %v6817_v61  ;;  %v2288_v61 = vrot.slane %v2287_v38, 4  ;;  %v7171_v10 = vcombine.high %v6906_v51, %v6910_v52  ;;  %v7170_v20 = vcombine.low %v6906_v51, %v6910_v52  ;;  %v8901_v22 = vsel %vm8868_vm2, %v2302_v3, %v2306_v4  ;;  %v6886_v41 = vld [vmem:[%s10889_s1 + $0x8a0] sm:$0xff] }
 0x10a   : > { %2152 = vmatpush2.bf16.msra.mxu0 %v6688_v57  ;;  %v7038_v57 = vld [vmem:[%s10889_s1 + $0xd60] sm:$0xff]  ;;  %v8930_v35 = vcombine.high %v8901_v22, %v8905_v23 }
 0x10b   : > { %2153 = vmatprep.subr.bf16.mxu0 %v6681_v12  ;;  %v6898_v12 = vld [vmem:[%s10889_s1 + $0x900] sm:$0xff]  ;;  %v8893_v18 = vsel %vm8868_vm2, %v2288_v61, %v2292_v62  ;;  %v7298_v26 = vcombine.low %v7034_v56, %v7038_v57 }
 0x10c   : > { %2205 = vmatpush2.bf16.msra.mxu1 %v6816_v11  ;;  %v7299_v11 = vcombine.high %v7034_v56, %v7038_v57  ;;  %v7163_v27 = vcombine.high %v6898_v12, %v6902_v13  ;;  %v7162_v36 = vcombine.low %v6898_v12, %v6902_v13  ;;  %v6874_v57 = vld [vmem:[%s10889_s1 + $0x840] sm:$0xff] }
 0x10d   : > { %2206 = vmatprep.subr.bf16.mxu1 %v6809_v15  ;;  %v6878_v61 = vld [vmem:[%s10889_s1 + $0x860] sm:$0xff] }
 0x10e   : > { %2154 = vmatpush2.bf16.msra.mxu0 %v6680_v14  ;;  %v7139_v5 = vcombine.high %v6874_v57, %v6878_v61  ;;  %v6990_v17 = vld [vmem:[%s10889_s1 + $0xbe0] sm:$0xff] }
 0x10f   : > { %3961 = vmatprep.subr.bf16.mxu0 %v7187_v55 }
 0x110   : > { %2207 = vmatpush2.bf16.msra.mxu1 %v6808_v54  ;;  %v6894_v54 = vld [vmem:[%s10889_s1 + $0x8e0] sm:$0xff] }
 0x111   : > { %4014 = vmatprep.subr.bf16.mxu1 %v7315_v34  ;;  %v1839_v53 = vpop.f32.mrf.mxu0  ;;  %2156 = vmatmul.mubr.bf16.vlgmr.msra.gmra.mxu0 %v8216_v21  ;;  %v7155_v38 = vcombine.high %v6890_v30, %v6894_v54 }
 0x112   : > { %3962 = vmatpush1.bf16.msra.mxu0 %v7186_v60  ;;  %2165 = vmatprep.mubr.bf16.mxu0 %v8235_v32  ;;  %v8897_v32 = vsel %vm8868_vm2, %v2316_v0, %v2320_v1  ;;  %v7022_v60 = vld [vmem:[%s10889_s1 + $0xce0] sm:$0xff] }
 0x113   : > { %v1892_v2 = vpop.f32.mrf.mxu1  ;;  %2209 = vmatmul.mubr.bf16.vlgmr.msra.gmra.mxu1 %v8225_v25  ;;  %v1841_v8 = vpop.f32.mrf.mxu0  ;;  %3963 = vmatprep.subr.bf16.mxu0 %v7179_v48  ;;  %v8917_v55 = vcombine.high %v8893_v18, %v8897_v32  ;;  %v7283_v40 = vcombine.high %v7018_v59, %v7022_v60  ;;  %v7154_v48 = vcombine.low %v6890_v30, %v6894_v54  ;;  %v7002_v0 = vld [vmem:[%s10889_s1 + $0xc40] sm:$0xff] }
 0x114   : > { %v8872_v7 = vadd.f32 %v1892_v2, %v1839_v53  ;;  %4015 = vmatpush1.bf16.msra.mxu1 %v7314_v47  ;;  %2218 = vmatprep.mubr.bf16.mxu1 %v8244_v33  ;;  %v7006_v1 = vld [vmem:[%s10889_s1 + $0xc60] sm:$0xff] }
 0x115   : > { %v1894_v25 = vpop.f32.mrf.mxu1  ;;  %4016 = vmatprep.subr.bf16.mxu1 %v7307_v50  ;;  %v1843_v15 = vpop.f32.mrf.mxu0  ;;  %v7282_v50 = vcombine.low %v7018_v59, %v7022_v60  ;;  %v7267_v6 = vcombine.high %v7002_v0, %v7006_v1  ;;  %v7266_v12 = vcombine.low %v7002_v0, %v7006_v1  ;;  %v6982_v30 = vld [vmem:[%s10889_s1 + $0xba0] sm:$0xff]  ;;  %v7250_v60 = vcombine.low %v6986_v16, %v6990_v17 }
 0x116   : > { %10894 = vst [vmem:[#allocation2_spill] sm:$0xff] %v8872_v7  ;;  %v8882_v14 = vadd.f32 %v1894_v25, %v1841_v8  ;;  %3964 = vmatpush1.bf16.msra.mxu0 %v7178_v49  ;;  %v6866_v8 = vld [vmem:[%s10889_s1 + $0x800] sm:$0xff] }
 0x117   : > { %v1896_v19 = vpop.f32.mrf.mxu1  ;;  %v1845_v24 = vpop.f32.mrf.mxu0  ;;  %3965 = vmatprep.subr.bf16.mxu0 %v7171_v10  ;;  %v6994_v10 = vld [vmem:[%s10889_s1 + $0xc00] sm:$0xff] }
 0x118   : > { %10895 = vst [vmem:[#allocation3_spill] sm:$0xff] %v8882_v14  ;;  %v8907_v33 = vadd.f32 %v1896_v19, %v1843_v15  ;;  %4017 = vmatpush1.bf16.msra.mxu1 %v7306_v9  ;;  %v6870_v9 = vld [vmem:[%s10889_s1 + $0x820] sm:$0xff]  ;;  %v7933_v14 = vld [vmem:[%s8055_s20 + $0x78] sm:$0x11] }
 0x119   : > { %v1898_v28 = vpop.f32.mrf.mxu1  ;;  %4018 = vmatprep.subr.bf16.mxu1 %v7299_v11  ;;  %v1849_v34 = vpop.f32.mrf.mxu0  ;;  %2166 = vmatmul.mubr.bf16.gmra.mxu0 %v8261_v42  ;;  %v6882_v42 = vld [vmem:[%s10889_s1 + $0x880] sm:$0xff]  ;;  %v7138_v11 = vcombine.low %v6874_v57, %v6878_v61  ;;  %v7131_v13 = vcombine.high %v6866_v8, %v6870_v9 }
 0x11a   : > { %10896 = vst [vmem:[#allocation4_spill] sm:$0xff] %v8907_v33  ;;  %v8919_v31 = vadd.f32 %v1898_v28, %v1845_v24  ;;  %3966 = vmatpush1.bf16.msra.mxu0 %v7170_v20  ;;  %3993 = vmatprep.mubr.bf16.mxu0 %v8917_v55  ;;  %v7147_v51 = vcombine.high %v6882_v42, %v6886_v41  ;;  %v6998_v25 = vld [vmem:[%s10889_s1 + $0xc20] sm:$0xff]  ;;  %v7932_v33 = vld [vmem:[%s8055_s20 + $0x58] sm:$0x11] }
 0x11b   : > { %v1902_v37 = vpop.f32.mrf.mxu1  ;;  %2219 = vmatmul.mubr.bf16.gmra.mxu1 %v8263_v44  ;;  %3967 = vmatprep.subr.bf16.mxu0 %v7163_v27  ;;  %v1851_v39 = vpop.f32.mrf.mxu0  ;;  %v7010_v44 = vld [vmem:[%s10889_s1 + $0xc80] sm:$0xff]  ;;  %v7146_v3 = vcombine.low %v6882_v42, %v6886_v41  ;;  %v7259_v15 = vcombine.high %v6994_v10, %v6998_v25  ;;  %v7130_v24 = vcombine.low %v6866_v8, %v6870_v9  ;;  %v2270_v8 = vld [vmem:[%s8055_s20 + $0x48] sm:$0xff] }
 0x11c   : > { %10897 = vst [vmem:[#allocation5_spill] sm:$0xff] %v8919_v31  ;;  %4019 = vmatpush1.bf16.msra.mxu1 %v7298_v26  ;;  %v8933_v63 = vadd.f32 %v1902_v37, %v1849_v34  ;;  %4046 = vmatprep.mubr.bf16.mxu1 %v8930_v35  ;;  %v7275_v56 = vcombine.high %v7010_v44, %v7014_v45  ;;  %v7114_v19 = vld [vmem:[%s10889_s1 + $0xfc0] sm:$0xff]  ;;  %v2274_v9 = vld [vmem:[%s8055_s20 + $0x68] sm:$0xff] }
 0x11d   : > { %4020 = vmatprep.subr.bf16.mxu1 %v7291_v29  ;;  %v1904_v43 = vpop.f32.mrf.mxu1  ;;  %v1853_v47 = vpop.f32.mrf.mxu0  ;;  %v7274_v4 = vcombine.low %v7010_v44, %v7014_v45  ;;  %v7118_v20 = vld [vmem:[%s10889_s1 + $0xfe0] sm:$0xff]  ;;  %v7258_v26 = vcombine.low %v6994_v10, %v6998_v25  ;;  %v7251_v27 = vcombine.high %v6986_v16, %v6990_v17  ;;  %v4424_v31 = vld [vmem:[%s8055_s20 + $0x68] sm:$0xee] }
 0x11e   : > { %10898 = vst [vmem:[#allocation6_spill] sm:$0xff] %v8933_v63  ;;  %v8948_v46 = vadd.f32 %v1904_v43, %v1851_v39  ;;  %3968 = vmatpush1.bf16.msra.mxu0 %v7162_v36  ;;  %v7379_v28 = vcombine.high %v7114_v19, %v7118_v20  ;;  %v6978_v29 = vld [vmem:[%s10889_s1 + $0xb80] sm:$0xff]  ;;  %v7378_v34 = vcombine.low %v7114_v19, %v7118_v20 }
 0x11f   : > { %v1906_v49 = vpop.f32.mrf.mxu1  ;;  %3969 = vmatprep.subr.bf16.mxu0 %v7155_v38  ;;  %v1855_v53 = vpop.f32.mrf.mxu0  ;;  %v7106_v54 = vld [vmem:[%s10889_s1 + $0xf80] sm:$0xff]  ;;  %v7243_v36 = vcombine.high %v6978_v29, %v6982_v30  ;;  %v7242_v42 = vcombine.low %v6978_v29, %v6982_v30 }
 0x120   : > { %10899 = vst [vmem:[#allocation7_spill] sm:$0xff] %v8948_v46  ;;  %4021 = vmatpush1.bf16.msra.mxu1 %v7290_v58  ;;  %v8951_v52 = vadd.f32 %v1906_v49, %v1853_v47  ;;  %v7110_v59 = vld [vmem:[%s10889_s1 + $0xfa0] sm:$0xff] }
 0x121   : > { %4022 = vmatprep.subr.bf16.mxu1 %v7283_v40  ;;  %v1908_v62 = vpop.f32.mrf.mxu1  ;;  %v7371_v37 = vcombine.high %v7106_v54, %v7110_v59  ;;  %v6970_v58 = vld [vmem:[%s10889_s1 + $0xb40] sm:$0xff]  ;;  %v7370_v41 = vcombine.low %v7106_v54, %v7110_v59 }
 0x122   : > { %10900 = vst [vmem:[#allocation8_spill] sm:$0xff] %v8951_v52  ;;  %v8965_v2 = vadd.f32 %v1908_v62, %v1855_v53  ;;  %3970 = vmatpush1.bf16.msra.mxu0 %v7154_v48  ;;  %v6974_v38 = vld [vmem:[%s10889_s1 + $0xb60] sm:$0xff] }
 0x123   : > { %3971 = vmatprep.subr.bf16.mxu0 %v7147_v51  ;;  %v7098_v39 = vld [vmem:[%s10889_s1 + $0xf40] sm:$0xff]  ;;  %v7235_v43 = vcombine.high %v6970_v58, %v6974_v38 }
 0x124   : > { %10901 = vst [vmem:[#allocation9_spill] sm:$0xff] %v8965_v2  ;;  %4023 = vmatpush1.bf16.msra.mxu1 %v7282_v50  ;;  %v7102_v40 = vld [vmem:[%s10889_s1 + $0xf60] sm:$0xff]  ;;  %v7234_v50 = vcombine.low %v6970_v58, %v6974_v38  ;;  %v2271_v58 = vld [vmem:[%s8055_s20 + $0x50] sm:$0x11] }
 0x125   : > { %4024 = vmatprep.subr.bf16.mxu1 %v7275_v56  ;;  %v7363_v44 = vcombine.high %v7098_v39, %v7102_v40  ;;  %v6962_v45 = vld [vmem:[%s10889_s1 + $0xb00] sm:$0xff]  ;;  %v7362_v51 = vcombine.low %v7098_v39, %v7102_v40 }
 0x126   : > { %3972 = vmatpush1.bf16.msra.mxu0 %v7146_v3  ;;  %v6966_v47 = vld [vmem:[%s10889_s1 + $0xb20] sm:$0xff] }
 0x127   : > { %3973 = vmatprep.subr.bf16.mxu0 %v7139_v5  ;;  %v7090_v48 = vld [vmem:[%s10889_s1 + $0xf00] sm:$0xff]  ;;  %v7227_v53 = vcombine.high %v6962_v45, %v6966_v47  ;;  %v7226_v1 = vcombine.low %v6962_v45, %v6966_v47 }
 0x128   : > { %4025 = vmatpush1.bf16.msra.mxu1 %v7274_v4  ;;  %v7094_v49 = vld [vmem:[%s10889_s1 + $0xf20] sm:$0xff] }
 0x129   : > { %4026 = vmatprep.subr.bf16.mxu1 %v7267_v6  ;;  %v7355_v56 = vcombine.high %v7090_v48, %v7094_v49  ;;  %v6954_v57 = vld [vmem:[%s10889_s1 + $0xac0] sm:$0xff]  ;;  %v7354_v5 = vcombine.low %v7090_v48, %v7094_v49 }
 0x12a   : > { %3974 = vmatpush1.bf16.msra.mxu0 %v7138_v11  ;;  %v6958_v61 = vld [vmem:[%s10889_s1 + $0xae0] sm:$0xff] }
 0x12b   : > { %3975 = vmatprep.subr.bf16.mxu0 %v7131_v13  ;;  %v7082_v62 = vld [vmem:[%s10889_s1 + $0xec0] sm:$0xff]  ;;  %v7219_v6 = vcombine.high %v6954_v57, %v6958_v61  ;;  %v7218_v10 = vcombine.low %v6954_v57, %v6958_v61 }
 0x12c   : > { %4027 = vmatpush1.bf16.msra.mxu1 %v7266_v12  ;;  %v7086_v0 = vld [vmem:[%s10889_s1 + $0xee0] sm:$0xff] }
 0x12d   : > { %4028 = vmatprep.subr.bf16.mxu1 %v7259_v15  ;;  %v2269_v3 = vld [vmem:[%s8055_s20 + $0x40] sm:$0xff]  ;;  %v7347_v25 = vcombine.high %v7082_v62, %v7086_v0  ;;  %v7346_v29 = vcombine.low %v7082_v62, %v7086_v0 }
 0x12e   : > { %3976 = vmatpush1.bf16.msra.mxu0 %v7130_v24  ;;  %v2273_v4 = vld [vmem:[%s8055_s20 + $0x60] sm:$0xff]  ;;  %v2337_v16 = vshrl.u32 %v2269_v3, 16  ;;  %v2340_v17 = vshll.u32 %v2269_v3, 16  ;;  %v2351_v24 = vshrl.u32 %v2270_v8, 16  ;;  %v2346_v3 = vshll.u32 %v2271_v58, 16 }
 0x12f   : > { %3977 = vmatprep.subr.bf16.mxu0 %v7251_v27  ;;  %v6946_v11 = vld [vmem:[%s10889_s1 + $0xa80] sm:$0xff]  ;;  %v2365_v19 = vshrl.u32 %v2273_v4, 16  ;;  %v2368_v20 = vshll.u32 %v2273_v4, 16  ;;  %v2379_v27 = vshrl.u32 %v2274_v9, 16  ;;  %v9103_v58 = vcombine.low %v8893_v18, %v8897_v32 }
 0x130   : > { %4029 = vmatpush1.bf16.msra.mxu1 %v7258_v26  ;;  %v6950_v12 = vld [vmem:[%s10889_s1 + $0xaa0] sm:$0xff]  ;;  %v2354_v26 = vshll.u32 %v2270_v8, 16  ;;  %v2339_v38 = vrot.slane %v2337_v16, 4  ;;  %v2342_v39 = vrot.slane %v2340_v17, 5  ;;  %v6927_v16 = vld [vmem:[%s10889_s1 + $0x9e8] sm:$0xff] }
 0x131   : > { %4030 = vmatprep.subr.bf16.mxu1 %v7379_v28  ;;  %v7074_v13 = vld [vmem:[%s10889_s1 + $0xe80] sm:$0xff]  ;;  %v2382_v28 = vshll.u32 %v2274_v9, 16  ;;  %v7211_v30 = vcombine.high %v6946_v11, %v6950_v12  ;;  %v7210_v59 = vcombine.low %v6946_v11, %v6950_v12  ;;  %v2367_v40 = vrot.slane %v2365_v19, 4  ;;  %v7051_v17 = vld [vmem:[%s10889_s1 + $0xdc8] sm:$0xff] }
 0x132   : > { %3978 = vmatpush2.bf16.msra.mxu0 %v7250_v60  ;;  %v7078_v15 = vld [vmem:[%s10889_s1 + $0xea0] sm:$0xff]  ;;  %v2381_v45 = vrot.slane %v2379_v27, 4  ;;  %v7055_v19 = vld [vmem:[%s10889_s1 + $0xde8] sm:$0xff] }
 0x133   : > { %3979 = vmatprep.subr.bf16.mxu0 %v7243_v36  ;;  %v6938_v54 = vld [vmem:[%s10889_s1 + $0xa40] sm:$0xff]  ;;  %v7339_v60 = vcombine.high %v7074_v13, %v7078_v15  ;;  %v2384_v47 = vrot.slane %v2382_v28, 5  ;;  %v7338_v48 = vcombine.low %v7074_v13, %v7078_v15  ;;  %v6923_v15 = vld [vmem:[%s10889_s1 + $0x9c8] sm:$0xff] }
 0x134   : > { %4031 = vmatpush2.bf16.msra.mxu1 %v7378_v34  ;;  %v6942_v34 = vld [vmem:[%s10889_s1 + $0xa60] sm:$0xff]  ;;  %v7188_v18 = vcombine.low %v6923_v15, %v6927_v16 }
 0x135   : > { %4032 = vmatprep.subr.bf16.mxu1 %v7371_v37  ;;  %v7066_v36 = vld [vmem:[%s10889_s1 + $0xe40] sm:$0xff]  ;;  %v7203_v49 = vcombine.high %v6938_v54, %v6942_v34  ;;  %v2385_v9 = vor.u32 %v2384_v47, %v2381_v45 }
 0x136   : > { %3980 = vmatpush2.bf16.msra.mxu0 %v7242_v42  ;;  %v7070_v37 = vld [vmem:[%s10889_s1 + $0xe60] sm:$0xff]  ;;  %v2370_v42 = vrot.slane %v2368_v20, 5 }
 0x137   : > { %3981 = vmatprep.subr.bf16.mxu0 %v7235_v43  ;;  %v2353_v43 = vrot.slane %v2351_v24, 4  ;;  %v6930_v57 = vld [vmem:[%s10889_s1 + $0xa00] sm:$0xff]  ;;  %v2348_v24 = vrot.slane %v2346_v3, 5 }
 0x138   : > { %4033 = vmatpush2.bf16.msra.mxu1 %v7370_v41  ;;  %v2275_v41 = vld [vmem:[%s8055_s20 + $0x70] sm:$0x11]  ;;  %v6934_v61 = vld [vmem:[%s10889_s1 + $0xa20] sm:$0xff]  ;;  %v2371_v4 = vor.u32 %v2370_v42, %v2367_v40 }
 0x139   : > { %4034 = vmatprep.subr.bf16.mxu1 %v7363_v44  ;;  %v2356_v44 = vrot.slane %v2354_v26, 5  ;;  %v7058_v62 = vld [vmem:[%s10889_s1 + $0xe00] sm:$0xff]  ;;  %v7195_v11 = vcombine.high %v6930_v57, %v6934_v61  ;;  %v7194_v12 = vcombine.low %v6930_v57, %v6934_v61 }
 0x13a   : > { %3982 = vmatpush2.bf16.msra.mxu0 %v7234_v50  ;;  %v2272_v50 = vld [vmem:[%s8055_s20 + $0x58] sm:$0x11]  ;;  %v7062_v0 = vld [vmem:[%s10889_s1 + $0xe20] sm:$0xff]  ;;  %v2372_v26 = vrot.slane %v2371_v4, 4  ;;  %v6899_v4 = vld [vmem:[%s10889_s1 + $0x908] sm:$0xff] }
 0x13b   : > { %3983 = vmatprep.subr.bf16.mxu0 %v7227_v53  ;;  %v7202_v53 = vcombine.low %v6938_v54, %v6942_v34  ;;  %v2360_v8 = vshll.u32 %v2272_v50, 16  ;;  %v7323_v13 = vcombine.high %v7058_v62, %v7062_v0  ;;  %v7317_v34 = vcombine.high %v7051_v17, %v7055_v19  ;;  %v7035_v50 = vld [vmem:[%s10889_s1 + $0xd48] sm:$0xff]  ;;  %v7470_v2 = vld [vmem:[%s10889_s1 + $0x1260] sm:$0xff] }
 0x13c   : > { %4035 = vmatpush2.bf16.msra.mxu1 %v7362_v51  ;;  %v2276_v51 = vld [vmem:[%s8055_s20 + $0x78] sm:$0x11]  ;;  %v7458_v46 = vld [vmem:[%s10889_s1 + $0x1200] sm:$0xff] }
 0x13d   : > { %4036 = vmatprep.subr.bf16.mxu1 %v7355_v56  ;;  %v7331_v56 = vcombine.high %v7066_v36, %v7070_v37 }
 0x13e   : > { %3984 = vmatpush2.bf16.msra.mxu0 %v7226_v1  ;;  %v2343_v1 = vor.u32 %v2342_v39, %v2339_v38  ;;  %v7043_v38 = vld [vmem:[%s10889_s1 + $0xd88] sm:$0xff] }
 0x13f   : > { %3985 = vmatprep.subr.bf16.mxu0 %v7219_v6  ;;  %v2357_v6 = vor.u32 %v2356_v44, %v2353_v43  ;;  %v7047_v39 = vld [vmem:[%s10889_s1 + $0xda8] sm:$0xff]  ;;  %v7316_v44 = vcombine.low %v7051_v17, %v7055_v19 }
 0x140   : > { %4037 = vmatpush2.bf16.msra.mxu1 %v7354_v5  ;;  %v2374_v5 = vshll.u32 %v2275_v41, 16  ;;  %v2344_v20 = vrot.slane %v2343_v1, 4  ;;  %v9117_v41 = vcombine.low %v8901_v22, %v8905_v23  ;;  %v7309_v47 = vcombine.high %v7043_v38, %v7047_v39  ;;  %v6907_v22 = vld [vmem:[%s10889_s1 + $0x948] sm:$0xff] }
 0x141   : > { %4038 = vmatprep.subr.bf16.mxu1 %v7347_v25  ;;  %v7330_v25 = vcombine.low %v7066_v36, %v7070_v37  ;;  %v2358_v28 = vrot.slane %v2357_v6, 4  ;;  %v6915_v36 = vld [vmem:[%s10889_s1 + $0x988] sm:$0xff] }
 0x142   : > { %3986 = vmatpush2.bf16.msra.mxu0 %v7218_v10  ;;  %v2388_v10 = vshll.u32 %v2276_v51, 16  ;;  %v2376_v27 = vrot.slane %v2374_v5, 5  ;;  %v6919_v37 = vld [vmem:[%s10889_s1 + $0x9a8] sm:$0xff]  ;;  %v2349_v40 = vsel %vm8868_vm2, %v2344_v20, %v2348_v24 }
 0x143   : > { %3987 = vmatprep.subr.bf16.mxu0 %v7211_v30  ;;  %v2386_v30 = vrot.slane %v2385_v9, 4  ;;  %v7181_v45 = vcombine.high %v6915_v36, %v6919_v37  ;;  %v6911_v23 = vld [vmem:[%s10889_s1 + $0x968] sm:$0xff] }
 0x144   : > { %4039 = vmatpush2.bf16.msra.mxu1 %v7346_v29  ;;  %v2362_v29 = vrot.slane %v2360_v8, 5  ;;  %v2390_v54 = vrot.slane %v2388_v10, 5  ;;  %v2377_v42 = vsel %vm8868_vm2, %v2372_v26, %v2376_v27  ;;  %v7039_v51 = vld [vmem:[%s10889_s1 + $0xd68] sm:$0xff] }
 0x145   : > { %4040 = vmatprep.subr.bf16.mxu1 %v7339_v60  ;;  %v7189_v60 = vcombine.high %v6923_v15, %v6927_v16  ;;  %v7301_v3 = vcombine.high %v7035_v50, %v7039_v51  ;;  %v6903_v5 = vld [vmem:[%s10889_s1 + $0x928] sm:$0xff]  ;;  %v9153_v9 = vcombine.low %v2349_v40, %v2377_v42  ;;  %v7300_v17 = vcombine.low %v7035_v50, %v7039_v51 }
 0x146   : > { %3988 = vmatpush2.bf16.msra.mxu0 %v7210_v59  ;;  %v7322_v59 = vcombine.low %v7058_v62, %v7062_v0  ;;  %v2363_v32 = vsel %vm8868_vm2, %v2358_v28, %v2362_v29  ;;  %v2391_v43 = vsel %vm8868_vm2, %v2386_v30, %v2390_v54  ;;  %v7308_v62 = vcombine.low %v7043_v38, %v7047_v39  ;;  %v7027_v10 = vld [vmem:[%s10889_s1 + $0xd08] sm:$0xff] }
 0x147   : > { %3989 = vmatprep.subr.bf16.mxu0 %v7203_v49  ;;  %v9132_v21 = vcombine.high %v2363_v32, %v2391_v43  ;;  %v7173_v0 = vcombine.high %v6907_v22, %v6911_v23  ;;  %v7165_v19 = vcombine.high %v6899_v4, %v6903_v5  ;;  %v6891_v26 = vld [vmem:[%s10889_s1 + $0x8c8] sm:$0xff] }
 0x148   : > { %4041 = vmatpush2.bf16.msra.mxu1 %v7338_v48  ;;  %v9123_v48 = vcombine.high %v2349_v40, %v2377_v42  ;;  %v6895_v27 = vld [vmem:[%s10889_s1 + $0x8e8] sm:$0xff] }
 0x149   : > { %4042 = vmatprep.subr.bf16.mxu1 %v7331_v56  ;;  %v7180_v56 = vcombine.low %v6915_v36, %v6919_v37  ;;  %v7019_v29 = vld [vmem:[%s10889_s1 + $0xcc8] sm:$0xff]  ;;  %v7157_v36 = vcombine.high %v6891_v26, %v6895_v27 }
 0x14a   : > { %3990 = vmatpush2.bf16.msra.mxu0 %v7202_v53  ;;  %v7023_v30 = vld [vmem:[%s10889_s1 + $0xce8] sm:$0xff] }
 0x14b   : > { %3991 = vmatprep.subr.bf16.mxu0 %v7195_v11  ;;  %v7285_v39 = vcombine.high %v7019_v29, %v7023_v30  ;;  %v6883_v40 = vld [vmem:[%s10889_s1 + $0x888] sm:$0xff] }
 0x14c   : > { %4043 = vmatpush2.bf16.msra.mxu1 %v7330_v25  ;;  %v7031_v25 = vld [vmem:[%s10889_s1 + $0xd28] sm:$0xff] }
 0x14d   : > { %4044 = vmatprep.subr.bf16.mxu1 %v7323_v13  ;;  %v7172_v13 = vcombine.low %v6907_v22, %v6911_v23  ;;  %v7293_v24 = vcombine.high %v7027_v10, %v7031_v25  ;;  %v6887_v42 = vld [vmem:[%s10889_s1 + $0x8a8] sm:$0xff]  ;;  %v7284_v23 = vcombine.low %v7019_v29, %v7023_v30 }
 0x14e   : > { %3992 = vmatpush2.bf16.msra.mxu0 %v7194_v12  ;;  %v9161_v12 = vcombine.low %v2363_v32, %v2391_v43  ;;  %v7011_v32 = vld [vmem:[%s10889_s1 + $0xc88] sm:$0xff] }
 0x14f   : > { %4067 = vmatprep.subr.bf16.mxu0 %v7189_v60  ;;  %v7015_v43 = vld [vmem:[%s10889_s1 + $0xca8] sm:$0xff] }
 0x150   : > { %4045 = vmatpush2.bf16.msra.mxu1 %v7322_v59  ;;  %v7164_v59 = vcombine.low %v6899_v4, %v6903_v5  ;;  %v7148_v4 = vcombine.low %v6883_v40, %v6887_v42  ;;  %v7276_v5 = vcombine.low %v7011_v32, %v7015_v43  ;;  %v7115_v29 = vld [vmem:[%s10889_s1 + $0xfc8] sm:$0xff] }
 0x151   : > { %4120 = vmatprep.subr.bf16.mxu1 %v7317_v34  ;;  %v1945_v49 = vpop.f32.mrf.mxu0  ;;  %3994 = vmatmul.mubr.bf16.vlgmr.msra.gmra.mxu0 %v9103_v58  ;;  %v7292_v34 = vcombine.low %v7027_v10, %v7031_v25  ;;  %v6867_v25 = vld [vmem:[%s10889_s1 + $0x808] sm:$0xff] }
 0x152   : > { %4068 = vmatpush1.bf16.msra.mxu0 %v7188_v18  ;;  %4003 = vmatprep.mubr.bf16.mxu0 %v9123_v48  ;;  %v7119_v30 = vld [vmem:[%s10889_s1 + $0xfe8] sm:$0xff] }
 0x153   : > { %v1998_v53 = vpop.f32.mrf.mxu1  ;;  %4047 = vmatmul.mubr.bf16.vlgmr.msra.gmra.mxu1 %v9117_v41  ;;  %v1947_v61 = vpop.f32.mrf.mxu0  ;;  %4069 = vmatprep.subr.bf16.mxu0 %v7181_v45 }
 0x154   : > { %v9141_v57 = vadd.f32 %v1998_v53, %v1945_v49  ;;  %4121 = vmatpush1.bf16.msra.mxu1 %v7316_v44  ;;  %4056 = vmatprep.mubr.bf16.mxu1 %v9132_v21  ;;  %v7149_v49 = vcombine.high %v6883_v40, %v6887_v42  ;;  %v7277_v53 = vcombine.high %v7011_v32, %v7015_v43  ;;  %v7111_v40 = vld [vmem:[%s10889_s1 + $0xfa8] sm:$0xff] }
 0x155   : > { %v2000_v1 = vpop.f32.mrf.mxu1  ;;  %4122 = vmatprep.subr.bf16.mxu1 %v7309_v47  ;;  %v1949_v8 = vpop.f32.mrf.mxu0  ;;  %v7156_v47 = vcombine.low %v6891_v26, %v6895_v27  ;;  %v6987_v26 = vld [vmem:[%s10889_s1 + $0xbc8] sm:$0xff] }
 0x156   : > { %v9150_v6 = vadd.f32 %v2000_v1, %v1947_v61  ;;  %4070 = vmatpush1.bf16.msra.mxu0 %v7180_v56  ;;  %v6875_v56 = vld [vmem:[%s10889_s1 + $0x848] sm:$0xff] }
 0x157   : > { %v2002_v11 = vpop.f32.mrf.mxu1  ;;  %v1951_v16 = vpop.f32.mrf.mxu0  ;;  %4071 = vmatprep.subr.bf16.mxu0 %v7173_v0  ;;  %v6879_v61 = vld [vmem:[%s10889_s1 + $0x868] sm:$0xff] }
 0x158   : > { %v9163_v15 = vadd.f32 %v2002_v11, %v1949_v8  ;;  %4123 = vmatpush1.bf16.msra.mxu1 %v7308_v62  ;;  %v7003_v0 = vld [vmem:[%s10889_s1 + $0xc48] sm:$0xff]  ;;  %v7141_v8 = vcombine.high %v6875_v56, %v6879_v61 }
 0x159   : > { %v2004_v20 = vpop.f32.mrf.mxu1  ;;  %4124 = vmatprep.subr.bf16.mxu1 %v7301_v3  ;;  %4004 = vmatmul.mubr.bf16.gmra.mxu0 %v9153_v9  ;;  %v1955_v54 = vpop.f32.mrf.mxu0  ;;  %v7007_v1 = vld [vmem:[%s10889_s1 + $0xc68] sm:$0xff] }
 0x15a   : > { %v9171_v28 = vadd.f32 %v2004_v20, %v1951_v16  ;;  %4072 = vmatpush1.bf16.msra.mxu0 %v7172_v13  ;;  %4099 = vmatprep.mubr.bf16.mxu0 %v8917_v55  ;;  %v7269_v10 = vcombine.high %v7003_v0, %v7007_v1  ;;  %v6871_v11 = vld [vmem:[%s10889_s1 + $0x828] sm:$0xff] }
 0x15b   : > { %4057 = vmatmul.mubr.bf16.gmra.mxu1 %v9161_v12  ;;  %v2008_v60 = vpop.f32.mrf.mxu1  ;;  %4073 = vmatprep.subr.bf16.mxu0 %v7165_v19  ;;  %v1957_v38 = vpop.f32.mrf.mxu0  ;;  %v6995_v13 = vld [vmem:[%s10889_s1 + $0xc08] sm:$0xff]  ;;  %v7268_v19 = vcombine.low %v7003_v0, %v7007_v1  ;;  %v7133_v20 = vcombine.high %v6867_v25, %v6871_v11 }
 0x15c   : > { %4125 = vmatpush1.bf16.msra.mxu1 %v7300_v17  ;;  %v9181_v37 = vadd.f32 %v2008_v60, %v1955_v54  ;;  %4152 = vmatprep.mubr.bf16.mxu1 %v8930_v35  ;;  %v6999_v16 = vld [vmem:[%s10889_s1 + $0xc28] sm:$0xff]  ;;  %v7140_v17 = vcombine.low %v6875_v56, %v6879_v61  ;;  %v7132_v54 = vcombine.low %v6867_v25, %v6871_v11 }
 0x15d   : > { %4126 = vmatprep.subr.bf16.mxu1 %v7293_v24  ;;  %v2010_v18 = vpop.f32.mrf.mxu1  ;;  %v1959_v45 = vpop.f32.mrf.mxu0  ;;  %v7261_v24 = vcombine.high %v6995_v13, %v6999_v16  ;;  %v6991_v27 = vld [vmem:[%s10889_s1 + $0xbe8] sm:$0xff] }
 0x15e   : > { %v9196_v44 = vadd.f32 %v2010_v18, %v1957_v38  ;;  %4074 = vmatpush1.bf16.msra.mxu0 %v7164_v59  ;;  %v7260_v59 = vcombine.low %v6995_v13, %v6999_v16  ;;  %v7253_v60 = vcombine.high %v6987_v26, %v6991_v27  ;;  %v6983_v38 = vld [vmem:[%s10889_s1 + $0xba8] sm:$0xff]  ;;  %v7252_v42 = vcombine.low %v6987_v26, %v6991_v27 }
 0x15f   : > { %v2012_v22 = vpop.f32.mrf.mxu1  ;;  %4075 = vmatprep.subr.bf16.mxu0 %v7157_v36  ;;  %v1961_v51 = vpop.f32.mrf.mxu0  ;;  %v6979_v36 = vld [vmem:[%s10889_s1 + $0xb88] sm:$0xff]  ;;  %v7380_v18 = vcombine.low %v7115_v29, %v7119_v30 }
 0x160   : > { %4127 = vmatpush1.bf16.msra.mxu1 %v7292_v34  ;;  %v9199_v50 = vadd.f32 %v2012_v22, %v1959_v45  ;;  %v7381_v34 = vcombine.high %v7115_v29, %v7119_v30  ;;  %v7245_v32 = vcombine.high %v6979_v36, %v6983_v38  ;;  %v6971_v45 = vld [vmem:[%s10889_s1 + $0xb48] sm:$0xff] }
 0x161   : > { %4128 = vmatprep.subr.bf16.mxu1 %v7285_v39  ;;  %v2014_v62 = vpop.f32.mrf.mxu1  ;;  %v7107_v39 = vld [vmem:[%s10889_s1 + $0xf88] sm:$0xff] }
 0x162   : > { %v9213_v3 = vadd.f32 %v2014_v62, %v1961_v51  ;;  %4076 = vmatpush1.bf16.msra.mxu0 %v7156_v47  ;;  %v7373_v43 = vcombine.high %v7107_v39, %v7111_v40  ;;  %v6975_v47 = vld [vmem:[%s10889_s1 + $0xb68] sm:$0xff]  ;;  %v7372_v51 = vcombine.low %v7107_v39, %v7111_v40 }
 0x163   : > { %4077 = vmatprep.subr.bf16.mxu0 %v7149_v49  ;;  %v7099_v22 = vld [vmem:[%s10889_s1 + $0xf48] sm:$0xff]  ;;  %v7244_v49 = vcombine.low %v6979_v36, %v6983_v38 }
 0x164   : > { %4129 = vmatpush1.bf16.msra.mxu1 %v7284_v23  ;;  %v7103_v23 = vld [vmem:[%s10889_s1 + $0xf68] sm:$0xff] }
 0x165   : > { %4130 = vmatprep.subr.bf16.mxu1 %v7277_v53  ;;  %v7237_v53 = vcombine.high %v6971_v45, %v6975_v47  ;;  %v7365_v56 = vcombine.high %v7099_v22, %v7103_v23  ;;  %v6963_v61 = vld [vmem:[%s10889_s1 + $0xb08] sm:$0xff] }
 0x166   : > { %4078 = vmatpush1.bf16.msra.mxu0 %v7148_v4  ;;  %v6967_v62 = vld [vmem:[%s10889_s1 + $0xb28] sm:$0xff]  ;;  %v7236_v4 = vcombine.low %v6971_v45, %v6975_v47 }
 0x167   : > { %4079 = vmatprep.subr.bf16.mxu0 %v7141_v8  ;;  %v7091_v0 = vld [vmem:[%s10889_s1 + $0xf08] sm:$0xff]  ;;  %v7229_v8 = vcombine.high %v6963_v61, %v6967_v62 }
 0x168   : > { %4131 = vmatpush1.bf16.msra.mxu1 %v7276_v5  ;;  %v7095_v1 = vld [vmem:[%s10889_s1 + $0xf28] sm:$0xff]  ;;  %v7364_v5 = vcombine.low %v7099_v22, %v7103_v23 }
 0x169   : > { %4132 = vmatprep.subr.bf16.mxu1 %v7269_v10  ;;  %v7357_v10 = vcombine.high %v7091_v0, %v7095_v1  ;;  %v6955_v25 = vld [vmem:[%s10889_s1 + $0xac8] sm:$0xff] }
 0x16a   : > { %4080 = vmatpush1.bf16.msra.mxu0 %v7140_v17  ;;  %v6959_v11 = vld [vmem:[%s10889_s1 + $0xae8] sm:$0xff]  ;;  %v7228_v17 = vcombine.low %v6963_v61, %v6967_v62  ;;  %v6924_v61 = vld [vmem:[%s10889_s1 + $0x9d0] sm:$0xff] }
 0x16b   : > { %4081 = vmatprep.subr.bf16.mxu0 %v7133_v20  ;;  %v7083_v13 = vld [vmem:[%s10889_s1 + $0xec8] sm:$0xff]  ;;  %v7221_v20 = vcombine.high %v6955_v25, %v6959_v11  ;;  %v6928_v62 = vld [vmem:[%s10889_s1 + $0x9f0] sm:$0xff] }
 0x16c   : > { %4133 = vmatpush1.bf16.msra.mxu1 %v7268_v19  ;;  %v7087_v16 = vld [vmem:[%s10889_s1 + $0xee8] sm:$0xff]  ;;  %v7356_v19 = vcombine.low %v7091_v0, %v7095_v1  ;;  %v7052_v0 = vld [vmem:[%s10889_s1 + $0xdd0] sm:$0xff] }
 0x16d   : > { %4134 = vmatprep.subr.bf16.mxu1 %v7261_v24  ;;  %v7349_v24 = vcombine.high %v7083_v13, %v7087_v16  ;;  %v6947_v26 = vld [vmem:[%s10889_s1 + $0xa88] sm:$0xff]  ;;  %v7056_v1 = vld [vmem:[%s10889_s1 + $0xdf0] sm:$0xff] }
 0x16e   : > { %4082 = vmatpush1.bf16.msra.mxu0 %v7132_v54  ;;  %v6951_v27 = vld [vmem:[%s10889_s1 + $0xaa8] sm:$0xff]  ;;  %v7220_v54 = vcombine.low %v6955_v25, %v6959_v11  ;;  %v6916_v25 = vld [vmem:[%s10889_s1 + $0x990] sm:$0xff] }
 0x16f   : > { %4083 = vmatprep.subr.bf16.mxu0 %v7253_v60  ;;  %v7075_v29 = vld [vmem:[%s10889_s1 + $0xe88] sm:$0xff]  ;;  %v7213_v60 = vcombine.high %v6947_v26, %v6951_v27  ;;  %v6920_v11 = vld [vmem:[%s10889_s1 + $0x9b0] sm:$0xff] }
 0x170   : > { %4135 = vmatpush1.bf16.msra.mxu1 %v7260_v59  ;;  %v7079_v30 = vld [vmem:[%s10889_s1 + $0xea8] sm:$0xff]  ;;  %v7348_v59 = vcombine.low %v7083_v13, %v7087_v16  ;;  %v7044_v13 = vld [vmem:[%s10889_s1 + $0xd90] sm:$0xff] }
 0x171   : > { %4136 = vmatprep.subr.bf16.mxu1 %v7381_v34  ;;  %v7341_v34 = vcombine.high %v7075_v29, %v7079_v30  ;;  %v6939_v36 = vld [vmem:[%s10889_s1 + $0xa48] sm:$0xff]  ;;  %v7048_v16 = vld [vmem:[%s10889_s1 + $0xdb0] sm:$0xff] }
 0x172   : > { %4084 = vmatpush2.bf16.msra.mxu0 %v7252_v42  ;;  %v6943_v38 = vld [vmem:[%s10889_s1 + $0xa68] sm:$0xff]  ;;  %v7212_v42 = vcombine.low %v6947_v26, %v6951_v27  ;;  %v6908_v26 = vld [vmem:[%s10889_s1 + $0x950] sm:$0xff] }
 0x173   : > { %4085 = vmatprep.subr.bf16.mxu0 %v7245_v32  ;;  %v7067_v39 = vld [vmem:[%s10889_s1 + $0xe48] sm:$0xff]  ;;  %v7205_v32 = vcombine.high %v6939_v36, %v6943_v38  ;;  %v6912_v27 = vld [vmem:[%s10889_s1 + $0x970] sm:$0xff] }
 0x174   : > { %4137 = vmatpush2.bf16.msra.mxu1 %v7380_v18  ;;  %v7071_v40 = vld [vmem:[%s10889_s1 + $0xe68] sm:$0xff]  ;;  %v7340_v18 = vcombine.low %v7075_v29, %v7079_v30  ;;  %v7036_v30 = vld [vmem:[%s10889_s1 + $0xd50] sm:$0xff] }
 0x175   : > { %4138 = vmatprep.subr.bf16.mxu1 %v7373_v43  ;;  %v7333_v43 = vcombine.high %v7067_v39, %v7071_v40  ;;  %v6931_v45 = vld [vmem:[%s10889_s1 + $0xa08] sm:$0xff] }
 0x176   : > { %4086 = vmatpush2.bf16.msra.mxu0 %v7244_v49  ;;  %v6935_v47 = vld [vmem:[%s10889_s1 + $0xa28] sm:$0xff]  ;;  %v7204_v49 = vcombine.low %v6939_v36, %v6943_v38  ;;  %v7310_v38 = vcombine.low %v7044_v13, %v7048_v16 }
 0x177   : > { %4087 = vmatprep.subr.bf16.mxu0 %v7237_v53  ;;  %v7059_v22 = vld [vmem:[%s10889_s1 + $0xe08] sm:$0xff]  ;;  %v7197_v53 = vcombine.high %v6931_v45, %v6935_v47 }
 0x178   : > { %4139 = vmatpush2.bf16.msra.mxu1 %v7372_v51  ;;  %v7063_v23 = vld [vmem:[%s10889_s1 + $0xe28] sm:$0xff]  ;;  %v7332_v51 = vcombine.low %v7067_v39, %v7071_v40  ;;  %v7175_v39 = vcombine.high %v6908_v26, %v6912_v27 }
 0x179   : > { %4140 = vmatprep.subr.bf16.mxu1 %v7365_v56  ;;  %v7325_v56 = vcombine.high %v7059_v22, %v7063_v23 }
 0x17a   : > { %4088 = vmatpush2.bf16.msra.mxu0 %v7236_v4  ;;  %v7196_v4 = vcombine.low %v6931_v45, %v6935_v47  ;;  %v7028_v47 = vld [vmem:[%s10889_s1 + $0xd10] sm:$0xff] }
 0x17b   : > { %4089 = vmatprep.subr.bf16.mxu0 %v7229_v8  ;;  %v7191_v8 = vcombine.high %v6924_v61, %v6928_v62 }
 0x17c   : > { %4141 = vmatpush2.bf16.msra.mxu1 %v7364_v5  ;;  %v7324_v5 = vcombine.low %v7059_v22, %v7063_v23  ;;  %v7032_v22 = vld [vmem:[%s10889_s1 + $0xd30] sm:$0xff] }
 0x17d   : > { %4142 = vmatprep.subr.bf16.mxu1 %v7357_v10  ;;  %v7319_v10 = vcombine.high %v7052_v0, %v7056_v1 }
 0x17e   : > { %4090 = vmatpush2.bf16.msra.mxu0 %v7228_v17  ;;  %v7190_v17 = vcombine.low %v6924_v61, %v6928_v62 }
 0x17f   : > { %4091 = vmatprep.subr.bf16.mxu0 %v7221_v20  ;;  %v7183_v20 = vcombine.high %v6916_v25, %v6920_v11 }
 0x180   : > { %4143 = vmatpush2.bf16.msra.mxu1 %v7356_v19  ;;  %v7318_v19 = vcombine.low %v7052_v0, %v7056_v1  ;;  %v7295_v0 = vcombine.high %v7028_v47, %v7032_v22  ;;  %v6892_v1 = vld [vmem:[%s10889_s1 + $0x8d0] sm:$0xff] }
 0x181   : > { %4144 = vmatprep.subr.bf16.mxu1 %v7349_v24  ;;  %v7311_v24 = vcombine.high %v7044_v13, %v7048_v16  ;;  %v7294_v16 = vcombine.low %v7028_v47, %v7032_v22  ;;  %v6880_v47 = vld [vmem:[%s10889_s1 + $0x870] sm:$0xff] }
 0x182   : > { %4092 = vmatpush2.bf16.msra.mxu0 %v7220_v54  ;;  %v7040_v54 = vld [vmem:[%s10889_s1 + $0xd70] sm:$0xff] }
 0x183   : > { %4093 = vmatprep.subr.bf16.mxu0 %v7213_v60  ;;  %v7182_v60 = vcombine.low %v6916_v25, %v6920_v11 }
 0x184   : > { %4145 = vmatpush2.bf16.msra.mxu1 %v7348_v59 }
 0x185   : > { %4146 = vmatprep.subr.bf16.mxu1 %v7341_v34 }
 0x186   : > { %4094 = vmatpush2.bf16.msra.mxu0 %v7212_v42  ;;  %v7303_v42 = vcombine.high %v7036_v30, %v7040_v54 }
 0x187   : > { %4095 = vmatprep.subr.bf16.mxu0 %v7205_v32  ;;  %v6904_v32 = vld [vmem:[%s10889_s1 + $0x930] sm:$0xff] }
 0x188   : > { %4147 = vmatpush2.bf16.msra.mxu1 %v7340_v18  ;;  %v6900_v18 = vld [vmem:[%s10889_s1 + $0x910] sm:$0xff] }
 0x189   : > { %4148 = vmatprep.subr.bf16.mxu1 %v7333_v43  ;;  %v7167_v61 = vcombine.high %v6900_v18, %v6904_v32  ;;  %v7166_v11 = vcombine.low %v6900_v18, %v6904_v32 }
 0x18a   : > { %4096 = vmatpush2.bf16.msra.mxu0 %v7204_v49  ;;  %v7174_v49 = vcombine.low %v6908_v26, %v6912_v27  ;;  %v6884_v26 = vld [vmem:[%s10889_s1 + $0x890] sm:$0xff] }
 0x18b   : > { %4097 = vmatprep.subr.bf16.mxu0 %v7197_v53  ;;  %v6888_v27 = vld [vmem:[%s10889_s1 + $0x8b0] sm:$0xff] }
 0x18c   : > { %4149 = vmatpush2.bf16.msra.mxu1 %v7332_v51 }
 0x18d   : > { %4150 = vmatprep.subr.bf16.mxu1 %v7325_v56  ;;  %v7302_v56 = vcombine.low %v7036_v30, %v7040_v54  ;;  %v7012_v30 = vld [vmem:[%s10889_s1 + $0xc90] sm:$0xff] }
 0x18e   : > { %4098 = vmatpush2.bf16.msra.mxu0 %v7196_v4  ;;  %v6896_v4 = vld [vmem:[%s10889_s1 + $0x8f0] sm:$0xff] }
 0x18f   : > { %4173 = vmatprep.subr.bf16.mxu0 %v7191_v8  ;;  %v7020_v8 = vld [vmem:[%s10889_s1 + $0xcd0] sm:$0xff] }
 0x190   : > { %4151 = vmatpush2.bf16.msra.mxu1 %v7324_v5  ;;  %v7016_v54 = vld [vmem:[%s10889_s1 + $0xcb0] sm:$0xff] }
 0x191   : > { %4226 = vmatprep.subr.bf16.mxu1 %v7319_v10  ;;  %v2051_v29 = vpop.f32.mrf.mxu0  ;;  %4100 = vmatmul.mubr.bf16.vlgmr.msra.gmra.mxu0 %v9103_v58  ;;  %v7024_v10 = vld [vmem:[%s10889_s1 + $0xcf0] sm:$0xff]  ;;  %v7279_v32 = vcombine.high %v7012_v30, %v7016_v54 }
 0x192   : > { %4174 = vmatpush1.bf16.msra.mxu0 %v7190_v17  ;;  %4109 = vmatprep.mubr.bf16.mxu0 %v9123_v48  ;;  %v7159_v17 = vcombine.high %v6892_v1, %v6896_v4 }
 0x193   : > { %v2104_v59 = vpop.f32.mrf.mxu1  ;;  %4153 = vmatmul.mubr.bf16.vlgmr.msra.gmra.mxu1 %v9117_v41  ;;  %v2053_v36 = vpop.f32.mrf.mxu0  ;;  %4175 = vmatprep.subr.bf16.mxu0 %v7183_v20 }
 0x194   : > { %v9361_v34 = vadd.f32 %v2104_v59, %v2051_v29  ;;  %4227 = vmatpush1.bf16.msra.mxu1 %v7318_v19  ;;  %4162 = vmatprep.mubr.bf16.mxu1 %v9132_v21 }
 0x195   : > { %v2106_v40 = vpop.f32.mrf.mxu1  ;;  %4228 = vmatprep.subr.bf16.mxu1 %v7311_v24  ;;  %v2055_v45 = vpop.f32.mrf.mxu0  ;;  %v7287_v24 = vcombine.high %v7020_v8, %v7024_v10 }
 0x196   : > { %v9370_v43 = vadd.f32 %v2106_v40, %v2053_v36  ;;  %4176 = vmatpush1.bf16.msra.mxu0 %v7182_v60  ;;  %v7158_v36 = vcombine.low %v6892_v1, %v6896_v4  ;;  %v7151_v40 = vcombine.high %v6884_v26, %v6888_v27  ;;  %v6868_v1 = vld [vmem:[%s10889_s1 + $0x810] sm:$0xff] }
 0x197   : > { %v2108_v23 = vpop.f32.mrf.mxu1  ;;  %v2057_v53 = vpop.f32.mrf.mxu0  ;;  %4177 = vmatprep.subr.bf16.mxu0 %v7175_v39  ;;  %v7286_v39 = vcombine.low %v7020_v8, %v7024_v10  ;;  %v6872_v4 = vld [vmem:[%s10889_s1 + $0x830] sm:$0xff] }
 0x198   : > { %v9379_v51 = vadd.f32 %v2108_v23, %v2055_v45  ;;  %4229 = vmatpush1.bf16.msra.mxu1 %v7310_v38  ;;  %v6876_v45 = vld [vmem:[%s10889_s1 + $0x850] sm:$0xff] }
 0x199   : > { %v2110_v62 = vpop.f32.mrf.mxu1  ;;  %4230 = vmatprep.subr.bf16.mxu1 %v7303_v42  ;;  %4110 = vmatmul.mubr.bf16.gmra.mxu0 %v9153_v9  ;;  %v2061_v25 = vpop.f32.mrf.mxu0  ;;  %v7004_v23 = vld [vmem:[%s10889_s1 + $0xc50] sm:$0xff] }
 0x19a   : > { %v9387_v5 = vadd.f32 %v2110_v62, %v2057_v53  ;;  %4178 = vmatpush1.bf16.msra.mxu0 %v7174_v49  ;;  %4205 = vmatprep.mubr.bf16.mxu0 %v8917_v55  ;;  %v7008_v49 = vld [vmem:[%s10889_s1 + $0xc70] sm:$0xff]  ;;  %v7143_v62 = vcombine.high %v6876_v45, %v6880_v47 }
 0x19b   : > { %4163 = vmatmul.mubr.bf16.gmra.mxu1 %v9161_v12  ;;  %v2114_v13 = vpop.f32.mrf.mxu1  ;;  %4179 = vmatprep.subr.bf16.mxu0 %v7167_v61  ;;  %v2063_v20 = vpop.f32.mrf.mxu0  ;;  %v7278_v61 = vcombine.low %v7012_v30, %v7016_v54  ;;  %v6996_v8 = vld [vmem:[%s10889_s1 + $0xc10] sm:$0xff] }
 0x19c   : > { %4231 = vmatpush1.bf16.msra.mxu1 %v7302_v56  ;;  %v9397_v19 = vadd.f32 %v2114_v13, %v2061_v25  ;;  %4258 = vmatprep.mubr.bf16.mxu1 %v8930_v35  ;;  %v7150_v56 = vcombine.low %v6884_v26, %v6888_v27  ;;  %v7000_v10 = vld [vmem:[%s10889_s1 + $0xc30] sm:$0xff]  ;;  %v7142_v25 = vcombine.low %v6876_v45, %v6880_v47 }
 0x19d   : > { %4232 = vmatprep.subr.bf16.mxu1 %v7295_v0  ;;  %v2116_v29 = vpop.f32.mrf.mxu1  ;;  %v2065_v60 = vpop.f32.mrf.mxu0  ;;  %v7271_v0 = vcombine.high %v7004_v23, %v7008_v49  ;;  %v7135_v13 = vcombine.high %v6868_v1, %v6872_v4  ;;  %v7120_v26 = vld [vmem:[%s10889_s1 + $0xff0] sm:$0xff]  ;;  %v7134_v27 = vcombine.low %v6868_v1, %v6872_v4 }
 0x19e   : > { %v9412_v59 = vadd.f32 %v2116_v29, %v2063_v20  ;;  %4180 = vmatpush1.bf16.msra.mxu0 %v7166_v11  ;;  %v7270_v11 = vcombine.low %v7004_v23, %v7008_v49  ;;  %v6992_v20 = vld [vmem:[%s10889_s1 + $0xbf0] sm:$0xff]  ;;  %v7262_v29 = vcombine.low %v6996_v8, %v7000_v10 }
 0x19f   : > { %v2118_v38 = vpop.f32.mrf.mxu1  ;;  %4181 = vmatprep.subr.bf16.mxu0 %v7159_v17  ;;  %v2067_v18 = vpop.f32.mrf.mxu0  ;;  %v6988_v17 = vld [vmem:[%s10889_s1 + $0xbd0] sm:$0xff] }
 0x1a0   : > { %4233 = vmatpush1.bf16.msra.mxu1 %v7294_v16  ;;  %v9415_v42 = vadd.f32 %v2118_v38, %v2065_v60  ;;  %v7263_v16 = vcombine.high %v6996_v8, %v7000_v10  ;;  %v7255_v30 = vcombine.high %v6988_v17, %v6992_v20  ;;  %v6980_v60 = vld [vmem:[%s10889_s1 + $0xb90] sm:$0xff] }
 0x1a1   : > { %4234 = vmatprep.subr.bf16.mxu1 %v7287_v24  ;;  %v2120_v22 = vpop.f32.mrf.mxu1  ;;  %v7116_v24 = vld [vmem:[%s10889_s1 + $0xfd0] sm:$0xff] }
 0x1a2   : > { %v9429_v53 = vadd.f32 %v2120_v22, %v2067_v18  ;;  %4182 = vmatpush1.bf16.msra.mxu0 %v7158_v36  ;;  %v7383_v54 = vcombine.high %v7116_v24, %v7120_v26  ;;  %v6984_v36 = vld [vmem:[%s10889_s1 + $0xbb0] sm:$0xff]  ;;  %v7382_v18 = vcombine.low %v7116_v24, %v7120_v26 }
 0x1a3   : > { %4183 = vmatprep.subr.bf16.mxu0 %v7151_v40  ;;  %v7108_v38 = vld [vmem:[%s10889_s1 + $0xf90] sm:$0xff]  ;;  %v7254_v40 = vcombine.low %v6988_v17, %v6992_v20 }
 0x1a4   : > { %4235 = vmatpush1.bf16.msra.mxu1 %v7286_v39  ;;  %v7112_v39 = vld [vmem:[%s10889_s1 + $0xfb0] sm:$0xff] }
 0x1a5   : > { %4236 = vmatprep.subr.bf16.mxu1 %v7279_v32  ;;  %v7247_v32 = vcombine.high %v6980_v60, %v6984_v36  ;;  %v7375_v45 = vcombine.high %v7108_v38, %v7112_v39  ;;  %v6972_v47 = vld [vmem:[%s10889_s1 + $0xb50] sm:$0xff] }
 0x1a6   : > { %4184 = vmatpush1.bf16.msra.mxu0 %v7150_v56  ;;  %v6976_v22 = vld [vmem:[%s10889_s1 + $0xb70] sm:$0xff]  ;;  %v7246_v56 = vcombine.low %v6980_v60, %v6984_v36 }
 0x1a7   : > { %4185 = vmatprep.subr.bf16.mxu0 %v7143_v62  ;;  %v7100_v23 = vld [vmem:[%s10889_s1 + $0xf50] sm:$0xff]  ;;  %v7239_v62 = vcombine.high %v6972_v47, %v6976_v22 }
 0x1a8   : > { %4237 = vmatpush1.bf16.msra.mxu1 %v7278_v61  ;;  %v7104_v49 = vld [vmem:[%s10889_s1 + $0xf70] sm:$0xff]  ;;  %v7374_v61 = vcombine.low %v7108_v38, %v7112_v39 }
 0x1a9   : > { %4238 = vmatprep.subr.bf16.mxu1 %v7271_v0  ;;  %v7367_v0 = vcombine.high %v7100_v23, %v7104_v49  ;;  %v6964_v1 = vld [vmem:[%s10889_s1 + $0xb10] sm:$0xff] }
 0x1aa   : > { %4186 = vmatpush1.bf16.msra.mxu0 %v7142_v25  ;;  %v6968_v4 = vld [vmem:[%s10889_s1 + $0xb30] sm:$0xff]  ;;  %v7238_v25 = vcombine.low %v6972_v47, %v6976_v22 }
 0x1ab   : > { %4187 = vmatprep.subr.bf16.mxu0 %v7135_v13  ;;  %v7092_v8 = vld [vmem:[%s10889_s1 + $0xf10] sm:$0xff]  ;;  %v7231_v13 = vcombine.high %v6964_v1, %v6968_v4 }
 0x1ac   : > { %4239 = vmatpush1.bf16.msra.mxu1 %v7270_v11  ;;  %v7096_v10 = vld [vmem:[%s10889_s1 + $0xf30] sm:$0xff]  ;;  %v7366_v11 = vcombine.low %v7100_v23, %v7104_v49 }
 0x1ad   : > { %4240 = vmatprep.subr.bf16.mxu1 %v7263_v16  ;;  %v7359_v16 = vcombine.high %v7092_v8, %v7096_v10  ;;  %v6956_v17 = vld [vmem:[%s10889_s1 + $0xad0] sm:$0xff] }
 0x1ae   : > { %4188 = vmatpush1.bf16.msra.mxu0 %v7134_v27  ;;  %v6960_v20 = vld [vmem:[%s10889_s1 + $0xaf0] sm:$0xff]  ;;  %v7230_v27 = vcombine.low %v6964_v1, %v6968_v4 }
 0x1af   : > { %4189 = vmatprep.subr.bf16.mxu0 %v7255_v30  ;;  %v7084_v24 = vld [vmem:[%s10889_s1 + $0xed0] sm:$0xff]  ;;  %v7223_v30 = vcombine.high %v6956_v17, %v6960_v20 }
 0x1b0   : > { %4241 = vmatpush1.bf16.msra.mxu1 %v7262_v29  ;;  %v7088_v26 = vld [vmem:[%s10889_s1 + $0xef0] sm:$0xff]  ;;  %v7358_v29 = vcombine.low %v7092_v8, %v7096_v10 }
 0x1b1   : > { %4242 = vmatprep.subr.bf16.mxu1 %v7383_v54  ;;  %v7351_v54 = vcombine.high %v7084_v24, %v7088_v26  ;;  %v6948_v60 = vld [vmem:[%s10889_s1 + $0xa90] sm:$0xff] }
 0x1b2   : > { %4190 = vmatpush2.bf16.msra.mxu0 %v7254_v40  ;;  %v6952_v36 = vld [vmem:[%s10889_s1 + $0xab0] sm:$0xff]  ;;  %v7222_v40 = vcombine.low %v6956_v17, %v6960_v20  ;;  %v6925_v17 = vld [vmem:[%s10889_s1 + $0x9d8] sm:$0xff] }
 0x1b3   : > { %4191 = vmatprep.subr.bf16.mxu0 %v7247_v32  ;;  %v7076_v38 = vld [vmem:[%s10889_s1 + $0xe90] sm:$0xff]  ;;  %v7215_v32 = vcombine.high %v6948_v60, %v6952_v36  ;;  %v6929_v20 = vld [vmem:[%s10889_s1 + $0x9f8] sm:$0xff] }
 0x1b4   : > { %4243 = vmatpush2.bf16.msra.mxu1 %v7382_v18  ;;  %v7080_v39 = vld [vmem:[%s10889_s1 + $0xeb0] sm:$0xff]  ;;  %v7350_v18 = vcombine.low %v7084_v24, %v7088_v26  ;;  %v7053_v24 = vld [vmem:[%s10889_s1 + $0xdd8] sm:$0xff] }
 0x1b5   : > { %4244 = vmatprep.subr.bf16.mxu1 %v7375_v45  ;;  %v7343_v45 = vcombine.high %v7076_v38, %v7080_v39  ;;  %v6940_v47 = vld [vmem:[%s10889_s1 + $0xa50] sm:$0xff]  ;;  %v7057_v26 = vld [vmem:[%s10889_s1 + $0xdf8] sm:$0xff] }
 0x1b6   : > { %4192 = vmatpush2.bf16.msra.mxu0 %v7246_v56  ;;  %v6944_v22 = vld [vmem:[%s10889_s1 + $0xa70] sm:$0xff]  ;;  %v7214_v56 = vcombine.low %v6948_v60, %v6952_v36  ;;  %v6917_v60 = vld [vmem:[%s10889_s1 + $0x998] sm:$0xff] }
 0x1b7   : > { %4193 = vmatprep.subr.bf16.mxu0 %v7239_v62  ;;  %v7068_v23 = vld [vmem:[%s10889_s1 + $0xe50] sm:$0xff]  ;;  %v7207_v62 = vcombine.high %v6940_v47, %v6944_v22  ;;  %v6921_v36 = vld [vmem:[%s10889_s1 + $0x9b8] sm:$0xff] }
 0x1b8   : > { %4245 = vmatpush2.bf16.msra.mxu1 %v7374_v61  ;;  %v7072_v49 = vld [vmem:[%s10889_s1 + $0xe70] sm:$0xff]  ;;  %v7342_v61 = vcombine.low %v7076_v38, %v7080_v39  ;;  %v7045_v38 = vld [vmem:[%s10889_s1 + $0xd98] sm:$0xff] }
 0x1b9   : > { %4246 = vmatprep.subr.bf16.mxu1 %v7367_v0  ;;  %v7335_v0 = vcombine.high %v7068_v23, %v7072_v49  ;;  %v6932_v1 = vld [vmem:[%s10889_s1 + $0xa10] sm:$0xff]  ;;  %v7049_v39 = vld [vmem:[%s10889_s1 + $0xdb8] sm:$0xff] }
 0x1ba   : > { %4194 = vmatpush2.bf16.msra.mxu0 %v7238_v25  ;;  %v6936_v4 = vld [vmem:[%s10889_s1 + $0xa30] sm:$0xff]  ;;  %v7206_v25 = vcombine.low %v6940_v47, %v6944_v22  ;;  %v6909_v47 = vld [vmem:[%s10889_s1 + $0x958] sm:$0xff] }
 0x1bb   : > { %4195 = vmatprep.subr.bf16.mxu0 %v7231_v13  ;;  %v7060_v8 = vld [vmem:[%s10889_s1 + $0xe10] sm:$0xff]  ;;  %v7199_v13 = vcombine.high %v6932_v1, %v6936_v4  ;;  %v6913_v22 = vld [vmem:[%s10889_s1 + $0x978] sm:$0xff] }
 0x1bc   : > { %4247 = vmatpush2.bf16.msra.mxu1 %v7366_v11  ;;  %v7064_v10 = vld [vmem:[%s10889_s1 + $0xe30] sm:$0xff]  ;;  %v7334_v11 = vcombine.low %v7068_v23, %v7072_v49  ;;  %v7037_v49 = vld [vmem:[%s10889_s1 + $0xd58] sm:$0xff] }
 0x1bd   : > { %4248 = vmatprep.subr.bf16.mxu1 %v7359_v16  ;;  %v7327_v16 = vcombine.high %v7060_v8, %v7064_v10 }
 0x1be   : > { %4196 = vmatpush2.bf16.msra.mxu0 %v7230_v27  ;;  %v7198_v27 = vcombine.low %v6932_v1, %v6936_v4  ;;  %v7312_v4 = vcombine.low %v7045_v38, %v7049_v39 }
 0x1bf   : > { %4197 = vmatprep.subr.bf16.mxu0 %v7223_v30  ;;  %v7193_v30 = vcombine.high %v6925_v17, %v6929_v20 }
 0x1c0   : > { %4249 = vmatpush2.bf16.msra.mxu1 %v7358_v29  ;;  %v7326_v29 = vcombine.low %v7060_v8, %v7064_v10  ;;  %v7177_v8 = vcombine.high %v6909_v47, %v6913_v22 }
 0x1c1   : > { %4250 = vmatprep.subr.bf16.mxu1 %v7351_v54  ;;  %v7321_v54 = vcombine.high %v7053_v24, %v7057_v26 }
 0x1c2   : > { %4198 = vmatpush2.bf16.msra.mxu0 %v7222_v40  ;;  %v7192_v40 = vcombine.low %v6925_v17, %v6929_v20  ;;  %v7029_v20 = vld [vmem:[%s10889_s1 + $0xd18] sm:$0xff] }
 0x1c3   : > { %4199 = vmatprep.subr.bf16.mxu0 %v7215_v32  ;;  %v7185_v32 = vcombine.high %v6917_v60, %v6921_v36 }
 0x1c4   : > { %4251 = vmatpush2.bf16.msra.mxu1 %v7350_v18  ;;  %v7320_v18 = vcombine.low %v7053_v24, %v7057_v26  ;;  %v7033_v24 = vld [vmem:[%s10889_s1 + $0xd38] sm:$0xff] }
 0x1c5   : > { %4252 = vmatprep.subr.bf16.mxu1 %v7343_v45  ;;  %v7313_v45 = vcombine.high %v7045_v38, %v7049_v39  ;;  %v7297_v38 = vcombine.high %v7029_v20, %v7033_v24  ;;  %v6893_v39 = vld [vmem:[%s10889_s1 + $0x8d8] sm:$0xff] }
 0x1c6   : > { %4200 = vmatpush2.bf16.msra.mxu0 %v7214_v56  ;;  %v7041_v56 = vld [vmem:[%s10889_s1 + $0xd78] sm:$0xff] }
 0x1c7   : > { %4201 = vmatprep.subr.bf16.mxu0 %v7207_v62  ;;  %v7184_v62 = vcombine.low %v6917_v60, %v6921_v36 }
 0x1c8   : > { %4253 = vmatpush2.bf16.msra.mxu1 %v7342_v61 }
 0x1c9   : > { %4254 = vmatprep.subr.bf16.mxu1 %v7335_v0 }
 0x1ca   : > { %4202 = vmatpush2.bf16.msra.mxu0 %v7206_v25  ;;  %v7305_v25 = vcombine.high %v7037_v49, %v7041_v56 }
 0x1cb   : > { %4203 = vmatprep.subr.bf16.mxu0 %v7199_v13  ;;  %v6905_v13 = vld [vmem:[%s10889_s1 + $0x938] sm:$0xff] }
 0x1cc   : > { %4255 = vmatpush2.bf16.msra.mxu1 %v7334_v11  ;;  %v6901_v11 = vld [vmem:[%s10889_s1 + $0x918] sm:$0xff] }
 0x1cd   : > { %4256 = vmatprep.subr.bf16.mxu1 %v7327_v16  ;;  %v7169_v60 = vcombine.high %v6901_v11, %v6905_v13 }
 0x1ce   : > { %4204 = vmatpush2.bf16.msra.mxu0 %v7198_v27  ;;  %v7176_v27 = vcombine.low %v6909_v47, %v6913_v22  ;;  %v7168_v22 = vcombine.low %v6901_v11, %v6905_v13  ;;  %v7017_v11 = vld [vmem:[%s10889_s1 + $0xcb8] sm:$0xff] }
 0x1cf   : > { %4279 = vmatprep.subr.bf16.mxu0 %v7193_v30 }
 0x1d0   : > { %4257 = vmatpush2.bf16.msra.mxu1 %v7326_v29 }
 0x1d1   : > { %4332 = vmatprep.subr.bf16.mxu1 %v7321_v54  ;;  %v2157_v23 = vpop.f32.mrf.mxu0  ;;  %4206 = vmatmul.mubr.bf16.vlgmr.msra.gmra.mxu0 %v9103_v58  ;;  %v7304_v54 = vcombine.low %v7037_v49, %v7041_v56  ;;  %v7296_v49 = vcombine.low %v7029_v20, %v7033_v24 }
 0x1d2   : > { %4280 = vmatpush1.bf16.msra.mxu0 %v7192_v40  ;;  %4215 = vmatprep.mubr.bf16.mxu0 %v9123_v48  ;;  %v6897_v40 = vld [vmem:[%s10889_s1 + $0x8f8] sm:$0xff] }
 0x1d3   : > { %v2210_v61 = vpop.f32.mrf.mxu1  ;;  %4259 = vmatmul.mubr.bf16.vlgmr.msra.gmra.mxu1 %v9117_v41  ;;  %v2159_v1 = vpop.f32.mrf.mxu0  ;;  %4281 = vmatprep.subr.bf16.mxu0 %v7185_v32  ;;  %v7021_v32 = vld [vmem:[%s10889_s1 + $0xcd8] sm:$0xff]  ;;  %v7161_v56 = vcombine.high %v6893_v39, %v6897_v40  ;;  %v7160_v20 = vcombine.low %v6893_v39, %v6897_v40 }
 0x1d4   : > { %v9577_v0 = vadd.f32 %v2210_v61, %v2157_v23  ;;  %4333 = vmatpush1.bf16.msra.mxu1 %v7320_v18  ;;  %4268 = vmatprep.mubr.bf16.mxu1 %v9132_v21  ;;  %v7009_v39 = vld [vmem:[%s10889_s1 + $0xc78] sm:$0xff] }
 0x1d5   : > { %v2212_v10 = vpop.f32.mrf.mxu1  ;;  %4334 = vmatprep.subr.bf16.mxu1 %v7313_v45  ;;  %v2161_v17 = vpop.f32.mrf.mxu0  ;;  %v7025_v45 = vld [vmem:[%s10889_s1 + $0xcf8] sm:$0xff] }
 0x1d6   : > { %v9586_v16 = vadd.f32 %v2212_v10, %v2159_v1  ;;  %4282 = vmatpush1.bf16.msra.mxu0 %v7184_v62  ;;  %v7289_v1 = vcombine.high %v7021_v32, %v7025_v45 }
 0x1d7   : > { %v2214_v26 = vpop.f32.mrf.mxu1  ;;  %v2163_v30 = vpop.f32.mrf.mxu0  ;;  %4283 = vmatprep.subr.bf16.mxu0 %v7177_v8  ;;  %v6889_v8 = vld [vmem:[%s10889_s1 + $0x8b8] sm:$0xff] }
 0x1d8   : > { %v9595_v29 = vadd.f32 %v2214_v26, %v2161_v17  ;;  %4335 = vmatpush1.bf16.msra.mxu1 %v7312_v4  ;;  %v6885_v4 = vld [vmem:[%s10889_s1 + $0x898] sm:$0xff]  ;;  %v7288_v26 = vcombine.low %v7021_v32, %v7025_v45 }
 0x1d9   : > { %v2216_v36 = vpop.f32.mrf.mxu1  ;;  %4336 = vmatprep.subr.bf16.mxu1 %v7305_v25  ;;  %4216 = vmatmul.mubr.bf16.gmra.mxu0 %v9153_v9  ;;  %v2167_v47 = vpop.f32.mrf.mxu0  ;;  %v7013_v25 = vld [vmem:[%s10889_s1 + $0xc98] sm:$0xff]  ;;  %v7152_v32 = vcombine.low %v6885_v4, %v6889_v8 }
 0x1da   : > { %v9603_v18 = vadd.f32 %v2216_v36, %v2163_v30  ;;  %4284 = vmatpush1.bf16.msra.mxu0 %v7176_v27  ;;  %4311 = vmatprep.mubr.bf16.mxu0 %v8917_v55  ;;  %v7153_v55 = vcombine.high %v6885_v4, %v6889_v8  ;;  %v7280_v45 = vcombine.low %v7013_v25, %v7017_v11 }
 0x1db   : > { %4269 = vmatmul.mubr.bf16.gmra.mxu1 %v9161_v12  ;;  %v2220_v23 = vpop.f32.mrf.mxu1  ;;  %4285 = vmatprep.subr.bf16.mxu0 %v7169_v60  ;;  %v2169_v62 = vpop.f32.mrf.mxu0  ;;  %v6877_v60 = vld [vmem:[%s10889_s1 + $0x858] sm:$0xff] }
 0x1dc   : > { %4337 = vmatpush1.bf16.msra.mxu1 %v7304_v54  ;;  %v9613_v61 = vadd.f32 %v2220_v23, %v2167_v47  ;;  %4364 = vmatprep.mubr.bf16.mxu1 %v8930_v35  ;;  %v7281_v54 = vcombine.high %v7013_v25, %v7017_v11  ;;  %v6881_v35 = vld [vmem:[%s10889_s1 + $0x878] sm:$0xff] }
 0x1dd   : > { %4338 = vmatprep.subr.bf16.mxu1 %v7297_v38  ;;  %v2222_v10 = vpop.f32.mrf.mxu1  ;;  %v2171_v17 = vpop.f32.mrf.mxu0  ;;  %v7005_v38 = vld [vmem:[%s10889_s1 + $0xc58] sm:$0xff]  ;;  %v7145_v47 = vcombine.high %v6877_v60, %v6881_v35 }
 0x1de   : > { %v9628_v13 = vadd.f32 %v2222_v10, %v2169_v62  ;;  %4286 = vmatpush1.bf16.msra.mxu0 %v7168_v22  ;;  %v7273_v22 = vcombine.high %v7005_v38, %v7009_v39  ;;  %v6869_v23 = vld [vmem:[%s10889_s1 + $0x818] sm:$0xff]  ;;  %v7272_v4 = vcombine.low %v7005_v38, %v7009_v39 }
 0x1df   : > { %v2224_v24 = vpop.f32.mrf.mxu1  ;;  %4287 = vmatprep.subr.bf16.mxu0 %v7161_v56  ;;  %v2173_v30 = vpop.f32.mrf.mxu0  ;;  %v6997_v56 = vld [vmem:[%s10889_s1 + $0xc18] sm:$0xff] }
 0x1e0   : > { %4339 = vmatpush1.bf16.msra.mxu1 %v7296_v49  ;;  %v9631_v27 = vadd.f32 %v2224_v24, %v2171_v17  ;;  %v6873_v49 = vld [vmem:[%s10889_s1 + $0x838] sm:$0xff] }
 0x1e1   : > { %4340 = vmatprep.subr.bf16.mxu1 %v7289_v1  ;;  %v2226_v36 = vpop.f32.mrf.mxu1  ;;  %v7001_v62 = vld [vmem:[%s10889_s1 + $0xc38] sm:$0xff]  ;;  %v7144_v1 = vcombine.low %v6877_v60, %v6881_v35  ;;  %v7137_v8 = vcombine.high %v6869_v23, %v6873_v49  ;;  %v7136_v24 = vcombine.low %v6869_v23, %v6873_v49 }
 0x1e2   : > { %v9645_v40 = vadd.f32 %v2226_v36, %v2173_v30  ;;  %4288 = vmatpush1.bf16.msra.mxu0 %v7160_v20  ;;  %v7265_v10 = vcombine.high %v6997_v56, %v7001_v62  ;;  %v6989_v25 = vld [vmem:[%s10889_s1 + $0xbd8] sm:$0xff] }
 0x1e3   : > { %4289 = vmatprep.subr.bf16.mxu0 %v7153_v55  ;;  %v6993_v11 = vld [vmem:[%s10889_s1 + $0xbf8] sm:$0xff] }
 0x1e4   : > { %4341 = vmatpush1.bf16.msra.mxu1 %v7288_v26  ;;  %v7117_v17 = vld [vmem:[%s10889_s1 + $0xfd8] sm:$0xff]  ;;  %v7264_v26 = vcombine.low %v6997_v56, %v7001_v62  ;;  %v7257_v55 = vcombine.high %v6989_v25, %v6993_v11  ;;  %v7256_v38 = vcombine.low %v6989_v25, %v6993_v11 }
 0x1e5   : > { %4342 = vmatprep.subr.bf16.mxu1 %v7281_v54  ;;  %v7121_v20 = vld [vmem:[%s10889_s1 + $0xff8] sm:$0xff] }
 0x1e6   : > { %4290 = vmatpush1.bf16.msra.mxu0 %v7152_v32  ;;  %v7385_v30 = vcombine.high %v7117_v17, %v7121_v20  ;;  %v6981_v54 = vld [vmem:[%s10889_s1 + $0xb98] sm:$0xff]  ;;  %v7384_v39 = vcombine.low %v7117_v17, %v7121_v20 }
 0x1e7   : > { %4291 = vmatprep.subr.bf16.mxu0 %v7145_v47  ;;  %v6985_v60 = vld [vmem:[%s10889_s1 + $0xbb8] sm:$0xff] }
 0x1e8   : > { %4343 = vmatpush1.bf16.msra.mxu1 %v7280_v45  ;;  %v7109_v35 = vld [vmem:[%s10889_s1 + $0xf98] sm:$0xff]  ;;  %v7249_v32 = vcombine.high %v6981_v54, %v6985_v60  ;;  %v7248_v56 = vcombine.low %v6981_v54, %v6985_v60 }
 0x1e9   : > { %4344 = vmatprep.subr.bf16.mxu1 %v7273_v22  ;;  %v7113_v36 = vld [vmem:[%s10889_s1 + $0xfb8] sm:$0xff] }
 0x1ea   : > { %4292 = vmatpush1.bf16.msra.mxu0 %v7144_v1  ;;  %v7377_v45 = vcombine.high %v7109_v35, %v7113_v36  ;;  %v6973_v47 = vld [vmem:[%s10889_s1 + $0xb58] sm:$0xff]  ;;  %v7376_v62 = vcombine.low %v7109_v35, %v7113_v36 }
 0x1eb   : > { %4293 = vmatprep.subr.bf16.mxu0 %v7137_v8  ;;  %v6977_v22 = vld [vmem:[%s10889_s1 + $0xb78] sm:$0xff] }
 0x1ec   : > { %4345 = vmatpush1.bf16.msra.mxu1 %v7272_v4  ;;  %v7101_v23 = vld [vmem:[%s10889_s1 + $0xf58] sm:$0xff]  ;;  %v7241_v1 = vcombine.high %v6973_v47, %v6977_v22  ;;  %v7240_v17 = vcombine.low %v6973_v47, %v6977_v22 }
 0x1ed   : > { %4346 = vmatprep.subr.bf16.mxu1 %v7265_v10  ;;  %v7105_v49 = vld [vmem:[%s10889_s1 + $0xf78] sm:$0xff] }
 0x1ee   : > { %4294 = vmatpush1.bf16.msra.mxu0 %v7136_v24  ;;  %v7369_v4 = vcombine.high %v7101_v23, %v7105_v49  ;;  %v6965_v8 = vld [vmem:[%s10889_s1 + $0xb18] sm:$0xff]  ;;  %v7368_v20 = vcombine.low %v7101_v23, %v7105_v49 }
 0x1ef   : > { %4295 = vmatprep.subr.bf16.mxu0 %v7257_v55  ;;  %v6969_v10 = vld [vmem:[%s10889_s1 + $0xb38] sm:$0xff] }
 0x1f0   : > { %4347 = vmatpush1.bf16.msra.mxu1 %v7264_v26  ;;  %v7093_v25 = vld [vmem:[%s10889_s1 + $0xf18] sm:$0xff]  ;;  %v7233_v24 = vcombine.high %v6965_v8, %v6969_v10  ;;  %v7232_v35 = vcombine.low %v6965_v8, %v6969_v10 }
 0x1f1   : > { %4348 = vmatprep.subr.bf16.mxu1 %v7385_v30  ;;  %v7097_v11 = vld [vmem:[%s10889_s1 + $0xf38] sm:$0xff] }
 0x1f2   : > { %4296 = vmatpush2.bf16.msra.mxu0 %v7256_v38  ;;  %v7361_v26 = vcombine.high %v7093_v25, %v7097_v11  ;;  %v6957_v55 = vld [vmem:[%s10889_s1 + $0xad8] sm:$0xff]  ;;  %v7360_v36 = vcombine.low %v7093_v25, %v7097_v11 }
 0x1f3   : > { %4297 = vmatprep.subr.bf16.mxu0 %v7249_v32  ;;  %v6961_v30 = vld [vmem:[%s10889_s1 + $0xaf8] sm:$0xff] }
 0x1f4   : > { %4349 = vmatpush2.bf16.msra.mxu1 %v7384_v39  ;;  %v7085_v54 = vld [vmem:[%s10889_s1 + $0xed8] sm:$0xff]  ;;  %v7225_v38 = vcombine.high %v6957_v55, %v6961_v30  ;;  %v7224_v23 = vcombine.low %v6957_v55, %v6961_v30 }
 0x1f5   : > { %4350 = vmatprep.subr.bf16.mxu1 %v7377_v45  ;;  %v7089_v60 = vld [vmem:[%s10889_s1 + $0xef8] sm:$0xff] }
 0x1f6   : > { %4298 = vmatpush2.bf16.msra.mxu0 %v7248_v56  ;;  %v7353_v39 = vcombine.high %v7085_v54, %v7089_v60  ;;  %v6949_v32 = vld [vmem:[%s10889_s1 + $0xa98] sm:$0xff]  ;;  %v7352_v49 = vcombine.low %v7085_v54, %v7089_v60 }
 0x1f7   : > { %4299 = vmatprep.subr.bf16.mxu0 %v7241_v1  ;;  %v6953_v45 = vld [vmem:[%s10889_s1 + $0xab8] sm:$0xff] }
 0x1f8   : > { %4351 = vmatpush2.bf16.msra.mxu1 %v7376_v62  ;;  %v7077_v47 = vld [vmem:[%s10889_s1 + $0xe98] sm:$0xff]  ;;  %v7217_v56 = vcombine.high %v6949_v32, %v6953_v45  ;;  %v7216_v25 = vcombine.low %v6949_v32, %v6953_v45  ;;  %v7578_v32 = vld [vmem:[%s10889_s1 + $0x15c0] sm:$0xff] }
 0x1f9   : > { %4352 = vmatprep.subr.bf16.mxu1 %v7369_v4  ;;  %v7081_v22 = vld [vmem:[%s10889_s1 + $0xeb8] sm:$0xff]  ;;  %v7582_v45 = vld [vmem:[%s10889_s1 + $0x15e0] sm:$0xff] }
 0x1fa   : > { %4300 = vmatpush2.bf16.msra.mxu0 %v7240_v17  ;;  %v7345_v62 = vcombine.high %v7077_v47, %v7081_v22  ;;  %v6941_v1 = vld [vmem:[%s10889_s1 + $0xa58] sm:$0xff]  ;;  %v7344_v11 = vcombine.low %v7077_v47, %v7081_v22 }
 0x1fb   : > { %4301 = vmatprep.subr.bf16.mxu0 %v7233_v24  ;;  %v6945_v4 = vld [vmem:[%s10889_s1 + $0xa78] sm:$0xff] }
 0x1fc   : > { %4353 = vmatpush2.bf16.msra.mxu1 %v7368_v20  ;;  %v7069_v8 = vld [vmem:[%s10889_s1 + $0xe58] sm:$0xff]  ;;  %v7209_v17 = vcombine.high %v6941_v1, %v6945_v4  ;;  %v7208_v54 = vcombine.low %v6941_v1, %v6945_v4  ;;  %v7570_v1 = vld [vmem:[%s10889_s1 + $0x1580] sm:$0xff] }
 0x1fd   : > { %4354 = vmatprep.subr.bf16.mxu1 %v7361_v26  ;;  %v7073_v10 = vld [vmem:[%s10889_s1 + $0xe78] sm:$0xff]  ;;  %v7574_v4 = vld [vmem:[%s10889_s1 + $0x15a0] sm:$0xff] }
 0x1fe   : > { %4302 = vmatpush2.bf16.msra.mxu0 %v7232_v35  ;;  %v7337_v20 = vcombine.high %v7069_v8, %v7073_v10  ;;  %v6933_v24 = vld [vmem:[%s10889_s1 + $0xa18] sm:$0xff]  ;;  %v7336_v60 = vcombine.low %v7069_v8, %v7073_v10  ;;  %v4417_v10 = vld [vmem:[%s8055_s20] sm:$0xee] }
 0x1ff   : > { %4303 = vmatprep.subr.bf16.mxu0 %v7225_v38  ;;  %v6937_v26 = vld [vmem:[%s10889_s1 + $0xa38] sm:$0xff]  ;;  %v7450_v38 = vld [vmem:[%s10889_s1 + $0x11c0] sm:$0xff] }
 0x200   : > { %4355 = vmatpush2.bf16.msra.mxu1 %v7360_v36  ;;  %v7061_v55 = vld [vmem:[%s10889_s1 + $0xe18] sm:$0xff]  ;;  %v7201_v35 = vcombine.high %v6933_v24, %v6937_v26  ;;  %v7200_v47 = vcombine.low %v6933_v24, %v6937_v26  ;;  %v4420_v24 = vld [vmem:[%s8055_s20 + $0x28] sm:$0xee] }
 0x201   : > { %4356 = vmatprep.subr.bf16.mxu1 %v7353_v39  ;;  %v7065_v30 = vld [vmem:[%s10889_s1 + $0xe38] sm:$0xff]  ;;  %v7454_v39 = vld [vmem:[%s10889_s1 + $0x11e0] sm:$0xff] }
 0x202   : > { %4304 = vmatpush2.bf16.msra.mxu0 %v7224_v23  ;;  %v7329_v36 = vcombine.high %v7061_v55, %v7065_v30  ;;  %v7328_v22 = vcombine.low %v7061_v55, %v7065_v30  ;;  %v7715_v23 = vcombine.high %v7450_v38, %v7454_v39  ;;  %v7714_v8 = vcombine.low %v7450_v38, %v7454_v39  ;;  %v7434_v30 = vld [vmem:[%s10889_s1 + $0x1140] sm:$0xff]  ;;  %v7926_v38 = vld [vmem:[%s8055_s20 + $0x10] sm:$0x11] }
 0x203   : > { %4305 = vmatprep.subr.bf16.mxu0 %v7217_v56  ;;  %v7442_v56 = vld [vmem:[%s10889_s1 + $0x1180] sm:$0xff]  ;;  %v7835_v55 = vcombine.high %v7570_v1, %v7574_v4  ;;  %v4446_v39 = vrot.slane %v7926_v38, 5 }
 0x204   : > { %4357 = vmatpush2.bf16.msra.mxu1 %v7352_v49  ;;  %v7843_v49 = vcombine.high %v7578_v32, %v7582_v45 }
 0x205   : > { %4358 = vmatprep.subr.bf16.mxu1 %v7345_v62  ;;  %v7446_v62 = vld [vmem:[%s10889_s1 + $0x11a0] sm:$0xff] }
 0x206   : > { %4306 = vmatpush2.bf16.msra.mxu0 %v7216_v25  ;;  %v4419_v25 = vld [vmem:[%s8055_s20 + $0x20] sm:$0xee]  ;;  %v7706_v26 = vcombine.low %v7442_v56, %v7446_v62 }
 0x207   : > { %4307 = vmatprep.subr.bf16.mxu0 %v7209_v17  ;;  %v7707_v17 = vcombine.high %v7442_v56, %v7446_v62  ;;  %v7389_v56 = vrot.slane %v4420_v24, 9  ;;  %v7929_v62 = vld [vmem:[%s8055_s20 + $0x38] sm:$0x11] }
 0x208   : > { %4359 = vmatpush2.bf16.msra.mxu1 %v7344_v11  ;;  %v7842_v11 = vcombine.low %v7578_v32, %v7582_v45  ;;  %v7388_v32 = vrot.slane %v4419_v25, 9  ;;  %v7927_v45 = vld [vmem:[%s8055_s20 + $0x30] sm:$0x11]  ;;  %v7834_v25 = vcombine.low %v7570_v1, %v7574_v4  ;;  %v7558_v1 = vld [vmem:[%s10889_s1 + $0x1520] sm:$0xff] }
 0x209   : > { %4360 = vmatprep.subr.bf16.mxu1 %v7337_v20  ;;  %v4418_v20 = vld [vmem:[%s8055_s20 + $0x8] sm:$0xee] }
 0x20a   : > { %4308 = vmatpush2.bf16.msra.mxu0 %v7208_v54  ;;  %v7438_v54 = vld [vmem:[%s10889_s1 + $0x1160] sm:$0xff] }
 0x20b   : > { %4309 = vmatprep.subr.bf16.mxu0 %v7201_v35  ;;  %v7566_v35 = vld [vmem:[%s10889_s1 + $0x1560] sm:$0xff]  ;;  %v7699_v38 = vcombine.high %v7434_v30, %v7438_v54 }
 0x20c   : > { %4361 = vmatpush2.bf16.msra.mxu1 %v7336_v60  ;;  %v7562_v60 = vld [vmem:[%s10889_s1 + $0x1540] sm:$0xff] }
 0x20d   : > { %4362 = vmatprep.subr.bf16.mxu1 %v7329_v36  ;;  %v7386_v36 = vrot.slane %v4417_v10, 9  ;;  %v4458_v10 = vrot.slane %v7929_v62, 5 }
 0x20e   : > { %4310 = vmatpush2.bf16.msra.mxu0 %v7200_v47  ;;  %v4454_v47 = vrot.slane %v7927_v45, 5 }
 0x20f   : > { %6045 = vmatprep.subr.bf16.mxu0 %v7715_v23  ;;  %v7928_v23 = vld [vmem:[%s8055_s20 + $0x18] sm:$0x11]  ;;  %v9835_v24 = vsel %vm9801_vm5, %v7389_v56, %v4458_v10  ;;  %v7542_v56 = vld [vmem:[%s10889_s1 + $0x14a0] sm:$0xff] }
 0x210   : > { %4363 = vmatpush2.bf16.msra.mxu1 %v7328_v22  ;;  %v7387_v22 = vrot.slane %v4418_v20, 9  ;;  %v7430_v20 = vld [vmem:[%s10889_s1 + $0x1120] sm:$0xff]  ;;  %v9827_v4 = vsel %vm9801_vm5, %v7388_v32, %v4454_v47 }
 0x211   : > { %6098 = vmatprep.subr.bf16.mxu1 %v7843_v49  ;;  %4312 = vmatmul.mubr.bf16.vlgmr.msra.gmra.mxu0 %v9103_v58  ;;  %v4450_v49 = vrot.slane %v7928_v23, 5  ;;  %v7410_v23 = vld [vmem:[%s10889_s1 + $0x1080] sm:$0xff]  ;;  %v7439_v58 = vld [vmem:[%s10889_s1 + $0x1168] sm:$0xff] }
 0x212   : > { %6046 = vmatpush1.bf16.msra.mxu0 %v7714_v8  ;;  %4321 = vmatprep.mubr.bf16.mxu0 %v9123_v48  ;;  %v7426_v8 = vld [vmem:[%s10889_s1 + $0x1100] sm:$0xff]  ;;  %v9823_v48 = vsel %vm9801_vm5, %v7386_v36, %v4446_v39 }
 0x213   : > { %4365 = vmatmul.mubr.bf16.vlgmr.msra.gmra.mxu1 %v9117_v41  ;;  %6047 = vmatprep.subr.bf16.mxu0 %v7707_v17  ;;  %v7827_v41 = vcombine.high %v7562_v60, %v7566_v35  ;;  %v7698_v17 = vcombine.low %v7434_v30, %v7438_v54  ;;  %v7691_v45 = vcombine.high %v7426_v8, %v7430_v20  ;;  %v7418_v39 = vld [vmem:[%s10889_s1 + $0x10c0] sm:$0xff] }
 0x214   : > { %6099 = vmatpush1.bf16.msra.mxu1 %v7842_v11  ;;  %4374 = vmatprep.mubr.bf16.mxu1 %v9132_v21  ;;  %v7554_v11 = vld [vmem:[%s10889_s1 + $0x1500] sm:$0xff]  ;;  %v9831_v21 = vsel %vm9801_vm5, %v7387_v22, %v4450_v49  ;;  %v9845_v30 = vcombine.high %v9823_v48, %v9827_v4  ;;  %v7690_v32 = vcombine.low %v7426_v8, %v7430_v20 }
 0x215   : > { %6100 = vmatprep.subr.bf16.mxu1 %v7835_v55  ;;  %v7826_v55 = vcombine.low %v7562_v60, %v7566_v35  ;;  %v7819_v36 = vcombine.high %v7554_v11, %v7558_v1  ;;  %v7546_v54 = vld [vmem:[%s10889_s1 + $0x14c0] sm:$0xff]  ;;  %v9856_v35 = vcombine.high %v9831_v21, %v9835_v24  ;;  %v7818_v47 = vcombine.low %v7554_v11, %v7558_v1 }
 0x216   : > { %6048 = vmatpush1.bf16.msra.mxu0 %v7706_v26  ;;  %v7422_v26 = vld [vmem:[%s10889_s1 + $0x10e0] sm:$0xff] }
 0x217   : > { %6049 = vmatprep.subr.bf16.mxu0 %v7699_v38  ;;  %v7550_v60 = vld [vmem:[%s10889_s1 + $0x14e0] sm:$0xff]  ;;  %v7682_v62 = vcombine.low %v7418_v39, %v7422_v26 }
 0x218   : > { %6101 = vmatpush1.bf16.msra.mxu1 %v7834_v25  ;;  %v7811_v22 = vcombine.high %v7546_v54, %v7550_v60  ;;  %v7414_v49 = vld [vmem:[%s10889_s1 + $0x10a0] sm:$0xff]  ;;  %v7810_v10 = vcombine.low %v7546_v54, %v7550_v60 }
 0x219   : > { %6102 = vmatprep.subr.bf16.mxu1 %v7827_v41  ;;  %4322 = vmatmul.mubr.bf16.gmra.mxu0 %v9153_v9  ;;  %v7683_v9 = vcombine.high %v7418_v39, %v7422_v26  ;;  %v7675_v25 = vcombine.high %v7410_v23, %v7414_v49  ;;  %v7402_v41 = vld [vmem:[%s10889_s1 + $0x1040] sm:$0xff]  ;;  %v7674_v1 = vcombine.low %v7410_v23, %v7414_v49 }
 0x21a   : > { %6050 = vmatpush1.bf16.msra.mxu0 %v7698_v17  ;;  %6077 = vmatprep.mubr.bf16.mxu0 %v9845_v30  ;;  %v7406_v8 = vld [vmem:[%s10889_s1 + $0x1060] sm:$0xff] }
 0x21b   : > { %4375 = vmatmul.mubr.bf16.gmra.mxu1 %v9161_v12  ;;  %6051 = vmatprep.subr.bf16.mxu0 %v7691_v45  ;;  %v7538_v12 = vld [vmem:[%s10889_s1 + $0x1480] sm:$0xff]  ;;  %v7666_v60 = vcombine.low %v7402_v41, %v7406_v8 }
 0x21c   : > { %6103 = vmatpush1.bf16.msra.mxu1 %v7826_v55  ;;  %6130 = vmatprep.mubr.bf16.mxu1 %v9856_v35  ;;  %v7803_v38 = vcombine.high %v7538_v12, %v7542_v56  ;;  %v7530_v20 = vld [vmem:[%s10889_s1 + $0x1440] sm:$0xff]  ;;  %v7802_v17 = vcombine.low %v7538_v12, %v7542_v56  ;;  %v7667_v55 = vcombine.high %v7402_v41, %v7406_v8 }
 0x21d   : > { %6104 = vmatprep.subr.bf16.mxu1 %v7819_v36  ;;  %v7534_v11 = vld [vmem:[%s10889_s1 + $0x1460] sm:$0xff] }
 0x21e   : > { %6052 = vmatpush1.bf16.msra.mxu0 %v7690_v32  ;;  %v7795_v45 = vcombine.high %v7530_v20, %v7534_v11  ;;  %v7394_v36 = vld [vmem:[%s10889_s1 + $0x1000] sm:$0xff]  ;;  %v7794_v32 = vcombine.low %v7530_v20, %v7534_v11 }
 0x21f   : > { %6053 = vmatprep.subr.bf16.mxu0 %v7683_v9  ;;  %v7398_v39 = vld [vmem:[%s10889_s1 + $0x1020] sm:$0xff] }
 0x220   : > { %6105 = vmatpush1.bf16.msra.mxu1 %v7818_v47  ;;  %v7522_v26 = vld [vmem:[%s10889_s1 + $0x1400] sm:$0xff]  ;;  %v7659_v47 = vcombine.high %v7394_v36, %v7398_v39  ;;  %v7658_v56 = vcombine.low %v7394_v36, %v7398_v39 }
 0x221   : > { %6106 = vmatprep.subr.bf16.mxu1 %v7811_v22  ;;  %v7526_v54 = vld [vmem:[%s10889_s1 + $0x1420] sm:$0xff] }
 0x222   : > { %6054 = vmatpush1.bf16.msra.mxu0 %v7682_v62  ;;  %v7787_v9 = vcombine.high %v7522_v26, %v7526_v54  ;;  %v7514_v22 = vld [vmem:[%s10889_s1 + $0x13c0] sm:$0xff]  ;;  %v7786_v62 = vcombine.low %v7522_v26, %v7526_v54 }
 0x223   : > { %6055 = vmatprep.subr.bf16.mxu0 %v7675_v25  ;;  %v7518_v23 = vld [vmem:[%s10889_s1 + $0x13e0] sm:$0xff] }
 0x224   : > { %6107 = vmatpush1.bf16.msra.mxu1 %v7810_v10  ;;  %v7642_v49 = vld [vmem:[%s10889_s1 + $0x17c0] sm:$0xff]  ;;  %v7779_v10 = vcombine.high %v7514_v22, %v7518_v23  ;;  %v7778_v11 = vcombine.low %v7514_v22, %v7518_v23 }
 0x225   : > { %6108 = vmatprep.subr.bf16.mxu1 %v7803_v38  ;;  %v7646_v12 = vld [vmem:[%s10889_s1 + $0x17e0] sm:$0xff] }
 0x226   : > { %6056 = vmatpush1.bf16.msra.mxu0 %v7674_v1  ;;  %v7907_v25 = vcombine.high %v7642_v49, %v7646_v12  ;;  %v7506_v38 = vld [vmem:[%s10889_s1 + $0x1380] sm:$0xff]  ;;  %v7906_v1 = vcombine.low %v7642_v49, %v7646_v12 }
 0x227   : > { %6057 = vmatprep.subr.bf16.mxu0 %v7667_v55  ;;  %v7510_v41 = vld [vmem:[%s10889_s1 + $0x13a0] sm:$0xff] }
 0x228   : > { %6109 = vmatpush1.bf16.msra.mxu1 %v7802_v17  ;;  %v7634_v8 = vld [vmem:[%s10889_s1 + $0x1780] sm:$0xff]  ;;  %v7771_v17 = vcombine.high %v7506_v38, %v7510_v41  ;;  %v7770_v54 = vcombine.low %v7506_v38, %v7510_v41 }
 0x229   : > { %6110 = vmatprep.subr.bf16.mxu1 %v7795_v45  ;;  %v7638_v20 = vld [vmem:[%s10889_s1 + $0x17a0] sm:$0xff] }
 0x22a   : > { %6058 = vmatpush1.bf16.msra.mxu0 %v7666_v60  ;;  %v7899_v55 = vcombine.high %v7634_v8, %v7638_v20  ;;  %v7498_v45 = vld [vmem:[%s10889_s1 + $0x1340] sm:$0xff]  ;;  %v9933_v60 = vpop.f32.mrf.mxu0 }
 0x22b   : > { %6059 = vmatprep.subr.bf16.mxu0 %v7659_v47  ;;  %v7502_v36 = vld [vmem:[%s10889_s1 + $0x1360] sm:$0xff] }
 0x22c   : > { %6111 = vmatpush1.bf16.msra.mxu1 %v7794_v32  ;;  %v7626_v39 = vld [vmem:[%s10889_s1 + $0x1740] sm:$0xff]  ;;  %v7898_v32 = vcombine.low %v7634_v8, %v7638_v20  ;;  %v7763_v47 = vcombine.high %v7498_v45, %v7502_v36 }
 0x22d   : > { %6112 = vmatprep.subr.bf16.mxu1 %v7787_v9  ;;  %v7630_v26 = vld [vmem:[%s10889_s1 + $0x1760] sm:$0xff]  ;;  %v9935_v9 = vpop.f32.mrf.mxu1 }
 0x22e   : > { %6060 = vmatpush1.bf16.msra.mxu0 %v7658_v56  ;;  %10904 = vst [vmem:[#allocation10_spill] sm:$0xff] %v9935_v9  ;;  %v7891_v22 = vcombine.high %v7626_v39, %v7630_v26  ;;  %v7490_v23 = vld [vmem:[%s10889_s1 + $0x1300] sm:$0xff] }
 0x22f   : > { %6061 = vmatprep.subr.bf16.mxu0 %v7779_v10  ;;  %v7494_v49 = vld [vmem:[%s10889_s1 + $0x1320] sm:$0xff]  ;;  %v9949_v10 = vpop.f32.mrf.mxu0  ;;  %v9951_v41 = vpop.f32.mrf.mxu1 }
 0x230   : > { %6113 = vmatpush1.bf16.msra.mxu1 %v7786_v62  ;;  %v7618_v12 = vld [vmem:[%s10889_s1 + $0x1700] sm:$0xff]  ;;  %v7762_v62 = vcombine.low %v7498_v45, %v7502_v36  ;;  %10905 = vst [vmem:[#allocation11_spill] sm:$0xff] %v9949_v10  ;;  %v7755_v38 = vcombine.high %v7490_v23, %v7494_v49  ;;  %10906 = vst [vmem:[#allocation12_spill] sm:$0xff] %v9951_v41  ;;  %v4474_v41 = vrot.slane %v7933_v14, 5  ;;  %v7443_v14 = vld [vmem:[%s10889_s1 + $0x1188] sm:$0xff] }
 0x231   : > { %6114 = vmatprep.subr.bf16.mxu1 %v7907_v25  ;;  %v7622_v56 = vld [vmem:[%s10889_s1 + $0x1720] sm:$0xff]  ;;  %v7890_v25 = vcombine.low %v7626_v39, %v7630_v26  ;;  %v9965_v45 = vpop.f32.mrf.mxu0  ;;  %v9967_v26 = vpop.f32.mrf.mxu1 }
 0x232   : > { %6062 = vmatpush2.bf16.msra.mxu0 %v7778_v11  ;;  %v7883_v8 = vcombine.high %v7618_v12, %v7622_v56  ;;  %v7482_v20 = vld [vmem:[%s10889_s1 + $0x12c0] sm:$0xff]  ;;  %10907 = vst [vmem:[#allocation13_spill] sm:$0xff] %v9965_v45  ;;  %v7882_v36 = vcombine.low %v7618_v12, %v7622_v56  ;;  %10908 = vst [vmem:[#allocation14_spill] sm:$0xff] %v9967_v26  ;;  %v4466_v26 = vrot.slane %v7932_v33, 5  ;;  %v7393_v45 = vrot.slane %v4424_v31, 9  ;;  %v7447_v31 = vld [vmem:[%s10889_s1 + $0x11a8] sm:$0xff] }
 0x233   : > { %6063 = vmatprep.subr.bf16.mxu0 %v7771_v17  ;;  %v7486_v11 = vld [vmem:[%s10889_s1 + $0x12e0] sm:$0xff]  ;;  %v9981_v12 = vpop.f32.mrf.mxu0 }
 0x234   : > { %6115 = vmatpush2.bf16.msra.mxu1 %v7906_v1  ;;  %v7610_v1 = vld [vmem:[%s10889_s1 + $0x16c0] sm:$0xff]  ;;  %v7747_v39 = vcombine.high %v7482_v20, %v7486_v11  ;;  %10909 = vst [vmem:[#allocation15_spill] sm:$0xff] %v9981_v12 }
 0x235   : > { %6116 = vmatprep.subr.bf16.mxu1 %v7899_v55  ;;  %v7614_v17 = vld [vmem:[%s10889_s1 + $0x16e0] sm:$0xff]  ;;  %v7754_v55 = vcombine.low %v7490_v23, %v7494_v49  ;;  %v7746_v49 = vcombine.low %v7482_v20, %v7486_v11 }
 0x236   : > { %6064 = vmatpush2.bf16.msra.mxu0 %v7770_v54  ;;  %v7875_v54 = vcombine.high %v7610_v1, %v7614_v17  ;;  %v7606_v23 = vld [vmem:[%s10889_s1 + $0x16a0] sm:$0xff]  ;;  %v7874_v56 = vcombine.low %v7610_v1, %v7614_v17  ;;  %v181_v1 = vlaneseq }
 0x237   : > { %6065 = vmatprep.subr.bf16.mxu0 %v7763_v47  ;;  %v7478_v47 = vld [vmem:[%s10889_s1 + $0x12a0] sm:$0xff] }
 0x238   : > { %6117 = vmatpush2.bf16.msra.mxu1 %v7898_v32  ;;  %v7474_v32 = vld [vmem:[%s10889_s1 + $0x1280] sm:$0xff] }
 0x239   : > { %6118 = vmatprep.subr.bf16.mxu1 %v7891_v22  ;;  %v7602_v22 = vld [vmem:[%s10889_s1 + $0x1680] sm:$0xff]  ;;  %v7738_v17 = vcombine.low %v7474_v32, %v7478_v47 }
 0x23a   : > { %6066 = vmatpush2.bf16.msra.mxu0 %v7762_v62  ;;  %v7739_v62 = vcombine.high %v7474_v32, %v7478_v47  ;;  %v7594_v20 = vld [vmem:[%s10889_s1 + $0x1640] sm:$0xff] }
 0x23b   : > { %6067 = vmatprep.subr.bf16.mxu0 %v7755_v38  ;;  %v7867_v38 = vcombine.high %v7602_v22, %v7606_v23  ;;  %v7598_v11 = vld [vmem:[%s10889_s1 + $0x1660] sm:$0xff] }
 0x23c   : > { %6119 = vmatpush2.bf16.msra.mxu1 %v7890_v25  ;;  %v9983_v25 = vpop.f32.mrf.mxu1  ;;  %v7859_v52 = vcombine.high %v7594_v20, %v7598_v11  ;;  %v7462_v32 = vld [vmem:[%s10889_s1 + $0x1220] sm:$0xff]  ;;  %v7858_v63 = vcombine.low %v7594_v20, %v7598_v11  ;;  %v7455_v20 = vld [vmem:[%s10889_s1 + $0x11e8] sm:$0xff] }
 0x23d   : > { %6120 = vmatprep.subr.bf16.mxu1 %v7883_v8  ;;  %10910 = vst [vmem:[#allocation16_spill] sm:$0xff] %v9983_v25  ;;  %v7466_v8 = vld [vmem:[%s10889_s1 + $0x1240] sm:$0xff]  ;;  %v7579_v11 = vld [vmem:[%s10889_s1 + $0x15c8] sm:$0xff] }
 0x23e   : > { %6068 = vmatpush2.bf16.msra.mxu0 %v7754_v55  ;;  %v9997_v55 = vpop.f32.mrf.mxu0  ;;  %v7586_v47 = vld [vmem:[%s10889_s1 + $0x1600] sm:$0xff] }
 0x23f   : > { %6069 = vmatprep.subr.bf16.mxu0 %v7747_v39  ;;  %10911 = vst [vmem:[#allocation17_spill] sm:$0xff] %v9997_v55  ;;  %v7731_v39 = vcombine.high %v7466_v8, %v7470_v2  ;;  %v4422_v55 = vld [vmem:[%s8055_s20 + $0x48] sm:$0xee] }
 0x240   : > { %6121 = vmatpush2.bf16.msra.mxu1 %v7882_v36  ;;  %v7866_v36 = vcombine.low %v7602_v22, %v7606_v23  ;;  %v7590_v22 = vld [vmem:[%s10889_s1 + $0x1620] sm:$0xff]  ;;  %v10013_v23 = vshrl.u32 %v181_v1, 7  ;;  %v7722_v1 = vcombine.low %v7458_v46, %v7462_v32 }
 0x241   : > { %6122 = vmatprep.subr.bf16.mxu1 %v7875_v54  ;;  %v9999_v54 = vpop.f32.mrf.mxu1  ;;  %v7850_v7 = vcombine.low %v7586_v47, %v7590_v22 }
 0x242   : > { %6070 = vmatpush2.bf16.msra.mxu0 %v7746_v49  ;;  %10912 = vst [vmem:[#allocation18_spill] sm:$0xff] %v9999_v54  ;;  %v7730_v49 = vcombine.low %v7466_v8, %v7470_v2  ;;  %v7723_v54 = vcombine.high %v7458_v46, %v7462_v32  ;;  %v191_v25 = vsub.s32 2, %v10013_v23  ;;  %v7851_v2 = vcombine.high %v7586_v47, %v7590_v22  ;;  %v7451_v8 = vld [vmem:[%s10889_s1 + $0x11c8] sm:$0xff]  ;;  %v7930_v46 = vld [vmem:[%s8055_s20 + $0x50] sm:$0x11] }
 0x243   : > { %6071 = vmatprep.subr.bf16.mxu0 %v7739_v62  ;;  %v4423_v62 = vld [vmem:[%s8055_s20 + $0x60] sm:$0xee]  ;;  %v10022_v12 = vpop.f32.mrf.mxu1  ;;  %v7931_v32 = vld [vmem:[%s8055_s20 + $0x70] sm:$0x11]  ;;  %v7717_v9 = vcombine.high %v7451_v8, %v7455_v20  ;;  %v7575_v47 = vld [vmem:[%s10889_s1 + $0x15a8] sm:$0xff] }
 0x244   : > { %6123 = vmatpush2.bf16.msra.mxu1 %v7874_v56  ;;  %v4421_v56 = vld [vmem:[%s8055_s20 + $0x40] sm:$0xee]  ;;  %10914 = vst [vmem:[#allocation20_spill] sm:$0xff] %v10022_v12  ;;  %v4470_v12 = vrot.slane %v7931_v32, 5 }
 0x245   : > { %6124 = vmatprep.subr.bf16.mxu1 %v7867_v38  ;;  %v10017_v38 = vpop.f32.mrf.mxu0 }
 0x246   : > { %6072 = vmatpush2.bf16.msra.mxu0 %v7738_v17  ;;  %10913 = vst [vmem:[#allocation19_spill] sm:$0xff] %v10017_v38  ;;  %v7583_v17 = vld [vmem:[%s10889_s1 + $0x15e8] sm:$0xff]  ;;  %v7391_v38 = vrot.slane %v4422_v55, 9  ;;  %v10061_v55 = vcombine.low %v9823_v48, %v9827_v4  ;;  %v7716_v48 = vcombine.low %v7451_v8, %v7455_v20  ;;  %v7708_v8 = vcombine.low %v7443_v14, %v7447_v31 }
 0x247   : > { %6073 = vmatprep.subr.bf16.mxu0 %v7731_v39  ;;  %v7392_v39 = vrot.slane %v4423_v62, 9  ;;  %v10040_v10 = vpop.f32.mrf.mxu0  ;;  %v195_v62 = vsub.s32 3, %v10013_v23  ;;  %v7845_v33 = vcombine.high %v7579_v11, %v7583_v17 }
 0x248   : > { %6125 = vmatpush2.bf16.msra.mxu1 %v7866_v36  ;;  %v4462_v36 = vrot.slane %v7930_v46, 5  ;;  %v4467_v4 = vsel %vm9801_vm5, %v7391_v38, %v4466_v26  ;;  %v4475_v46 = vsel %vm9801_vm5, %v7393_v45, %v4474_v41  ;;  %v7563_v41 = vld [vmem:[%s10889_s1 + $0x1548] sm:$0xff] }
 0x249   : > { %6126 = vmatprep.subr.bf16.mxu1 %v7859_v52  ;;  %v7390_v52 = vrot.slane %v4421_v56, 9  ;;  %v10045_v56 = vld [vmem:[%s10890_s2] sm:$0xff]  ;;  %v10081_v32 = vpop.f32.mrf.mxu0  ;;  %v7567_v45 = vld [vmem:[%s10889_s1 + $0x1568] sm:$0xff] }
 0x24a   : > { %6074 = vmatpush2.bf16.msra.mxu0 %v7730_v49  ;;  %v10048_v49 = vpop.f32.mrf.mxu1 }
 0x24b   : > { %6075 = vmatprep.subr.bf16.mxu0 %v7723_v54  ;;  %10915 = vst [vmem:[#allocation21_spill] sm:$0xff] %v10048_v49  ;;  %v7571_v54 = vld [vmem:[%s10889_s1 + $0x1588] sm:$0xff]  ;;  %v4463_v22 = vsel %vm9801_vm5, %v7390_v52, %v4462_v36  ;;  %v7844_v52 = vcombine.low %v7579_v11, %v7583_v17  ;;  %v7709_v36 = vcombine.high %v7443_v14, %v7447_v31 }
 0x24c   : > { %6127 = vmatpush2.bf16.msra.mxu1 %v7858_v63  ;;  %v10057_v63 = vrot.slane %v10045_v56, %v191_v25  ;;  %v10075_v25 = vcombine.low %v9831_v21, %v9835_v24  ;;  %v10083_v49 = vpop.f32.mrf.mxu1  ;;  %v7435_v21 = vld [vmem:[%s10889_s1 + $0x1148] sm:$0xff]  ;;  %v10094_v24 = vrot.slane %v10045_v56, %v195_v62  ;;  %v7836_v17 = vcombine.low %v7571_v54, %v7575_v47 }
 0x24d   : > { %6128 = vmatprep.subr.bf16.mxu1 %v7851_v2  ;;  %v4471_v2 = vsel %vm9801_vm5, %v7392_v39, %v4470_v12  ;;  %10916 = vst [vmem:[#allocation22_spill] sm:$0xff] %v10083_v49  ;;  %v7837_v12 = vcombine.high %v7571_v54, %v7575_v47  ;;  %v7701_v39 = vcombine.high %v7435_v21, %v7439_v58 }
 0x24e   : > { %6076 = vmatpush2.bf16.msra.mxu0 %v7722_v1  ;;  %v10085_v1 = vcombine.high %v4463_v22, %v4471_v2  ;;  %v2231_v26 = vadd.f32 %v9141_v57, %v10057_v63  ;;  %v7427_v57 = vld [vmem:[%s10889_s1 + $0x1108] sm:$0xff]  ;;  %v2232_v14 = vadd.f32 %v9150_v6, %v10094_v24 }
 0x24f   : > { %6151 = vmatprep.subr.bf16.mxu0 %v7717_v9  ;;  %v10097_v9 = vcombine.high %v4467_v4, %v4475_v46 }
 0x250   : > { %6129 = vmatpush2.bf16.msra.mxu1 %v7850_v7 }
 0x251   : > { %6204 = vmatprep.subr.bf16.mxu1 %v7845_v33  ;;  %v4101_v7 = vpop.f32.mrf.mxu0  ;;  %6078 = vmatmul.mubr.bf16.vlgmr.msra.gmra.mxu0 %v10061_v55  ;;  %v7829_v33 = vcombine.high %v7563_v41, %v7567_v45 }
 0x252   : > { %6152 = vmatpush1.bf16.msra.mxu0 %v7716_v48  ;;  %6087 = vmatprep.mubr.bf16.mxu0 %v10085_v1  ;;  %v7431_v48 = vld [vmem:[%s10889_s1 + $0x1128] sm:$0xff] }
 0x253   : > { %v4154_v38 = vpop.f32.mrf.mxu1  ;;  %6131 = vmatmul.mubr.bf16.vlgmr.msra.gmra.mxu1 %v10075_v25  ;;  %v4103_v11 = vpop.f32.mrf.mxu0  ;;  %6153 = vmatprep.subr.bf16.mxu0 %v7709_v36  ;;  %v7555_v36 = vld [vmem:[%s10889_s1 + $0x1508] sm:$0xff] }
 0x254   : > { %v4155_v20 = vadd.f32 %v4154_v38, %v4101_v7  ;;  %6205 = vmatpush1.bf16.msra.mxu1 %v7844_v52  ;;  %6140 = vmatprep.mubr.bf16.mxu1 %v10097_v9  ;;  %v10120_v52 = vcombine.low %v4463_v22, %v4471_v2  ;;  %v2239_v7 = vadd.f32 %v9163_v15, %v10057_v63  ;;  %v7419_v15 = vld [vmem:[%s10889_s1 + $0x10c8] sm:$0xff] }
 0x255   : > { %v4156_v62 = vpop.f32.mrf.mxu1  ;;  %6206 = vmatprep.subr.bf16.mxu1 %v7837_v12  ;;  %v4105_v47 = vpop.f32.mrf.mxu0  ;;  %v7559_v12 = vld [vmem:[%s10889_s1 + $0x1528] sm:$0xff]  ;;  %v7700_v38 = vcombine.low %v7435_v21, %v7439_v58 }
 0x256   : > { %v10117_v31 = vadd.f32 %v4155_v20, %v2231_v26  ;;  %v4157_v54 = vadd.f32 %v4156_v62, %v4103_v11  ;;  %6154 = vmatpush1.bf16.msra.mxu0 %v7708_v8  ;;  %v10130_v26 = vcombine.low %v4467_v4, %v4475_v46  ;;  %v7828_v20 = vcombine.low %v7563_v41, %v7567_v45  ;;  %v7423_v4 = vld [vmem:[%s10889_s1 + $0x10e8] sm:$0xff] }
 0x257   : > { %v4158_v6 = vpop.f32.mrf.mxu1  ;;  %v4107_v2 = vpop.f32.mrf.mxu0  ;;  %6155 = vmatprep.subr.bf16.mxu0 %v7701_v39  ;;  %v7693_v62 = vcombine.high %v7427_v57, %v7431_v48  ;;  %v7821_v49 = vcombine.high %v7555_v36, %v7559_v12  ;;  %v2240_v46 = vadd.f32 %v9171_v28, %v10094_v24  ;;  %v7547_v45 = vld [vmem:[%s10889_s1 + $0x14c8] sm:$0xff]  ;;  %v7692_v28 = vcombine.low %v7427_v57, %v7431_v48 }
 0x258   : > { %10917 = vst [vmem:[#allocation23_spill] sm:$0xff] %v10117_v31  ;;  %v10132_v11 = vadd.f32 %v4157_v54, %v2232_v14  ;;  %v4159_v22 = vadd.f32 %v4158_v6, %v4105_v47  ;;  %6207 = vmatpush1.bf16.msra.mxu1 %v7836_v17  ;;  %v7551_v8 = vld [vmem:[%s10889_s1 + $0x14e8] sm:$0xff]  ;;  %v2247_v17 = vadd.f32 %v9181_v37, %v10057_v63 }
 0x259   : > { %v4160_v31 = vpop.f32.mrf.mxu1  ;;  %6208 = vmatprep.subr.bf16.mxu1 %v7829_v33  ;;  %v4111_v41 = vpop.f32.mrf.mxu0  ;;  %6088 = vmatmul.mubr.bf16.gmra.mxu0 %v10120_v52  ;;  %v7820_v33 = vcombine.low %v7555_v36, %v7559_v12  ;;  %v7685_v47 = vcombine.high %v7419_v15, %v7423_v4  ;;  %v7813_v6 = vcombine.high %v7547_v45, %v7551_v8  ;;  %v7411_v37 = vld [vmem:[%s10889_s1 + $0x1088] sm:$0xff] }
 0x25a   : > { %v10142_v21 = vadd.f32 %v4159_v22, %v2239_v7  ;;  %v4161_v58 = vadd.f32 %v4160_v31, %v4107_v2  ;;  %6156 = vmatpush1.bf16.msra.mxu0 %v7700_v38  ;;  %v7415_v38 = vld [vmem:[%s10889_s1 + $0x10a8] sm:$0xff]  ;;  %6183 = vmatprep.mubr.bf16.mxu0 %v9845_v30  ;;  %v2248_v57 = vadd.f32 %v9196_v44, %v10094_v24 }
 0x25b   : > { %v4164_v39 = vpop.f32.mrf.mxu1  ;;  %6141 = vmatmul.mubr.bf16.gmra.mxu1 %v10130_v26  ;;  %v4113_v54 = vpop.f32.mrf.mxu0  ;;  %6157 = vmatprep.subr.bf16.mxu0 %v7693_v62  ;;  %v2255_v22 = vadd.f32 %v9199_v50, %v10057_v63  ;;  %v7684_v44 = vcombine.low %v7419_v15, %v7423_v4  ;;  %v7812_v62 = vcombine.low %v7547_v45, %v7551_v8  ;;  %v7407_v50 = vld [vmem:[%s10889_s1 + $0x1068] sm:$0xff] }
 0x25c   : > { %v10154_v14 = vadd.f32 %v4161_v58, %v2240_v46  ;;  %v4165_v31 = vadd.f32 %v4164_v39, %v4111_v41  ;;  %6209 = vmatpush1.bf16.msra.mxu1 %v7828_v20  ;;  %v7543_v20 = vld [vmem:[%s10889_s1 + $0x14a8] sm:$0xff]  ;;  %6236 = vmatprep.mubr.bf16.mxu1 %v9856_v35  ;;  %v2256_v63 = vadd.f32 %v9213_v3, %v10094_v24 }
 0x25d   : > { %v4166_v7 = vpop.f32.mrf.mxu1  ;;  %6210 = vmatprep.subr.bf16.mxu1 %v7821_v49  ;;  %v4115_v12 = vpop.f32.mrf.mxu0  ;;  %v7539_v49 = vld [vmem:[%s10889_s1 + $0x1488] sm:$0xff] }
 0x25e   : > { %v10165_v48 = vadd.f32 %v4165_v31, %v2247_v17  ;;  %v4167_v36 = vadd.f32 %v4166_v7, %v4113_v54  ;;  %6158 = vmatpush1.bf16.msra.mxu0 %v7692_v28  ;;  %v7677_v17 = vcombine.high %v7411_v37, %v7415_v38  ;;  %v7805_v31 = vcombine.high %v7539_v49, %v7543_v20  ;;  %v7403_v54 = vld [vmem:[%s10889_s1 + $0x1048] sm:$0xff] }
 0x25f   : > { %v4168_v2 = vpop.f32.mrf.mxu1  ;;  %v4117_v41 = vpop.f32.mrf.mxu0  ;;  %6159 = vmatprep.subr.bf16.mxu0 %v7685_v47  ;;  %v7531_v45 = vld [vmem:[%s10889_s1 + $0x1448] sm:$0xff]  ;;  %v7676_v28 = vcombine.low %v7411_v37, %v7415_v38  ;;  %v7804_v47 = vcombine.low %v7539_v49, %v7543_v20  ;;  %v7669_v7 = vcombine.high %v7403_v54, %v7407_v50 }
 0x260   : > { %v10176_v46 = vadd.f32 %v4167_v36, %v2248_v57  ;;  %v4169_v58 = vadd.f32 %v4168_v2, %v4115_v12  ;;  %6211 = vmatpush1.bf16.msra.mxu1 %v7820_v33  ;;  %v7535_v8 = vld [vmem:[%s10889_s1 + $0x1468] sm:$0xff]  ;;  %v7668_v57 = vcombine.low %v7403_v54, %v7407_v50 }
 0x261   : > { %v4170_v39 = vpop.f32.mrf.mxu1  ;;  %6212 = vmatprep.subr.bf16.mxu1 %v7813_v6  ;;  %v7797_v3 = vcombine.high %v7531_v45, %v7535_v8  ;;  %v7395_v24 = vld [vmem:[%s10889_s1 + $0x1008] sm:$0xff]  ;;  %v7796_v36 = vcombine.low %v7531_v45, %v7535_v8 }
 0x262   : > { %v10186_v15 = vadd.f32 %v4169_v58, %v2255_v22  ;;  %v4171_v4 = vadd.f32 %v4170_v39, %v4117_v41  ;;  %6160 = vmatpush1.bf16.msra.mxu0 %v7684_v44  ;;  %v7399_v6 = vld [vmem:[%s10889_s1 + $0x1028] sm:$0xff] }
 0x263   : > { %6161 = vmatprep.subr.bf16.mxu0 %v7677_v17  ;;  %v7523_v37 = vld [vmem:[%s10889_s1 + $0x1408] sm:$0xff]  ;;  %v7661_v12 = vcombine.high %v7395_v24, %v7399_v6 }
 0x264   : > { %v10194_v33 = vadd.f32 %v4171_v4, %v2256_v63  ;;  %6213 = vmatpush1.bf16.msra.mxu1 %v7812_v62  ;;  %v7527_v38 = vld [vmem:[%s10889_s1 + $0x1428] sm:$0xff]  ;;  %v7660_v62 = vcombine.low %v7395_v24, %v7399_v6 }
 0x265   : > { %6214 = vmatprep.subr.bf16.mxu1 %v7805_v31  ;;  %v7789_v49 = vcombine.high %v7523_v37, %v7527_v38  ;;  %v7515_v20 = vld [vmem:[%s10889_s1 + $0x13c8] sm:$0xff]  ;;  %v7788_v58 = vcombine.low %v7523_v37, %v7527_v38 }
 0x266   : > { %6162 = vmatpush1.bf16.msra.mxu0 %v7676_v28  ;;  %v7519_v22 = vld [vmem:[%s10889_s1 + $0x13e8] sm:$0xff] }
 0x267   : > { %6163 = vmatprep.subr.bf16.mxu0 %v7669_v7  ;;  %v7643_v2 = vld [vmem:[%s10889_s1 + $0x17c8] sm:$0xff]  ;;  %v7781_v41 = vcombine.high %v7515_v20, %v7519_v22  ;;  %v7780_v63 = vcombine.low %v7515_v20, %v7519_v22 }
 0x268   : > { %6215 = vmatpush1.bf16.msra.mxu1 %v7804_v47  ;;  %v7647_v44 = vld [vmem:[%s10889_s1 + $0x17e8] sm:$0xff] }
 0x269   : > { %6216 = vmatprep.subr.bf16.mxu1 %v7797_v3  ;;  %v7909_v17 = vcombine.high %v7643_v2, %v7647_v44  ;;  %v7507_v39 = vld [vmem:[%s10889_s1 + $0x1388] sm:$0xff]  ;;  %v7908_v4 = vcombine.low %v7643_v2, %v7647_v44 }
 0x26a   : > { %6164 = vmatpush1.bf16.msra.mxu0 %v7668_v57  ;;  %v7511_v31 = vld [vmem:[%s10889_s1 + $0x13a8] sm:$0xff] }
 0x26b   : > { %6165 = vmatprep.subr.bf16.mxu0 %v7661_v12  ;;  %v7635_v54 = vld [vmem:[%s10889_s1 + $0x1788] sm:$0xff]  ;;  %v7773_v45 = vcombine.high %v7507_v39, %v7511_v31  ;;  %v7772_v24 = vcombine.low %v7507_v39, %v7511_v31 }
 0x26c   : > { %6217 = vmatpush1.bf16.msra.mxu1 %v7796_v36  ;;  %v7639_v50 = vld [vmem:[%s10889_s1 + $0x17a8] sm:$0xff] }
 0x26d   : > { %6218 = vmatprep.subr.bf16.mxu1 %v7789_v49  ;;  %v7901_v8 = vcombine.high %v7635_v54, %v7639_v50  ;;  %v7499_v28 = vld [vmem:[%s10889_s1 + $0x1348] sm:$0xff]  ;;  %v7900_v6 = vcombine.low %v7635_v54, %v7639_v50 }
 0x26e   : > { %6166 = vmatpush1.bf16.msra.mxu0 %v7660_v62  ;;  %v7503_v47 = vld [vmem:[%s10889_s1 + $0x1368] sm:$0xff] }
 0x26f   : > { %6167 = vmatprep.subr.bf16.mxu0 %v7781_v41  ;;  %v7627_v7 = vld [vmem:[%s10889_s1 + $0x1748] sm:$0xff]  ;;  %v7765_v37 = vcombine.high %v7499_v28, %v7503_v47  ;;  %v7764_v20 = vcombine.low %v7499_v28, %v7503_v47 }
 0x270   : > { %6219 = vmatpush1.bf16.msra.mxu1 %v7788_v58  ;;  %v7631_v3 = vld [vmem:[%s10889_s1 + $0x1768] sm:$0xff] }
 0x271   : > { %6220 = vmatprep.subr.bf16.mxu1 %v7909_v17  ;;  %v7893_v38 = vcombine.high %v7627_v7, %v7631_v3  ;;  %v7491_v57 = vld [vmem:[%s10889_s1 + $0x1308] sm:$0xff]  ;;  %v7892_v22 = vcombine.low %v7627_v7, %v7631_v3 }
 0x272   : > { %6168 = vmatpush2.bf16.msra.mxu0 %v7780_v63  ;;  %v7495_v36 = vld [vmem:[%s10889_s1 + $0x1328] sm:$0xff] }
 0x273   : > { %6169 = vmatprep.subr.bf16.mxu0 %v7773_v45  ;;  %v7619_v12 = vld [vmem:[%s10889_s1 + $0x1708] sm:$0xff]  ;;  %v7757_v2 = vcombine.high %v7491_v57, %v7495_v36  ;;  %v7756_v39 = vcombine.low %v7491_v57, %v7495_v36 }
 0x274   : > { %6221 = vmatpush2.bf16.msra.mxu1 %v7908_v4  ;;  %v7623_v49 = vld [vmem:[%s10889_s1 + $0x1728] sm:$0xff] }
 0x275   : > { %6222 = vmatprep.subr.bf16.mxu1 %v7901_v8  ;;  %v7885_v44 = vcombine.high %v7619_v12, %v7623_v49  ;;  %v7483_v62 = vld [vmem:[%s10889_s1 + $0x12c8] sm:$0xff]  ;;  %v7884_v31 = vcombine.low %v7619_v12, %v7623_v49 }
 0x276   : > { %6170 = vmatpush2.bf16.msra.mxu0 %v7772_v24  ;;  %v7487_v58 = vld [vmem:[%s10889_s1 + $0x12e8] sm:$0xff] }
 0x277   : > { %6171 = vmatprep.subr.bf16.mxu0 %v7765_v37  ;;  %v7611_v41 = vld [vmem:[%s10889_s1 + $0x16c8] sm:$0xff]  ;;  %v7749_v54 = vcombine.high %v7483_v62, %v7487_v58  ;;  %v7748_v28 = vcombine.low %v7483_v62, %v7487_v58 }
 0x278   : > { %6223 = vmatpush2.bf16.msra.mxu1 %v7900_v6  ;;  %v7615_v17 = vld [vmem:[%s10889_s1 + $0x16e8] sm:$0xff] }
 0x279   : > { %6224 = vmatprep.subr.bf16.mxu1 %v7893_v38  ;;  %v7877_v50 = vcombine.high %v7611_v41, %v7615_v17  ;;  %v7475_v63 = vld [vmem:[%s10889_s1 + $0x1288] sm:$0xff]  ;;  %v7876_v47 = vcombine.low %v7611_v41, %v7615_v17 }
 0x27a   : > { %6172 = vmatpush2.bf16.msra.mxu0 %v7764_v20  ;;  %v7479_v4 = vld [vmem:[%s10889_s1 + $0x12a8] sm:$0xff] }
 0x27b   : > { %6173 = vmatprep.subr.bf16.mxu0 %v7757_v2  ;;  %v7603_v45 = vld [vmem:[%s10889_s1 + $0x1688] sm:$0xff]  ;;  %v7741_v7 = vcombine.high %v7475_v63, %v7479_v4  ;;  %v7740_v57 = vcombine.low %v7475_v63, %v7479_v4  ;;  %v199_v63 = vsub.s32 4, %v10013_v23 }
 0x27c   : > { %6225 = vmatpush2.bf16.msra.mxu1 %v7892_v22  ;;  %v7607_v8 = vld [vmem:[%s10889_s1 + $0x16a8] sm:$0xff] }
 0x27d   : > { %6226 = vmatprep.subr.bf16.mxu1 %v7885_v44  ;;  %v7869_v3 = vcombine.high %v7603_v45, %v7607_v8  ;;  %v7467_v24 = vld [vmem:[%s10889_s1 + $0x1248] sm:$0xff]  ;;  %v7868_v36 = vcombine.low %v7603_v45, %v7607_v8 }
 0x27e   : > { %6174 = vmatpush2.bf16.msra.mxu0 %v7756_v39  ;;  %v7471_v6 = vld [vmem:[%s10889_s1 + $0x1268] sm:$0xff]  ;;  %v7452_v39 = vld [vmem:[%s10889_s1 + $0x11d0] sm:$0xff] }
 0x27f   : > { %6175 = vmatprep.subr.bf16.mxu0 %v7749_v54  ;;  %v7595_v37 = vld [vmem:[%s10889_s1 + $0x1648] sm:$0xff]  ;;  %v7733_v12 = vcombine.high %v7467_v24, %v7471_v6  ;;  %v7732_v62 = vcombine.low %v7467_v24, %v7471_v6  ;;  %v7580_v54 = vld [vmem:[%s10889_s1 + $0x15d0] sm:$0xff] }
 0x280   : > { %6227 = vmatpush2.bf16.msra.mxu1 %v7884_v31  ;;  %v7599_v38 = vld [vmem:[%s10889_s1 + $0x1668] sm:$0xff]  ;;  %v7456_v31 = vld [vmem:[%s10889_s1 + $0x11f0] sm:$0xff] }
 0x281   : > { %6228 = vmatprep.subr.bf16.mxu1 %v7877_v50  ;;  %v7861_v49 = vcombine.high %v7595_v37, %v7599_v38  ;;  %v7459_v20 = vld [vmem:[%s10889_s1 + $0x1208] sm:$0xff]  ;;  %v7860_v58 = vcombine.low %v7595_v37, %v7599_v38  ;;  %v7584_v50 = vld [vmem:[%s10889_s1 + $0x15f0] sm:$0xff]  ;;  %v7719_v8 = vcombine.high %v7452_v39, %v7456_v31  ;;  %v10331_v37 = vrot.slane %v10045_v56, %v199_v63 }
 0x282   : > { %6176 = vmatpush2.bf16.msra.mxu0 %v7748_v28  ;;  %v7463_v22 = vld [vmem:[%s10889_s1 + $0x1228] sm:$0xff]  ;;  %v7847_v28 = vcombine.high %v7580_v54, %v7584_v50  ;;  %v7572_v24 = vld [vmem:[%s10889_s1 + $0x1590] sm:$0xff]  ;;  %v7718_v38 = vcombine.low %v7452_v39, %v7456_v31 }
 0x283   : > { %6177 = vmatprep.subr.bf16.mxu0 %v7741_v7  ;;  %v7587_v2 = vld [vmem:[%s10889_s1 + $0x1608] sm:$0xff]  ;;  %v7725_v41 = vcombine.high %v7459_v20, %v7463_v22  ;;  %v7724_v4 = vcombine.low %v7459_v20, %v7463_v22  ;;  %v7448_v7 = vld [vmem:[%s10889_s1 + $0x11b0] sm:$0xff] }
 0x284   : > { %6229 = vmatpush2.bf16.msra.mxu1 %v7876_v47  ;;  %v7591_v44 = vld [vmem:[%s10889_s1 + $0x1628] sm:$0xff]  ;;  %v7444_v47 = vld [vmem:[%s10889_s1 + $0x1190] sm:$0xff] }
 0x285   : > { %6230 = vmatprep.subr.bf16.mxu1 %v7869_v3  ;;  %v7853_v17 = vcombine.high %v7587_v2, %v7591_v44  ;;  %v7852_v45 = vcombine.low %v7587_v2, %v7591_v44  ;;  %v203_v3 = vsub.s32 5, %v10013_v23  ;;  %v7576_v6 = vld [vmem:[%s10889_s1 + $0x15b0] sm:$0xff] }
 0x286   : > { %6178 = vmatpush2.bf16.msra.mxu0 %v7740_v57  ;;  %v7846_v57 = vcombine.low %v7580_v54, %v7584_v50  ;;  %v7440_v20 = vld [vmem:[%s10889_s1 + $0x1170] sm:$0xff]  ;;  %v7838_v54 = vcombine.low %v7572_v24, %v7576_v6 }
 0x287   : > { %6179 = vmatprep.subr.bf16.mxu0 %v7733_v12  ;;  %v7839_v12 = vcombine.high %v7572_v24, %v7576_v6  ;;  %v10340_v22 = vrot.slane %v10045_v56, %v203_v3  ;;  %v7564_v44 = vld [vmem:[%s10889_s1 + $0x1550] sm:$0xff]  ;;  %v2241_v6 = vadd.f32 %v9379_v51, %v10331_v37 }
 0x288   : > { %6231 = vmatpush2.bf16.msra.mxu1 %v7868_v36  ;;  %v7711_v36 = vcombine.high %v7444_v47, %v7448_v7  ;;  %v7556_v3 = vld [vmem:[%s10889_s1 + $0x1510] sm:$0xff] }
 0x289   : > { %6232 = vmatprep.subr.bf16.mxu1 %v7861_v49  ;;  %v7436_v49 = vld [vmem:[%s10889_s1 + $0x1150] sm:$0xff] }
 0x28a   : > { %6180 = vmatpush2.bf16.msra.mxu0 %v7732_v62  ;;  %v7568_v62 = vld [vmem:[%s10889_s1 + $0x1570] sm:$0xff]  ;;  %v7703_v50 = vcombine.high %v7436_v49, %v7440_v20 }
 0x28b   : > { %6181 = vmatprep.subr.bf16.mxu0 %v7725_v41  ;;  %v7560_v24 = vld [vmem:[%s10889_s1 + $0x1530] sm:$0xff] }
 0x28c   : > { %6233 = vmatpush2.bf16.msra.mxu1 %v7860_v58  ;;  %v2233_v58 = vadd.f32 %v9361_v34, %v10331_v37  ;;  %v7428_v34 = vld [vmem:[%s10889_s1 + $0x1110] sm:$0xff] }
 0x28d   : > { %6234 = vmatprep.subr.bf16.mxu1 %v7853_v17  ;;  %v7710_v17 = vcombine.low %v7444_v47, %v7448_v7  ;;  %v7424_v51 = vld [vmem:[%s10889_s1 + $0x10f0] sm:$0xff] }
 0x28e   : > { %6182 = vmatpush2.bf16.msra.mxu0 %v7724_v4  ;;  %v7831_v4 = vcombine.high %v7564_v44, %v7568_v62 }
 0x28f   : > { %6257 = vmatprep.subr.bf16.mxu0 %v7719_v8  ;;  %v2234_v8 = vadd.f32 %v9370_v43, %v10340_v22  ;;  %v7702_v43 = vcombine.low %v7436_v49, %v7440_v20  ;;  %v2242_v49 = vadd.f32 %v9387_v5, %v10340_v22 }
 0x290   : > { %6235 = vmatpush2.bf16.msra.mxu1 %v7852_v45  ;;  %v7432_v45 = vld [vmem:[%s10889_s1 + $0x1130] sm:$0xff] }
 0x291   : > { %6310 = vmatprep.subr.bf16.mxu1 %v7847_v28  ;;  %v4207_v2 = vpop.f32.mrf.mxu0  ;;  %6184 = vmatmul.mubr.bf16.vlgmr.msra.gmra.mxu0 %v10061_v55  ;;  %v7694_v5 = vcombine.low %v7428_v34, %v7432_v45 }
 0x292   : > { %6258 = vmatpush1.bf16.msra.mxu0 %v7718_v38  ;;  %6193 = vmatprep.mubr.bf16.mxu0 %v10085_v1 }
 0x293   : > { %v4260_v41 = vpop.f32.mrf.mxu1  ;;  %6237 = vmatmul.mubr.bf16.vlgmr.msra.gmra.mxu1 %v10075_v25  ;;  %v4209_v31 = vpop.f32.mrf.mxu0  ;;  %6259 = vmatprep.subr.bf16.mxu0 %v7711_v36 }
 0x294   : > { %v4261_v39 = vadd.f32 %v4260_v41, %v4207_v2  ;;  %6311 = vmatpush1.bf16.msra.mxu1 %v7846_v57  ;;  %6246 = vmatprep.mubr.bf16.mxu1 %v10097_v9  ;;  %v7830_v57 = vcombine.low %v7564_v44, %v7568_v62 }
 0x295   : > { %v4262_v63 = vpop.f32.mrf.mxu1  ;;  %6312 = vmatprep.subr.bf16.mxu1 %v7839_v12  ;;  %v4211_v7 = vpop.f32.mrf.mxu0 }
 0x296   : > { %v10361_v28 = vadd.f32 %v4261_v39, %v2233_v58  ;;  %v4263_v47 = vadd.f32 %v4262_v63, %v4209_v31  ;;  %6260 = vmatpush1.bf16.msra.mxu0 %v7710_v17  ;;  %v7695_v58 = vcombine.high %v7428_v34, %v7432_v45  ;;  %v7823_v39 = vcombine.high %v7556_v3, %v7560_v24  ;;  %v7420_v31 = vld [vmem:[%s10889_s1 + $0x10d0] sm:$0xff] }
 0x297   : > { %v4264_v38 = vpop.f32.mrf.mxu1  ;;  %v4213_v2 = vpop.f32.mrf.mxu0  ;;  %6261 = vmatprep.subr.bf16.mxu0 %v7703_v50  ;;  %v7548_v17 = vld [vmem:[%s10889_s1 + $0x14d0] sm:$0xff]  ;;  %v2249_v50 = vadd.f32 %v9397_v19, %v10331_v37  ;;  %v2250_v34 = vadd.f32 %v9412_v59, %v10340_v22  ;;  %v7686_v59 = vcombine.low %v7420_v31, %v7424_v51 }
 0x298   : > { %v10372_v36 = vadd.f32 %v4263_v47, %v2234_v8  ;;  %v4265_v12 = vadd.f32 %v4264_v38, %v4211_v7  ;;  %6313 = vmatpush1.bf16.msra.mxu1 %v7838_v54  ;;  %v7552_v54 = vld [vmem:[%s10889_s1 + $0x14f0] sm:$0xff] }
 0x299   : > { %v4266_v41 = vpop.f32.mrf.mxu1  ;;  %6314 = vmatprep.subr.bf16.mxu1 %v7831_v4  ;;  %v4217_v62 = vpop.f32.mrf.mxu0  ;;  %6194 = vmatmul.mubr.bf16.gmra.mxu0 %v10120_v52  ;;  %v7822_v4 = vcombine.low %v7556_v3, %v7560_v24  ;;  %v7412_v19 = vld [vmem:[%s10889_s1 + $0x1090] sm:$0xff] }
 0x29a   : > { %v10382_v20 = vadd.f32 %v4265_v12, %v2241_v6  ;;  %v4267_v44 = vadd.f32 %v4266_v41, %v4213_v2  ;;  %6262 = vmatpush1.bf16.msra.mxu0 %v7702_v43  ;;  %v7687_v6 = vcombine.high %v7420_v31, %v7424_v51  ;;  %v7815_v12 = vcombine.high %v7548_v17, %v7552_v54  ;;  %v7416_v43 = vld [vmem:[%s10889_s1 + $0x10b0] sm:$0xff] }
 0x29b   : > { %v4270_v63 = vpop.f32.mrf.mxu1  ;;  %6247 = vmatmul.mubr.bf16.gmra.mxu1 %v10130_v26  ;;  %v4219_v7 = vpop.f32.mrf.mxu0  ;;  %6263 = vmatprep.subr.bf16.mxu0 %v7695_v58  ;;  %v7544_v2 = vld [vmem:[%s10889_s1 + $0x14b0] sm:$0xff]  ;;  %v2257_v58 = vadd.f32 %v9415_v42, %v10331_v37  ;;  %v2258_v37 = vadd.f32 %v9429_v53, %v10340_v22 }
 0x29c   : > { %v10394_v8 = vadd.f32 %v4267_v44, %v2242_v49  ;;  %v4271_v47 = vadd.f32 %v4270_v63, %v4217_v62  ;;  %6315 = vmatpush1.bf16.msra.mxu1 %v7830_v57  ;;  %6289 = vmatprep.mubr.bf16.mxu0 %v9845_v30  ;;  %v7540_v57 = vld [vmem:[%s10889_s1 + $0x1490] sm:$0xff] }
 0x29d   : > { %v4272_v38 = vpop.f32.mrf.mxu1  ;;  %6316 = vmatprep.subr.bf16.mxu1 %v7823_v39  ;;  %v4221_v24 = vpop.f32.mrf.mxu0  ;;  %6342 = vmatprep.mubr.bf16.mxu1 %v9856_v35  ;;  %v7814_v39 = vcombine.low %v7548_v17, %v7552_v54  ;;  %v7408_v42 = vld [vmem:[%s10889_s1 + $0x1070] sm:$0xff] }
 0x29e   : > { %v10405_v45 = vadd.f32 %v4271_v47, %v2249_v50  ;;  %v4273_v3 = vadd.f32 %v4272_v38, %v4219_v7  ;;  %6264 = vmatpush1.bf16.msra.mxu0 %v7694_v5  ;;  %v7679_v50 = vcombine.high %v7412_v19, %v7416_v43  ;;  %v7807_v47 = vcombine.high %v7540_v57, %v7544_v2  ;;  %v7404_v7 = vld [vmem:[%s10889_s1 + $0x1050] sm:$0xff] }
 0x29f   : > { %v4274_v41 = vpop.f32.mrf.mxu1  ;;  %v4223_v62 = vpop.f32.mrf.mxu0  ;;  %6265 = vmatprep.subr.bf16.mxu0 %v7687_v6  ;;  %v7532_v17 = vld [vmem:[%s10889_s1 + $0x1450] sm:$0xff]  ;;  %v7678_v5 = vcombine.low %v7412_v19, %v7416_v43  ;;  %v7806_v6 = vcombine.low %v7540_v57, %v7544_v2  ;;  %v7671_v38 = vcombine.high %v7404_v7, %v7408_v42 }
 0x2a0   : > { %v10416_v49 = vadd.f32 %v4273_v3, %v2250_v34  ;;  %v4275_v44 = vadd.f32 %v4274_v41, %v4221_v24  ;;  %6317 = vmatpush1.bf16.msra.mxu1 %v7822_v4  ;;  %v7536_v54 = vld [vmem:[%s10889_s1 + $0x1470] sm:$0xff]  ;;  %v7670_v34 = vcombine.low %v7404_v7, %v7408_v42 }
 0x2a1   : > { %v4276_v63 = vpop.f32.mrf.mxu1  ;;  %6318 = vmatprep.subr.bf16.mxu1 %v7815_v12  ;;  %v7799_v53 = vcombine.high %v7532_v17, %v7536_v54  ;;  %v7396_v22 = vld [vmem:[%s10889_s1 + $0x1010] sm:$0xff]  ;;  %v7798_v3 = vcombine.low %v7532_v17, %v7536_v54 }
 0x2a2   : > { %v10426_v31 = vadd.f32 %v4275_v44, %v2257_v58  ;;  %v4277_v51 = vadd.f32 %v4276_v63, %v4223_v62  ;;  %6266 = vmatpush1.bf16.msra.mxu0 %v7686_v59  ;;  %v7400_v12 = vld [vmem:[%s10889_s1 + $0x1030] sm:$0xff] }
 0x2a3   : > { %6267 = vmatprep.subr.bf16.mxu0 %v7679_v50  ;;  %v7524_v19 = vld [vmem:[%s10889_s1 + $0x1410] sm:$0xff]  ;;  %v7663_v24 = vcombine.high %v7396_v22, %v7400_v12 }
 0x2a4   : > { %v10434_v4 = vadd.f32 %v4277_v51, %v2258_v37  ;;  %6319 = vmatpush1.bf16.msra.mxu1 %v7814_v39  ;;  %v7528_v43 = vld [vmem:[%s10889_s1 + $0x1430] sm:$0xff]  ;;  %v7662_v39 = vcombine.low %v7396_v22, %v7400_v12 }
 0x2a5   : > { %6320 = vmatprep.subr.bf16.mxu1 %v7807_v47  ;;  %v7791_v57 = vcombine.high %v7524_v19, %v7528_v43  ;;  %v7516_v2 = vld [vmem:[%s10889_s1 + $0x13d0] sm:$0xff]  ;;  %v7790_v44 = vcombine.low %v7524_v19, %v7528_v43 }
 0x2a6   : > { %6268 = vmatpush1.bf16.msra.mxu0 %v7678_v5  ;;  %v7520_v58 = vld [vmem:[%s10889_s1 + $0x13f0] sm:$0xff] }
 0x2a7   : > { %6269 = vmatprep.subr.bf16.mxu0 %v7671_v38  ;;  %v7644_v41 = vld [vmem:[%s10889_s1 + $0x17d0] sm:$0xff]  ;;  %v7783_v62 = vcombine.high %v7516_v2, %v7520_v58  ;;  %v7782_v37 = vcombine.low %v7516_v2, %v7520_v58 }
 0x2a8   : > { %6321 = vmatpush1.bf16.msra.mxu1 %v7806_v6  ;;  %v7648_v59 = vld [vmem:[%s10889_s1 + $0x17f0] sm:$0xff] }
 0x2a9   : > { %6322 = vmatprep.subr.bf16.mxu1 %v7799_v53  ;;  %v7911_v50 = vcombine.high %v7644_v41, %v7648_v59  ;;  %v7508_v63 = vld [vmem:[%s10889_s1 + $0x1390] sm:$0xff]  ;;  %v7910_v51 = vcombine.low %v7644_v41, %v7648_v59 }
 0x2aa   : > { %6270 = vmatpush1.bf16.msra.mxu0 %v7670_v34  ;;  %v7512_v47 = vld [vmem:[%s10889_s1 + $0x13b0] sm:$0xff] }
 0x2ab   : > { %6271 = vmatprep.subr.bf16.mxu0 %v7663_v24  ;;  %v7636_v7 = vld [vmem:[%s10889_s1 + $0x1790] sm:$0xff]  ;;  %v7775_v17 = vcombine.high %v7508_v63, %v7512_v47  ;;  %v7774_v22 = vcombine.low %v7508_v63, %v7512_v47 }
 0x2ac   : > { %6323 = vmatpush1.bf16.msra.mxu1 %v7798_v3  ;;  %v7640_v42 = vld [vmem:[%s10889_s1 + $0x17b0] sm:$0xff] }
 0x2ad   : > { %6324 = vmatprep.subr.bf16.mxu1 %v7791_v57  ;;  %v7903_v54 = vcombine.high %v7636_v7, %v7640_v42  ;;  %v7500_v5 = vld [vmem:[%s10889_s1 + $0x1350] sm:$0xff]  ;;  %v7902_v12 = vcombine.low %v7636_v7, %v7640_v42 }
 0x2ae   : > { %6272 = vmatpush1.bf16.msra.mxu0 %v7662_v39  ;;  %v7504_v6 = vld [vmem:[%s10889_s1 + $0x1370] sm:$0xff] }
 0x2af   : > { %6273 = vmatprep.subr.bf16.mxu0 %v7783_v62  ;;  %v7628_v38 = vld [vmem:[%s10889_s1 + $0x1750] sm:$0xff]  ;;  %v7767_v19 = vcombine.high %v7500_v5, %v7504_v6  ;;  %v7766_v2 = vcombine.low %v7500_v5, %v7504_v6 }
 0x2b0   : > { %6325 = vmatpush1.bf16.msra.mxu1 %v7790_v44  ;;  %v7632_v53 = vld [vmem:[%s10889_s1 + $0x1770] sm:$0xff] }
 0x2b1   : > { %6326 = vmatprep.subr.bf16.mxu1 %v7911_v50  ;;  %v7895_v43 = vcombine.high %v7628_v38, %v7632_v53  ;;  %v7492_v34 = vld [vmem:[%s10889_s1 + $0x1310] sm:$0xff]  ;;  %v7894_v58 = vcombine.low %v7628_v38, %v7632_v53 }
 0x2b2   : > { %6274 = vmatpush2.bf16.msra.mxu0 %v7782_v37  ;;  %v7496_v3 = vld [vmem:[%s10889_s1 + $0x1330] sm:$0xff] }
 0x2b3   : > { %6275 = vmatprep.subr.bf16.mxu0 %v7775_v17  ;;  %v7620_v24 = vld [vmem:[%s10889_s1 + $0x1710] sm:$0xff]  ;;  %v7759_v41 = vcombine.high %v7492_v34, %v7496_v3  ;;  %v7758_v63 = vcombine.low %v7492_v34, %v7496_v3 }
 0x2b4   : > { %6327 = vmatpush2.bf16.msra.mxu1 %v7910_v51  ;;  %v7624_v57 = vld [vmem:[%s10889_s1 + $0x1730] sm:$0xff] }
 0x2b5   : > { %6328 = vmatprep.subr.bf16.mxu1 %v7903_v54  ;;  %v7887_v59 = vcombine.high %v7620_v24, %v7624_v57  ;;  %v7484_v39 = vld [vmem:[%s10889_s1 + $0x12d0] sm:$0xff]  ;;  %v7886_v47 = vcombine.low %v7620_v24, %v7624_v57 }
 0x2b6   : > { %6276 = vmatpush2.bf16.msra.mxu0 %v7774_v22  ;;  %v7488_v44 = vld [vmem:[%s10889_s1 + $0x12f0] sm:$0xff] }
 0x2b7   : > { %6277 = vmatprep.subr.bf16.mxu0 %v7767_v19  ;;  %v7612_v62 = vld [vmem:[%s10889_s1 + $0x16d0] sm:$0xff]  ;;  %v7751_v7 = vcombine.high %v7484_v39, %v7488_v44  ;;  %v7750_v5 = vcombine.low %v7484_v39, %v7488_v44 }
 0x2b8   : > { %6329 = vmatpush2.bf16.msra.mxu1 %v7902_v12  ;;  %v7616_v50 = vld [vmem:[%s10889_s1 + $0x16f0] sm:$0xff] }
 0x2b9   : > { %6330 = vmatprep.subr.bf16.mxu1 %v7895_v43  ;;  %v7879_v42 = vcombine.high %v7612_v62, %v7616_v50  ;;  %v7476_v37 = vld [vmem:[%s10889_s1 + $0x1290] sm:$0xff]  ;;  %v7878_v6 = vcombine.low %v7612_v62, %v7616_v50 }
 0x2ba   : > { %6278 = vmatpush2.bf16.msra.mxu0 %v7766_v2  ;;  %v7480_v51 = vld [vmem:[%s10889_s1 + $0x12b0] sm:$0xff] }
 0x2bb   : > { %6279 = vmatprep.subr.bf16.mxu0 %v7759_v41  ;;  %v7604_v17 = vld [vmem:[%s10889_s1 + $0x1690] sm:$0xff]  ;;  %v7743_v38 = vcombine.high %v7476_v37, %v7480_v51  ;;  %v7742_v34 = vcombine.low %v7476_v37, %v7480_v51  ;;  %v207_v37 = vsub.s32 6, %v10013_v23 }
 0x2bc   : > { %6331 = vmatpush2.bf16.msra.mxu1 %v7894_v58  ;;  %v7608_v54 = vld [vmem:[%s10889_s1 + $0x16b0] sm:$0xff] }
 0x2bd   : > { %6332 = vmatprep.subr.bf16.mxu1 %v7887_v59  ;;  %v7871_v53 = vcombine.high %v7604_v17, %v7608_v54  ;;  %v7468_v22 = vld [vmem:[%s10889_s1 + $0x1250] sm:$0xff]  ;;  %v7870_v3 = vcombine.low %v7604_v17, %v7608_v54 }
 0x2be   : > { %6280 = vmatpush2.bf16.msra.mxu0 %v7758_v63  ;;  %v7472_v12 = vld [vmem:[%s10889_s1 + $0x1270] sm:$0xff]  ;;  %v7453_v63 = vld [vmem:[%s10889_s1 + $0x11d8] sm:$0xff] }
 0x2bf   : > { %6281 = vmatprep.subr.bf16.mxu0 %v7751_v7  ;;  %v7596_v19 = vld [vmem:[%s10889_s1 + $0x1650] sm:$0xff]  ;;  %v7735_v24 = vcombine.high %v7468_v22, %v7472_v12  ;;  %v7734_v39 = vcombine.low %v7468_v22, %v7472_v12  ;;  %v7581_v7 = vld [vmem:[%s10889_s1 + $0x15d8] sm:$0xff] }
 0x2c0   : > { %6333 = vmatpush2.bf16.msra.mxu1 %v7886_v47  ;;  %v7600_v43 = vld [vmem:[%s10889_s1 + $0x1670] sm:$0xff]  ;;  %v7457_v47 = vld [vmem:[%s10889_s1 + $0x11f8] sm:$0xff] }
 0x2c1   : > { %6334 = vmatprep.subr.bf16.mxu1 %v7879_v42  ;;  %v7863_v57 = vcombine.high %v7596_v19, %v7600_v43  ;;  %v7460_v2 = vld [vmem:[%s10889_s1 + $0x1210] sm:$0xff]  ;;  %v7862_v44 = vcombine.low %v7596_v19, %v7600_v43  ;;  %v7585_v42 = vld [vmem:[%s10889_s1 + $0x15f8] sm:$0xff]  ;;  %v7721_v54 = vcombine.high %v7453_v63, %v7457_v47  ;;  %v10571_v19 = vrot.slane %v10045_v56, %v207_v37  ;;  %v10582_v56 = vld [vmem:[%s10890_s2] sm:$0xff] }
 0x2c2   : > { %6282 = vmatpush2.bf16.msra.mxu0 %v7750_v5  ;;  %v7464_v58 = vld [vmem:[%s10889_s1 + $0x1230] sm:$0xff]  ;;  %v7849_v5 = vcombine.high %v7581_v7, %v7585_v42  ;;  %v7573_v22 = vld [vmem:[%s10889_s1 + $0x1598] sm:$0xff]  ;;  %v7720_v43 = vcombine.low %v7453_v63, %v7457_v47 }
 0x2c3   : > { %6283 = vmatprep.subr.bf16.mxu0 %v7743_v38  ;;  %v7588_v41 = vld [vmem:[%s10889_s1 + $0x1610] sm:$0xff]  ;;  %v7727_v62 = vcombine.high %v7460_v2, %v7464_v58  ;;  %v7726_v51 = vcombine.low %v7460_v2, %v7464_v58  ;;  %v7449_v38 = vld [vmem:[%s10889_s1 + $0x11b8] sm:$0xff] }
 0x2c4   : > { %6335 = vmatpush2.bf16.msra.mxu1 %v7878_v6  ;;  %v7592_v59 = vld [vmem:[%s10889_s1 + $0x1630] sm:$0xff]  ;;  %v7445_v6 = vld [vmem:[%s10889_s1 + $0x1198] sm:$0xff] }
 0x2c5   : > { %6336 = vmatprep.subr.bf16.mxu1 %v7871_v53  ;;  %v7855_v50 = vcombine.high %v7588_v41, %v7592_v59  ;;  %v7854_v17 = vcombine.low %v7588_v41, %v7592_v59  ;;  %v211_v53 = vsub.s32 7, %v10013_v23  ;;  %v7577_v12 = vld [vmem:[%s10889_s1 + $0x15b8] sm:$0xff] }
 0x2c6   : > { %6284 = vmatpush2.bf16.msra.mxu0 %v7742_v34  ;;  %v7848_v34 = vcombine.low %v7581_v7, %v7585_v42  ;;  %v7441_v2 = vld [vmem:[%s10889_s1 + $0x1178] sm:$0xff]  ;;  %v7840_v7 = vcombine.low %v7573_v22, %v7577_v12 }
 0x2c7   : > { %6285 = vmatprep.subr.bf16.mxu0 %v7735_v24  ;;  %v7841_v24 = vcombine.high %v7573_v22, %v7577_v12  ;;  %v10585_v58 = vrot.slane %v10582_v56, %v211_v53  ;;  %v7565_v59 = vld [vmem:[%s10889_s1 + $0x1558] sm:$0xff]  ;;  %v2243_v12 = vadd.f32 %v9595_v29, %v10571_v19 }
 0x2c8   : > { %6337 = vmatpush2.bf16.msra.mxu1 %v7870_v3  ;;  %v7713_v3 = vcombine.high %v7445_v6, %v7449_v38  ;;  %v7557_v53 = vld [vmem:[%s10889_s1 + $0x1518] sm:$0xff] }
 0x2c9   : > { %6338 = vmatprep.subr.bf16.mxu1 %v7863_v57  ;;  %v7437_v57 = vld [vmem:[%s10889_s1 + $0x1158] sm:$0xff] }
 0x2ca   : > { %6286 = vmatpush2.bf16.msra.mxu0 %v7734_v39  ;;  %v7569_v39 = vld [vmem:[%s10889_s1 + $0x1578] sm:$0xff]  ;;  %v7705_v42 = vcombine.high %v7437_v57, %v7441_v2 }
 0x2cb   : > { %6287 = vmatprep.subr.bf16.mxu0 %v7727_v62  ;;  %v7561_v22 = vld [vmem:[%s10889_s1 + $0x1538] sm:$0xff] }
 0x2cc   : > { %6339 = vmatpush2.bf16.msra.mxu1 %v7862_v44  ;;  %v2235_v44 = vadd.f32 %v9577_v0, %v10571_v19  ;;  %v7429_v0 = vld [vmem:[%s10889_s1 + $0x1118] sm:$0xff] }
 0x2cd   : > { %6340 = vmatprep.subr.bf16.mxu1 %v7855_v50  ;;  %v7712_v50 = vcombine.low %v7445_v6, %v7449_v38  ;;  %v7425_v29 = vld [vmem:[%s10889_s1 + $0x10f8] sm:$0xff] }
 0x2ce   : > { %6288 = vmatpush2.bf16.msra.mxu0 %v7726_v51  ;;  %v7833_v51 = vcombine.high %v7565_v59, %v7569_v39 }
 0x2cf   : > { %6363 = vmatprep.subr.bf16.mxu0 %v7721_v54  ;;  %v2236_v54 = vadd.f32 %v9586_v16, %v10585_v58  ;;  %v7704_v16 = vcombine.low %v7437_v57, %v7441_v2  ;;  %v2244_v57 = vadd.f32 %v9603_v18, %v10585_v58 }
 0x2d0   : > { %6341 = vmatpush2.bf16.msra.mxu1 %v7854_v17  ;;  %v7433_v17 = vld [vmem:[%s10889_s1 + $0x1138] sm:$0xff] }
 0x2d1   : > { %6416 = vmatprep.subr.bf16.mxu1 %v7849_v5  ;;  %v4313_v41 = vpop.f32.mrf.mxu0  ;;  %6290 = vmatmul.mubr.bf16.vlgmr.msra.gmra.mxu0 %v10061_v55  ;;  %v7696_v18 = vcombine.low %v7429_v0, %v7433_v17 }
 0x2d2   : > { %6364 = vmatpush1.bf16.msra.mxu0 %v7720_v43  ;;  %6299 = vmatprep.mubr.bf16.mxu0 %v10085_v1 }
 0x2d3   : > { %v4366_v62 = vpop.f32.mrf.mxu1  ;;  %6343 = vmatmul.mubr.bf16.vlgmr.msra.gmra.mxu1 %v10075_v25  ;;  %v4315_v47 = vpop.f32.mrf.mxu0  ;;  %6365 = vmatprep.subr.bf16.mxu0 %v7713_v3 }
 0x2d4   : > { %v4367_v63 = vadd.f32 %v4366_v62, %v4313_v41  ;;  %6417 = vmatpush1.bf16.msra.mxu1 %v7848_v34  ;;  %6352 = vmatprep.mubr.bf16.mxu1 %v10097_v9  ;;  %v7832_v34 = vcombine.low %v7565_v59, %v7569_v39 }
 0x2d5   : > { %v4368_v37 = vpop.f32.mrf.mxu1  ;;  %6418 = vmatprep.subr.bf16.mxu1 %v7841_v24  ;;  %v4317_v38 = vpop.f32.mrf.mxu0 }
 0x2d6   : > { %v10606_v5 = vadd.f32 %v4367_v63, %v2235_v44  ;;  %v4369_v6 = vadd.f32 %v4368_v37, %v4315_v47  ;;  %6366 = vmatpush1.bf16.msra.mxu0 %v7712_v50  ;;  %v7697_v44 = vcombine.high %v7429_v0, %v7433_v17  ;;  %v7825_v63 = vcombine.high %v7557_v53, %v7561_v22  ;;  %v7421_v47 = vld [vmem:[%s10889_s1 + $0x10d8] sm:$0xff] }
 0x2d7   : > { %v4370_v43 = vpop.f32.mrf.mxu1  ;;  %v4319_v41 = vpop.f32.mrf.mxu0  ;;  %6367 = vmatprep.subr.bf16.mxu0 %v7705_v42  ;;  %v7549_v50 = vld [vmem:[%s10889_s1 + $0x14d8] sm:$0xff]  ;;  %v2251_v42 = vadd.f32 %v9613_v61, %v10571_v19  ;;  %v2252_v0 = vadd.f32 %v9628_v13, %v10585_v58  ;;  %v7688_v13 = vcombine.low %v7421_v47, %v7425_v29 }
 0x2d8   : > { %v10617_v3 = vadd.f32 %v4369_v6, %v2236_v54  ;;  %v4371_v24 = vadd.f32 %v4370_v43, %v4317_v38  ;;  %6419 = vmatpush1.bf16.msra.mxu1 %v7840_v7  ;;  %v7553_v7 = vld [vmem:[%s10889_s1 + $0x14f8] sm:$0xff] }
 0x2d9   : > { %v4372_v62 = vpop.f32.mrf.mxu1  ;;  %6420 = vmatprep.subr.bf16.mxu1 %v7833_v51  ;;  %v4323_v39 = vpop.f32.mrf.mxu0  ;;  %6300 = vmatmul.mubr.bf16.gmra.mxu0 %v10120_v52  ;;  %v7824_v51 = vcombine.low %v7557_v53, %v7561_v22  ;;  %v7413_v61 = vld [vmem:[%s10889_s1 + $0x1098] sm:$0xff] }
 0x2da   : > { %v10627_v2 = vadd.f32 %v4371_v24, %v2243_v12  ;;  %v4373_v59 = vadd.f32 %v4372_v62, %v4319_v41  ;;  %6368 = vmatpush1.bf16.msra.mxu0 %v7704_v16  ;;  %v7689_v12 = vcombine.high %v7421_v47, %v7425_v29  ;;  %v7817_v24 = vcombine.high %v7549_v50, %v7553_v7  ;;  %v7417_v16 = vld [vmem:[%s10889_s1 + $0x10b8] sm:$0xff] }
 0x2db   : > { %v4376_v37 = vpop.f32.mrf.mxu1  ;;  %6353 = vmatmul.mubr.bf16.gmra.mxu1 %v10130_v26  ;;  %v4325_v38 = vpop.f32.mrf.mxu0  ;;  %6369 = vmatprep.subr.bf16.mxu0 %v7697_v44  ;;  %v7545_v41 = vld [vmem:[%s10889_s1 + $0x14b8] sm:$0xff]  ;;  %v7816_v62 = vcombine.low %v7549_v50, %v7553_v7 }
 0x2dc   : > { %v10639_v54 = vadd.f32 %v4373_v59, %v2244_v57  ;;  %v4377_v6 = vadd.f32 %v4376_v37, %v4323_v39  ;;  %6421 = vmatpush1.bf16.msra.mxu1 %v7832_v34  ;;  %6395 = vmatprep.mubr.bf16.mxu0 %v9845_v30  ;;  %v7541_v34 = vld [vmem:[%s10889_s1 + $0x1498] sm:$0xff]  ;;  %v2259_v30 = vadd.f32 %v9631_v27, %v10571_v19 }
 0x2dd   : > { %v4378_v43 = vpop.f32.mrf.mxu1  ;;  %6422 = vmatprep.subr.bf16.mxu1 %v7825_v63  ;;  %v4327_v22 = vpop.f32.mrf.mxu0  ;;  %6448 = vmatprep.mubr.bf16.mxu1 %v9856_v35  ;;  %v7681_v39 = vcombine.high %v7413_v61, %v7417_v16  ;;  %v7809_v37 = vcombine.high %v7541_v34, %v7545_v41  ;;  %v7405_v35 = vld [vmem:[%s10889_s1 + $0x1058] sm:$0xff]  ;;  %v2260_v19 = vadd.f32 %v9645_v40, %v10585_v58 }
 0x2de   : > { %v10650_v17 = vadd.f32 %v4377_v6, %v2251_v42  ;;  %v4379_v53 = vadd.f32 %v4378_v43, %v4325_v38  ;;  %6370 = vmatpush1.bf16.msra.mxu0 %v7696_v18  ;;  %v7409_v27 = vld [vmem:[%s10889_s1 + $0x1078] sm:$0xff]  ;;  %v7680_v18 = vcombine.low %v7413_v61, %v7417_v16  ;;  %v7808_v6 = vcombine.low %v7541_v34, %v7545_v41 }
 0x2df   : > { %v4380_v44 = vpop.f32.mrf.mxu1  ;;  %v4329_v59 = vpop.f32.mrf.mxu0  ;;  %6371 = vmatprep.subr.bf16.mxu0 %v7689_v12  ;;  %v7533_v50 = vld [vmem:[%s10889_s1 + $0x1458] sm:$0xff]  ;;  %v7673_v38 = vcombine.high %v7405_v35, %v7409_v27  ;;  %v7672_v61 = vcombine.low %v7405_v35, %v7409_v27 }
 0x2e0   : > { %v10661_v63 = vadd.f32 %v4379_v53, %v2252_v0  ;;  %v4381_v57 = vadd.f32 %v4380_v44, %v4327_v22  ;;  %6423 = vmatpush1.bf16.msra.mxu1 %v7824_v51  ;;  %v7537_v7 = vld [vmem:[%s10889_s1 + $0x1478] sm:$0xff] }
 0x2e1   : > { %v4382_v42 = vpop.f32.mrf.mxu1  ;;  %6424 = vmatprep.subr.bf16.mxu1 %v7817_v24  ;;  %v7801_v40 = vcombine.high %v7533_v50, %v7537_v7  ;;  %v7397_v58 = vld [vmem:[%s10889_s1 + $0x1018] sm:$0xff]  ;;  %v7800_v16 = vcombine.low %v7533_v50, %v7537_v7 }
 0x2e2   : > { %v10671_v47 = vadd.f32 %v4381_v57, %v2259_v30  ;;  %v4383_v29 = vadd.f32 %v4382_v42, %v4329_v59  ;;  %6372 = vmatpush1.bf16.msra.mxu0 %v7688_v13  ;;  %v7401_v12 = vld [vmem:[%s10889_s1 + $0x1038] sm:$0xff] }
 0x2e3   : > { %6373 = vmatprep.subr.bf16.mxu0 %v7681_v39  ;;  %v7525_v43 = vld [vmem:[%s10889_s1 + $0x1418] sm:$0xff]  ;;  %v7665_v0 = vcombine.high %v7397_v58, %v7401_v12  ;;  %v7664_v44 = vcombine.low %v7397_v58, %v7401_v12 }
 0x2e4   : > { %v10679_v51 = vadd.f32 %v4383_v29, %v2260_v19  ;;  %6425 = vmatpush1.bf16.msra.mxu1 %v7816_v62  ;;  %v7529_v24 = vld [vmem:[%s10889_s1 + $0x1438] sm:$0xff] }
 0x2e5   : > { %6426 = vmatprep.subr.bf16.mxu1 %v7809_v37  ;;  %v7793_v53 = vcombine.high %v7525_v43, %v7529_v24  ;;  %v7517_v22 = vld [vmem:[%s10889_s1 + $0x13d8] sm:$0xff]  ;;  %v7792_v13 = vcombine.low %v7525_v43, %v7529_v24 }
 0x2e6   : > { %6374 = vmatpush1.bf16.msra.mxu0 %v7680_v18  ;;  %v7521_v34 = vld [vmem:[%s10889_s1 + $0x13f8] sm:$0xff] }
 0x2e7   : > { %6375 = vmatprep.subr.bf16.mxu0 %v7673_v38  ;;  %v7645_v41 = vld [vmem:[%s10889_s1 + $0x17d8] sm:$0xff]  ;;  %v7785_v62 = vcombine.high %v7517_v22, %v7521_v34  ;;  %v7784_v35 = vcombine.low %v7517_v22, %v7521_v34 }
 0x2e8   : > { %6427 = vmatpush1.bf16.msra.mxu1 %v7808_v6  ;;  %v7649_v30 = vld [vmem:[%s10889_s1 + $0x17f8] sm:$0xff] }
 0x2e9   : > { %6428 = vmatprep.subr.bf16.mxu1 %v7801_v40  ;;  %v7913_v57 = vcombine.high %v7645_v41, %v7649_v30  ;;  %v7509_v59 = vld [vmem:[%s10889_s1 + $0x1398] sm:$0xff]  ;;  %v7912_v27 = vcombine.low %v7645_v41, %v7649_v30 }
 0x2ea   : > { %6376 = vmatpush1.bf16.msra.mxu0 %v7672_v61  ;;  %v7513_v39 = vld [vmem:[%s10889_s1 + $0x13b8] sm:$0xff] }
 0x2eb   : > { %6377 = vmatprep.subr.bf16.mxu0 %v7665_v0  ;;  %v7637_v42 = vld [vmem:[%s10889_s1 + $0x1798] sm:$0xff]  ;;  %v7777_v19 = vcombine.high %v7509_v59, %v7513_v39  ;;  %v7776_v38 = vcombine.low %v7509_v59, %v7513_v39 }
 0x2ec   : > { %6429 = vmatpush1.bf16.msra.mxu1 %v7800_v16  ;;  %v7641_v37 = vld [vmem:[%s10889_s1 + $0x17b8] sm:$0xff] }
 0x2ed   : > { %6430 = vmatprep.subr.bf16.mxu1 %v7793_v53  ;;  %v7905_v29 = vcombine.high %v7637_v42, %v7641_v37  ;;  %v7501_v50 = vld [vmem:[%s10889_s1 + $0x1358] sm:$0xff]  ;;  %v7904_v40 = vcombine.low %v7637_v42, %v7641_v37 }
 0x2ee   : > { %6378 = vmatpush1.bf16.msra.mxu0 %v7664_v44  ;;  %v7505_v7 = vld [vmem:[%s10889_s1 + $0x1378] sm:$0xff] }
 0x2ef   : > { %6379 = vmatprep.subr.bf16.mxu0 %v7785_v62  ;;  %v7629_v18 = vld [vmem:[%s10889_s1 + $0x1758] sm:$0xff]  ;;  %v7769_v58 = vcombine.high %v7501_v50, %v7505_v7  ;;  %v7768_v0 = vcombine.low %v7501_v50, %v7505_v7 }
 0x2f0   : > { %6431 = vmatpush1.bf16.msra.mxu1 %v7792_v13  ;;  %v7633_v6 = vld [vmem:[%s10889_s1 + $0x1778] sm:$0xff] }
 0x2f1   : > { %6432 = vmatprep.subr.bf16.mxu1 %v7913_v57  ;;  %v7897_v12 = vcombine.high %v7629_v18, %v7633_v6  ;;  %v7493_v43 = vld [vmem:[%s10889_s1 + $0x1318] sm:$0xff]  ;;  %v7896_v53 = vcombine.low %v7629_v18, %v7633_v6 }
 0x2f2   : > { %6380 = vmatpush2.bf16.msra.mxu0 %v7784_v35  ;;  %v7497_v24 = vld [vmem:[%s10889_s1 + $0x1338] sm:$0xff] }
 0x2f3   : > { %6381 = vmatprep.subr.bf16.mxu0 %v7777_v19  ;;  %v7621_v61 = vld [vmem:[%s10889_s1 + $0x1718] sm:$0xff]  ;;  %v7761_v22 = vcombine.high %v7493_v43, %v7497_v24  ;;  %v7760_v62 = vcombine.low %v7493_v43, %v7497_v24 }
 0x2f4   : > { %6433 = vmatpush2.bf16.msra.mxu1 %v7912_v27  ;;  %v7625_v16 = vld [vmem:[%s10889_s1 + $0x1738] sm:$0xff] }
 0x2f5   : > { %6434 = vmatprep.subr.bf16.mxu1 %v7905_v29  ;;  %v7889_v34 = vcombine.high %v7621_v61, %v7625_v16  ;;  %v7485_v41 = vld [vmem:[%s10889_s1 + $0x12d8] sm:$0xff]  ;;  %v7888_v57 = vcombine.low %v7621_v61, %v7625_v16 }
 0x2f6   : > { %6382 = vmatpush2.bf16.msra.mxu0 %v7776_v38  ;;  %v7489_v30 = vld [vmem:[%s10889_s1 + $0x12f8] sm:$0xff] }
 0x2f7   : > { %6383 = vmatprep.subr.bf16.mxu0 %v7769_v58  ;;  %v7613_v44 = vld [vmem:[%s10889_s1 + $0x16d8] sm:$0xff]  ;;  %v7753_v59 = vcombine.high %v7485_v41, %v7489_v30  ;;  %v7752_v19 = vcombine.low %v7485_v41, %v7489_v30 }
 0x2f8   : > { %6435 = vmatpush2.bf16.msra.mxu1 %v7904_v40  ;;  %v7617_v13 = vld [vmem:[%s10889_s1 + $0x16f8] sm:$0xff] }
 0x2f9   : > { %6436 = vmatprep.subr.bf16.mxu1 %v7897_v12  ;;  %v7881_v39 = vcombine.high %v7613_v44, %v7617_v13  ;;  %v7477_v42 = vld [vmem:[%s10889_s1 + $0x1298] sm:$0xff]  ;;  %v7880_v29 = vcombine.low %v7613_v44, %v7617_v13  ;;  %v183_v44 = vsub.s32 0, %v10013_v23 }
 0x2fa   : > { %6384 = vmatpush2.bf16.msra.mxu0 %v7768_v0  ;;  %v7481_v37 = vld [vmem:[%s10889_s1 + $0x12b8] sm:$0xff] }
 0x2fb   : > { %6385 = vmatprep.subr.bf16.mxu0 %v7761_v22  ;;  %v7605_v35 = vld [vmem:[%s10889_s1 + $0x1698] sm:$0xff]  ;;  %v7745_v50 = vcombine.high %v7477_v42, %v7481_v37  ;;  %v7744_v58 = vcombine.low %v7477_v42, %v7481_v37  ;;  %v10918_v42 = vld [vmem:[#allocation10_spill] sm:$0xff] }
 0x2fc   : > { %6437 = vmatpush2.bf16.msra.mxu1 %v7896_v53  ;;  %v7609_v27 = vld [vmem:[%s10889_s1 + $0x16b8] sm:$0xff]  ;;  %v4049_v37 = vadd.f32 %v10918_v42, %v9933_v60  ;;  %v10924_v60 = vld [vmem:[#allocation14_spill] sm:$0xff] }
 0x2fd   : > { %6438 = vmatprep.subr.bf16.mxu1 %v7889_v34  ;;  %v7873_v7 = vcombine.high %v7605_v35, %v7609_v27  ;;  %v7469_v18 = vld [vmem:[%s10889_s1 + $0x1258] sm:$0xff]  ;;  %v7872_v12 = vcombine.low %v7605_v35, %v7609_v27  ;;  %v10919_v35 = vld [vmem:[#allocation2_spill] sm:$0xff] }
 0x2fe   : > { %6386 = vmatpush2.bf16.msra.mxu0 %v7760_v62  ;;  %v7473_v6 = vld [vmem:[%s10889_s1 + $0x1278] sm:$0xff]  ;;  %v187_v62 = vsub.s32 1, %v10013_v23 }
 0x2ff   : > { %6387 = vmatprep.subr.bf16.mxu0 %v7753_v59  ;;  %v7597_v38 = vld [vmem:[%s10889_s1 + $0x1658] sm:$0xff]  ;;  %v7737_v43 = vcombine.high %v7469_v18, %v7473_v6  ;;  %v7736_v22 = vcombine.low %v7469_v18, %v7473_v6  ;;  %v184_v59 = vrot.slane %v10582_v56, %v183_v44  ;;  %v10922_v18 = vld [vmem:[#allocation3_spill] sm:$0xff] }
 0x300   : > { %6439 = vmatpush2.bf16.msra.mxu1 %v7888_v57  ;;  %v7601_v40 = vld [vmem:[%s10889_s1 + $0x1678] sm:$0xff] }
 0x301   : > { %6440 = vmatprep.subr.bf16.mxu1 %v7881_v39  ;;  %v7865_v24 = vcombine.high %v7597_v38, %v7601_v40  ;;  %v7461_v61 = vld [vmem:[%s10889_s1 + $0x1218] sm:$0xff]  ;;  %v7864_v34 = vcombine.low %v7597_v38, %v7601_v40  ;;  %v188_v39 = vrot.slane %v10582_v56, %v187_v62  ;;  %v2229_v27 = vadd.f32 %v10919_v35, %v184_v59  ;;  %v10931_v35 = vld [vmem:[#allocation6_spill] sm:$0xff] }
 0x302   : > { %6388 = vmatpush2.bf16.msra.mxu0 %v7752_v19  ;;  %v7465_v16 = vld [vmem:[%s10889_s1 + $0x1238] sm:$0xff]  ;;  %v10920_v19 = vld [vmem:[#allocation11_spill] sm:$0xff] }
 0x303   : > { %6389 = vmatprep.subr.bf16.mxu0 %v7745_v50  ;;  %v7589_v0 = vld [vmem:[%s10889_s1 + $0x1618] sm:$0xff]  ;;  %v7729_v41 = vcombine.high %v7461_v61, %v7465_v16  ;;  %v7728_v13 = vcombine.low %v7461_v61, %v7465_v16  ;;  %v2230_v56 = vadd.f32 %v10922_v18, %v188_v39  ;;  %v4385_v6 = vadd.f32 %v4049_v37, %v2229_v27  ;;  %v10927_v61 = vld [vmem:[#allocation16_spill] sm:$0xff] }
 0x304   : > { %6441 = vmatpush2.bf16.msra.mxu1 %v7880_v29  ;;  %v7593_v53 = vld [vmem:[%s10889_s1 + $0x1638] sm:$0xff]  ;;  %v10921_v29 = vld [vmem:[#allocation12_spill] sm:$0xff]  ;;  %v2245_v27 = vadd.f32 %v10931_v35, %v184_v59 }
 0x305   : > { %6442 = vmatprep.subr.bf16.mxu1 %v7873_v7  ;;  %v7857_v30 = vcombine.high %v7589_v0, %v7593_v53  ;;  %v7856_v57 = vcombine.low %v7589_v0, %v7593_v53  ;;  %v4051_v50 = vadd.f32 %v10921_v29, %v10920_v19  ;;  %v10923_v38 = vld [vmem:[#allocation13_spill] sm:$0xff] }
 0x306   : > { %6390 = vmatpush2.bf16.msra.mxu0 %v7744_v58  ;;  %v4053_v40 = vadd.f32 %v10924_v60, %v10923_v38  ;;  %v10929_v44 = vld [vmem:[#allocation17_spill] sm:$0xff]  ;;  %v10934_v38 = vld [vmem:[#allocation7_spill] sm:$0xff] }
 0x307   : > { %6391 = vmatprep.subr.bf16.mxu0 %v7737_v43  ;;  %v10925_v43 = vld [vmem:[#allocation4_spill] sm:$0xff]  ;;  %v2246_v60 = vadd.f32 %v10934_v38, %v188_v39 }
 0x308   : > { %6443 = vmatpush2.bf16.msra.mxu1 %v7872_v12 }
 0x309   : > { %6444 = vmatprep.subr.bf16.mxu1 %v7865_v24  ;;  %v2237_v24 = vadd.f32 %v10925_v43, %v184_v59 }
 0x30a   : > { %6392 = vmatpush2.bf16.msra.mxu0 %v7736_v22 }
 0x30b   : > { %6393 = vmatprep.subr.bf16.mxu0 %v7729_v41 }
 0x30c   : > { %6445 = vmatpush2.bf16.msra.mxu1 %v7864_v34  ;;  %v10928_v34 = vld [vmem:[#allocation5_spill] sm:$0xff] }
 0x30d   : > { %6446 = vmatprep.subr.bf16.mxu1 %v7857_v30  ;;  %v2238_v41 = vadd.f32 %v10928_v34, %v188_v39  ;;  %v4393_v30 = vadd.f32 %v4053_v40, %v2237_v24 }
 0x30e   : > { %6394 = vmatpush2.bf16.msra.mxu0 %v7728_v13  ;;  %v10930_v13 = vld [vmem:[#allocation18_spill] sm:$0xff] }
 0x30f   : > { %v4059_v62 = vadd.f32 %v10930_v13, %v10929_v44 }
 0x310   : > { %6447 = vmatpush2.bf16.msra.mxu1 %v7856_v57 }
 0x311   : > { %v6079_v7 = vpop.f32.mrf.mxu0  ;;  %6396 = vmatmul.mubr.bf16.vlgmr.msra.gmra.mxu0 %v10061_v55 }
 0x312   : > { %6405 = vmatprep.mubr.bf16.mxu0 %v10085_v1  ;;  %v10926_v1 = vld [vmem:[#allocation15_spill] sm:$0xff] }
 0x313   : > { %v6132_v23 = vpop.f32.mrf.mxu1  ;;  %6449 = vmatmul.mubr.bf16.vlgmr.msra.gmra.mxu1 %v10075_v25  ;;  %v6081_v12 = vpop.f32.mrf.mxu0  ;;  %v4386_v25 = vadd.f32 %v4051_v50, %v2230_v56  ;;  %v4055_v16 = vadd.f32 %v10927_v61, %v10926_v1  ;;  %v10932_v50 = vld [vmem:[#allocation19_spill] sm:$0xff]  ;;  %v10936_v1 = vld [vmem:[#allocation8_spill] sm:$0xff] }
 0x314   : > { %v6133_v58 = vadd.f32 %v6132_v23, %v6079_v7  ;;  %6458 = vmatprep.mubr.bf16.mxu1 %v10097_v9  ;;  %v10933_v7 = vld [vmem:[#allocation20_spill] sm:$0xff]  ;;  %v2253_v61 = vadd.f32 %v10936_v1, %v184_v59 }
 0x315   : > { %v6134_v55 = vpop.f32.mrf.mxu1  ;;  %v6083_v22 = vpop.f32.mrf.mxu0  ;;  %v4394_v29 = vadd.f32 %v4055_v16, %v2238_v41  ;;  %v4061_v23 = vadd.f32 %v10933_v7, %v10932_v50  ;;  %v10938_v41 = vld [vmem:[#allocation9_spill] sm:$0xff]  ;;  %v10939_v50 = vld [vmem:[#allocation23_spill] sm:$0xff] }
 0x316   : > { %v6469_v0 = vadd.f32 %v6133_v58, %v4385_v6  ;;  %v6135_v53 = vadd.f32 %v6134_v55, %v6081_v12  ;;  %v4401_v58 = vadd.f32 %v4059_v62, %v2245_v27  ;;  %v10935_v12 = vld [vmem:[#allocation21_spill] sm:$0xff] }
 0x317   : > { %v6136_v9 = vpop.f32.mrf.mxu1  ;;  %v6085_v37 = vpop.f32.mrf.mxu0  ;;  %v4063_v43 = vadd.f32 %v10935_v12, %v10040_v10 }
 0x318   : > { %6501 = vst [vmem:[%s10810_s30] sm:$0xff] %v6469_v0  ;;  %v6470_v57 = vadd.f32 %v6135_v53, %v4386_v25  ;;  %v6137_v42 = vadd.f32 %v6136_v9, %v6083_v22  ;;  %v4402_v0 = vadd.f32 %v4061_v23, %v2246_v60  ;;  %v2254_v9 = vadd.f32 %v10938_v41, %v188_v39 }
 0x319   : > { %v6138_v19 = vpop.f32.mrf.mxu1  ;;  %v6089_v6 = vpop.f32.mrf.mxu0  ;;  %6406 = vmatmul.mubr.bf16.gmra.mxu0 %v10120_v52  ;;  %v10937_v52 = vld [vmem:[#allocation22_spill] sm:$0xff] }
 0x31a   : > { %6502 = vst [vmem:[%s10810_s30 + $0x8] sm:$0xff] %v6470_v57  ;;  %v6477_v18 = vadd.f32 %v6137_v42, %v4393_v30  ;;  %v6139_v56 = vadd.f32 %v6138_v19, %v6085_v37  ;;  %v4065_v53 = vadd.f32 %v10937_v52, %v10081_v32  ;;  %v4409_v30 = vadd.f32 %v4063_v43, %v2253_v61 }
 0x31b   : > { %v6142_v40 = vpop.f32.mrf.mxu1  ;;  %6459 = vmatmul.mubr.bf16.gmra.mxu1 %v10130_v26  ;;  %v6091_v25 = vpop.f32.mrf.mxu0 }
 0x31c   : > { %6509 = vst [vmem:[%s10810_s30 + $0x40] sm:$0xff] %v6477_v18  ;;  %v6478_v24 = vadd.f32 %v6139_v56, %v4394_v29  ;;  %v6143_v55 = vadd.f32 %v6142_v40, %v6089_v6  ;;  %v4410_v57 = vadd.f32 %v4065_v53, %v2254_v9 }
 0x31d   : > { %v6144_v16 = vpop.f32.mrf.mxu1  ;;  %v6093_v34 = vpop.f32.mrf.mxu0 }
 0x31e   : > { %6510 = vst [vmem:[%s10810_s30 + $0x48] sm:$0xff] %v6478_v24  ;;  %v6485_v26 = vadd.f32 %v6143_v55, %v4401_v58  ;;  %v6145_v22 = vadd.f32 %v6144_v16, %v6091_v25 }
 0x31f   : > { %v6146_v10 = vpop.f32.mrf.mxu1  ;;  %v6095_v59 = vpop.f32.mrf.mxu0 }
 0x320   : > { %6517 = vst [vmem:[%s10810_s30 + $0x80] sm:$0xff] %v6485_v26  ;;  %v6486_v44 = vadd.f32 %v6145_v22, %v4402_v0  ;;  %v6147_v13 = vadd.f32 %v6146_v10, %v6093_v34 }
 0x321   : > { %v6148_v62 = vpop.f32.mrf.mxu1 }
 0x322   : > { %6518 = vst [vmem:[%s10810_s30 + $0x88] sm:$0xff] %v6486_v44  ;;  %v6493_v42 = vadd.f32 %v6147_v13, %v4409_v30  ;;  %v6149_v32 = vadd.f32 %v6148_v62, %v6095_v59 }
 0x324   : > { %6525 = vst [vmem:[%s10810_s30 + $0xc0] sm:$0xff] %v6493_v42  ;;  %v6494_v37 = vadd.f32 %v6149_v32, %v4410_v57 }
 0x326   : > { %6526 = vst [vmem:[%s10810_s30 + $0xc8] sm:$0xff] %v6494_v37 }
 0x351   : > { %v6185_v35 = vpop.f32.mrf.mxu0 }
 0x353   : > { %v6238_v27 = vpop.f32.mrf.mxu1  ;;  %v6187_v29 = vpop.f32.mrf.mxu0 }
 0x354   : > { %v6239_v19 = vadd.f32 %v6238_v27, %v6185_v35 }
 0x355   : > { %v6240_v39 = vpop.f32.mrf.mxu1  ;;  %v6189_v18 = vpop.f32.mrf.mxu0 }
 0x356   : > { %v6471_v7 = vadd.f32 %v6239_v19, %v10939_v50  ;;  %v6241_v23 = vadd.f32 %v6240_v39, %v6187_v29 }
 0x357   : > { %v6242_v56 = vpop.f32.mrf.mxu1  ;;  %v6191_v60 = vpop.f32.mrf.mxu0 }
 0x358   : > { %6503 = vst [vmem:[%s10810_s30 + $0x10] sm:$0xff] %v6471_v7  ;;  %v6472_v6 = vadd.f32 %v6241_v23, %v10132_v11  ;;  %v6243_v38 = vadd.f32 %v6242_v56, %v6189_v18 }
 0x359   : > { %v6244_v40 = vpop.f32.mrf.mxu1  ;;  %v6195_v43 = vpop.f32.mrf.mxu0 }
 0x35a   : > { %6504 = vst [vmem:[%s10810_s30 + $0x18] sm:$0xff] %v6472_v6  ;;  %v6479_v58 = vadd.f32 %v6243_v38, %v10142_v21  ;;  %v6245_v12 = vadd.f32 %v6244_v40, %v6191_v60 }
 0x35b   : > { %v6248_v24 = vpop.f32.mrf.mxu1  ;;  %v6197_v1 = vpop.f32.mrf.mxu0 }
 0x35c   : > { %6511 = vst [vmem:[%s10810_s30 + $0x50] sm:$0xff] %v6479_v58  ;;  %v6480_v55 = vadd.f32 %v6245_v12, %v10154_v14  ;;  %v6249_v25 = vadd.f32 %v6248_v24, %v6195_v43 }
 0x35d   : > { %v6250_v61 = vpop.f32.mrf.mxu1  ;;  %v6199_v0 = vpop.f32.mrf.mxu0 }
 0x35e   : > { %6512 = vst [vmem:[%s10810_s30 + $0x58] sm:$0xff] %v6480_v55  ;;  %v6487_v11 = vadd.f32 %v6249_v25, %v10165_v48  ;;  %v6251_v16 = vadd.f32 %v6250_v61, %v6197_v1 }
 0x35f   : > { %v6252_v52 = vpop.f32.mrf.mxu1  ;;  %v6201_v26 = vpop.f32.mrf.mxu0 }
 0x360   : > { %6519 = vst [vmem:[%s10810_s30 + $0x90] sm:$0xff] %v6487_v11  ;;  %v6488_v21 = vadd.f32 %v6251_v16, %v10176_v46  ;;  %v6253_v53 = vadd.f32 %v6252_v52, %v6199_v0 }
 0x361   : > { %v6254_v22 = vpop.f32.mrf.mxu1 }
 0x362   : > { %6520 = vst [vmem:[%s10810_s30 + $0x98] sm:$0xff] %v6488_v21  ;;  %v6495_v14 = vadd.f32 %v6253_v53, %v10186_v15  ;;  %v6255_v34 = vadd.f32 %v6254_v22, %v6201_v26 }
 0x364   : > { %6527 = vst [vmem:[%s10810_s30 + $0xd0] sm:$0xff] %v6495_v14  ;;  %v6496_v10 = vadd.f32 %v6255_v34, %v10194_v33 }
 0x366   : > { %6528 = vst [vmem:[%s10810_s30 + $0xd8] sm:$0xff] %v6496_v10 }
 0x391   : > { %v6291_v48 = vpop.f32.mrf.mxu0 }
 0x393   : > { %v6344_v41 = vpop.f32.mrf.mxu1  ;;  %v6293_v30 = vpop.f32.mrf.mxu0 }
 0x394   : > { %v6345_v9 = vadd.f32 %v6344_v41, %v6291_v48 }
 0x395   : > { %v6346_v44 = vpop.f32.mrf.mxu1  ;;  %v6295_v59 = vpop.f32.mrf.mxu0 }
 0x396   : > { %v6473_v46 = vadd.f32 %v6345_v9, %v10361_v28  ;;  %v6347_v13 = vadd.f32 %v6346_v44, %v6293_v30 }
 0x397   : > { %v6348_v62 = vpop.f32.mrf.mxu1  ;;  %v6297_v42 = vpop.f32.mrf.mxu0 }
 0x398   : > { %6505 = vst [vmem:[%s10810_s30 + $0x20] sm:$0xff] %v6473_v46  ;;  %v6474_v15 = vadd.f32 %v6347_v13, %v10372_v36  ;;  %v6349_v57 = vadd.f32 %v6348_v62, %v6295_v59 }
 0x399   : > { %v6350_v33 = vpop.f32.mrf.mxu1  ;;  %v6301_v35 = vpop.f32.mrf.mxu0 }
 0x39a   : > { %6506 = vst [vmem:[%s10810_s30 + $0x28] sm:$0xff] %v6474_v15  ;;  %v6481_v32 = vadd.f32 %v6349_v57, %v10382_v20  ;;  %v6351_v37 = vadd.f32 %v6350_v33, %v6297_v42 }
 0x39b   : > { %v6354_v27 = vpop.f32.mrf.mxu1  ;;  %v6303_v29 = vpop.f32.mrf.mxu0 }
 0x39c   : > { %6513 = vst [vmem:[%s10810_s30 + $0x60] sm:$0xff] %v6481_v32  ;;  %v6482_v28 = vadd.f32 %v6351_v37, %v10394_v8  ;;  %v6355_v19 = vadd.f32 %v6354_v27, %v6301_v35 }
 0x39d   : > { %v6356_v39 = vpop.f32.mrf.mxu1  ;;  %v6305_v7 = vpop.f32.mrf.mxu0 }
 0x39e   : > { %6514 = vst [vmem:[%s10810_s30 + $0x68] sm:$0xff] %v6482_v28  ;;  %v6489_v36 = vadd.f32 %v6355_v19, %v10405_v45  ;;  %v6357_v50 = vadd.f32 %v6356_v39, %v6303_v29 }
 0x39f   : > { %v6358_v23 = vpop.f32.mrf.mxu1  ;;  %v6307_v56 = vpop.f32.mrf.mxu0 }
 0x3a0   : > { %6521 = vst [vmem:[%s10810_s30 + $0xa0] sm:$0xff] %v6489_v36  ;;  %v6490_v20 = vadd.f32 %v6357_v50, %v10416_v49  ;;  %v6359_v18 = vadd.f32 %v6358_v23, %v6305_v7 }
 0x3a1   : > { %v6360_v6 = vpop.f32.mrf.mxu1 }
 0x3a2   : > { %6522 = vst [vmem:[%s10810_s30 + $0xa8] sm:$0xff] %v6490_v20  ;;  %v6497_v8 = vadd.f32 %v6359_v18, %v10426_v31  ;;  %v6361_v38 = vadd.f32 %v6360_v6, %v6307_v56 }
 0x3a4   : > { %6529 = vst [vmem:[%s10810_s30 + $0xe0] sm:$0xff] %v6497_v8  ;;  %v6498_v60 = vadd.f32 %v6361_v38, %v10434_v4 }
 0x3a6   : > { %6530 = vst [vmem:[%s10810_s30 + $0xe8] sm:$0xff] %v6498_v60 }
 0x3d1   : > { %v6397_v45 = vpop.f32.mrf.mxu0 }
 0x3d3   : > { %v6450_v40 = vpop.f32.mrf.mxu1  ;;  %v6399_v12 = vpop.f32.mrf.mxu0 }
 0x3d4   : > { %v6451_v58 = vadd.f32 %v6450_v40, %v6397_v45 }
 0x3d5   : > { %v6452_v43 = vpop.f32.mrf.mxu1  ;;  %v6401_v55 = vpop.f32.mrf.mxu0 }
 0x3d6   : > { %v6475_v49 = vadd.f32 %v6451_v58, %v10606_v5  ;;  %v6453_v24 = vadd.f32 %v6452_v43, %v6399_v12 }
 0x3d7   : > { %v6454_v25 = vpop.f32.mrf.mxu1  ;;  %v6403_v61 = vpop.f32.mrf.mxu0 }
 0x3d8   : > { %6507 = vst [vmem:[%s10810_s30 + $0x30] sm:$0xff] %v6475_v49  ;;  %v6476_v31 = vadd.f32 %v6453_v24, %v10617_v3  ;;  %v6455_v1 = vadd.f32 %v6454_v25, %v6401_v55 }
 0x3d9   : > { %v6456_v4 = vpop.f32.mrf.mxu1  ;;  %v6407_v0 = vpop.f32.mrf.mxu0 }
 0x3da   : > { %6508 = vst [vmem:[%s10810_s30 + $0x38] sm:$0xff] %v6476_v31  ;;  %v6483_v11 = vadd.f32 %v6455_v1, %v10627_v2  ;;  %v6457_v16 = vadd.f32 %v6456_v4, %v6403_v61 }
 0x3db   : > { %v6460_v52 = vpop.f32.mrf.mxu1  ;;  %v6409_v53 = vpop.f32.mrf.mxu0 }
 0x3dc   : > { %6515 = vst [vmem:[%s10810_s30 + $0x70] sm:$0xff] %v6483_v11  ;;  %v6484_v5 = vadd.f32 %v6457_v16, %v10639_v54  ;;  %v6461_v21 = vadd.f32 %v6460_v52, %v6407_v0 }
 0x3dd   : > { %v6462_v26 = vpop.f32.mrf.mxu1  ;;  %v6411_v14 = vpop.f32.mrf.mxu0 }
 0x3de   : > { %6516 = vst [vmem:[%s10810_s30 + $0x78] sm:$0xff] %v6484_v5  ;;  %v6491_v3 = vadd.f32 %v6461_v21, %v10650_v17  ;;  %v6463_v22 = vadd.f32 %v6462_v26, %v6409_v53 }
 0x3df   : > { %v6464_v34 = vpop.f32.mrf.mxu1  ;;  %v6413_v48 = vpop.f32.mrf.mxu0 }
 0x3e0   : > { %6523 = vst [vmem:[%s10810_s30 + $0xb0] sm:$0xff] %v6491_v3  ;;  %v6492_v2 = vadd.f32 %v6463_v22, %v10661_v63  ;;  %v6465_v10 = vadd.f32 %v6464_v34, %v6411_v14 }
 0x3e1   : > { %v6466_v41 = vpop.f32.mrf.mxu1 }
 0x3e2   : > { %6524 = vst [vmem:[%s10810_s30 + $0xb8] sm:$0xff] %v6492_v2  ;;  %v6499_v54 = vadd.f32 %v6465_v10, %v10671_v47  ;;  %v6467_v9 = vadd.f32 %v6466_v41, %v6413_v48 }
 0x3e4   : > { %6531 = vst [vmem:[%s10810_s30 + $0xf0] sm:$0xff] %v6499_v54  ;;  %v6500_v30 = vadd.f32 %v6467_v9, %v10679_v51 }
 0x3e6   : > { %6532 = vst [vmem:[%s10810_s30 + $0xf8] sm:$0xff] %v6500_v30 }
 0x3e7 PF: > { %s13_s12 = sadd.s32 1, %s7941_s12  }
 0x3e8   : > { %p10_p4 = scmp.ge.s32.totalorder %s13_s12, 4  }
 0x3ea   :  { %12 = sbr.rel (!%p10_p4) target bundleno = 1 (0x1), region = 64 }

</bundles_post_ra>
